<compile_context>
chip_gen: v5e
topology: v5e:2x2
jax: 0.10.0
libtpu: 0.0.40
codegen_flags: <defaults>
</compile_context>

<pallas_src>
import math

import jax
import jax.numpy as jnp
from jax.experimental import pallas as pl
from jax.experimental.pallas import tpu as pltpu


_VMEM_LIMIT_BYTES = 32 * 1024 * 1024   # safe on v5e/v6e (128 MiB) and v7x (64 MiB)

# Fixed geometry implied by the PyTorch module (fc1 = Linear(512, 64) => 32x32 input):
#   name: (Wp = padded input width, Wo = output width)
_CONV_GEOM = {"conv1": (36, 16), "conv2": (20, 8), "conv3": (12, 4)}


# --------------------------------------------------------------------------- #
# helpers
# --------------------------------------------------------------------------- #
def _row_tile(m, target):
    """Largest divisor of m that is a multiple of 8, <= target, and (when m is
    big enough) leaves at least 2 grid steps so both v7x TensorCores get work.
    Falls back to m itself (full-array block => (8,128) rule satisfied)."""
    limit = min(target, m // 2) if m >= 16 else m
    best = None
    for d in range(1, m + 1):
        if m % d == 0 and d <= limit and d % 8 == 0:
            best = d
    return best if best is not None else m


def _h_im2col(x):
    """x: (N, H, W, C) NHWC -> (N*Ho, 5*Wp*C) row panel for a 5x5/s2/p2 conv.

    Row (n*Ho + h_o), column (di*Wp + wp)*C + c  ==  x_padded[n, 2*h_o + di, wp, c].
    Only the H axis is unrolled (2.5x inflation); the W-axis taps live in the
    banded weight, so the kernel needs no slicing, reshaping or relayouts at all.
    """
    N, H, W, C = x.shape
    Ho = H // 2
    xp = jnp.pad(x, ((0, 0), (2, 2), (2, 2), (0, 0)))
    Wp = W + 4
    rows = [xp[:, di:di + 2 * Ho:2] for di in range(5)]      # each (N, Ho, Wp, C)
    y = jnp.stack(rows, axis=2)                              # (N, Ho, 5, Wp, C)
    return y.reshape(N * Ho, 5 * Wp * C)


def _banded_conv_weight(w, Wp, Wo):
    """w: (O, C, 5, 5) torch layout -> banded matmul weight (5*Wp*C, Wo*O) with

        Wb[(di*Wp + wp)*C + c, w_o*O + o] = w[o, c, di, dj]  if wp == 2*w_o + dj

    Folding the W-axis taps / output columns into the (K, N) dims of one matmul
    makes both the kernel input and output lane-dense and turns the whole conv
    into a single MXU contraction per row tile.
    """
    O, C, kh, kw = w.shape
    wp_idx = jnp.arange(Wp)[:, None, None]
    wo_idx = jnp.arange(Wo)[None, :, None]
    dj_idx = jnp.arange(kw)[None, None, :]
    mask = (wp_idx == 2 * wo_idx + dj_idx).astype(w.dtype)   # (Wp, Wo, kw)
    # Wb[di, wp, c, w_o, o] = sum_dj mask[wp, w_o, dj] * w[o, c, di, dj]
    wb = jnp.einsum("pwj,ocij->ipcwo", mask, w)              # (5, Wp, C, Wo, O)
    return wb.reshape(kh * Wp * C, Wo * O)


# --------------------------------------------------------------------------- #
# conv kernel: one lane-dense matmul + bias + ReLU per row tile
# --------------------------------------------------------------------------- #
def _conv_row_kernel(x_ref, w_ref, b_ref, o_ref):
    # x_ref: (tm, K)      bf16  H-im2col row panel (lane-dense K)
    # w_ref: (K, Wo*O)    bf16  banded weights (taps folded into K, cols into N)
    # b_ref: (1, Wo*O)    f32
    # o_ref: (tm, Wo*O)   bf16  lane-dense output (full-width stores)
    acc = jnp.dot(x_ref[...], w_ref[...], preferred_element_type=jnp.float32)
    o_ref[...] = jnp.maximum(acc + b_ref[...], 0.0).astype(o_ref.dtype)


def conv5x5s2_relu(x, wb, b_row, *, rows_target):
    """x: (N,H,W,C) bf16 NHWC; wb: (5*Wp*C, Wo*O) bf16; b_row: (1, Wo*O) f32.

    5x5 conv, stride 2, padding 2, bias, ReLU.  Returns (N, H//2, W//2, O) bf16.
    """
    N, H, W, C = x.shape
    Ho, Wo = H // 2, W // 2
    Kdim, Nout = wb.shape
    assert Kdim == 5 * (W + 4) * C, "banded weight does not match input geometry"
    O = Nout // Wo

    x2 = _h_im2col(x)                                        # (N*Ho, K)
    M = N * Ho
    tm = _row_tile(M, rows_target)

    out = pl.pallas_call(
        _conv_row_kernel,
        out_shape=jax.ShapeDtypeStruct((M, Nout), jnp.bfloat16),
        grid=(M // tm,),
        in_specs=[
            pl.BlockSpec((tm, Kdim), lambda i: (i, 0)),
            pl.BlockSpec((Kdim, Nout), lambda i: (0, 0)),
            pl.BlockSpec((1, Nout), lambda i: (0, 0)),
        ],
        out_specs=pl.BlockSpec((tm, Nout), lambda i: (i, 0)),
        compiler_params=pltpu.CompilerParams(
            dimension_semantics=("parallel",),
            vmem_limit_bytes=_VMEM_LIMIT_BYTES,
        ),
    )(x2, wb, b_row)
    # (N*Ho, Wo*O) -> (N, Ho, Wo, O): row-major-preserving reshape, free.
    return out.reshape(N, Ho, Wo, O)


# --------------------------------------------------------------------------- #
# fused fc1 -> ReLU -> fc2 -> ReLU -> fc3 kernel (one launch, no HBM intermediates)
# --------------------------------------------------------------------------- #
def _mlp_kernel(x_ref, w1_ref, b1_ref, w2_ref, b2_ref, w3_ref, b3_ref, o_ref):
    h = jnp.dot(x_ref[...], w1_ref[...], preferred_element_type=jnp.float32)
    h = jnp.maximum(h + b1_ref[...], 0.0)
    h = jnp.dot(h.astype(w2_ref.dtype), w2_ref[...], preferred_element_type=jnp.float32)
    h = jnp.maximum(h + b2_ref[...], 0.0)
    z = jnp.dot(h.astype(w3_ref.dtype), w3_ref[...], preferred_element_type=jnp.float32)
    o_ref[...] = z + b3_ref[...]                             # o_ref is f32: no cast


def mlp_head(x, w1, b1, w2, b2, w3, b3, *, rows_target=2048):
    N, K = x.shape
    tm = _row_tile(N, rows_target)
    return pl.pallas_call(
        _mlp_kernel,
        out_shape=jax.ShapeDtypeStruct((N, w3.shape[-1]), jnp.float32),
        grid=(N // tm,),
        in_specs=[
            pl.BlockSpec((tm, K), lambda i: (i, 0)),
            pl.BlockSpec(w1.shape, lambda i: (0, 0)),
            pl.BlockSpec(b1.shape, lambda i: (0, 0)),
            pl.BlockSpec(w2.shape, lambda i: (0, 0)),
            pl.BlockSpec(b2.shape, lambda i: (0, 0)),
            pl.BlockSpec(w3.shape, lambda i: (0, 0)),
            pl.BlockSpec(b3.shape, lambda i: (0, 0)),
        ],
        out_specs=pl.BlockSpec((tm, w3.shape[-1]), lambda i: (i, 0)),
        compiler_params=pltpu.CompilerParams(
            dimension_semantics=("parallel",),
            vmem_limit_bytes=_VMEM_LIMIT_BYTES,
        ),
    )(x, w1, b1, w2, b2, w3, b3)


# --------------------------------------------------------------------------- #
# parameters: PyTorch-layout init (same distributions as CNN.init_weights),
# then a one-time conversion to kernel-ready layouts.
# --------------------------------------------------------------------------- #
def init_params(key):
    ks = jax.random.split(key, 6)
    p = {}
    p["conv1_w"] = jax.random.normal(ks[0], (16, 3, 5, 5), jnp.float32) / math.sqrt(25 * 3)
    p["conv1_b"] = jnp.zeros((16,), jnp.float32)
    p["conv2_w"] = jax.random.normal(ks[1], (64, 16, 5, 5), jnp.float32) / math.sqrt(25 * 16)
    p["conv2_b"] = jnp.zeros((64,), jnp.float32)
    p["conv3_w"] = jax.random.normal(ks[2], (32, 64, 5, 5), jnp.float32) / math.sqrt(25 * 64)
    p["conv3_b"] = jnp.zeros((32,), jnp.float32)
    # torch Linear stores (out_features, in_features); init std = 1/sqrt(in)
    p["fc1_w"] = jax.random.normal(ks[3], (64, 512), jnp.float32) / math.sqrt(512)
    p["fc1_b"] = jnp.zeros((64,), jnp.float32)
    p["fc2_w"] = jax.random.normal(ks[4], (32, 64), jnp.float32) / math.sqrt(64)
    p["fc2_b"] = jnp.zeros((32,), jnp.float32)
    p["fc3_w"] = jax.random.normal(ks[5], (5, 32), jnp.float32) / math.sqrt(32)
    p["fc3_b"] = jnp.zeros((5,), jnp.float32)
    return p


def prepare_params(p):
    """One-time conversion of PyTorch-layout params to kernel-ready layouts."""
    out = {}
    for name, (Wp, Wo) in _CONV_GEOM.items():
        w, b = p[name + "_w"], p[name + "_b"]
        out[name + "_w"] = _banded_conv_weight(w, Wp, Wo).astype(jnp.bfloat16)
        out[name + "_b"] = jnp.tile(b, Wo)[None, :].astype(jnp.float32)   # (1, Wo*O)
    # fc1: torch flattens NCHW (c,h,w); our activations flatten NHWC (h,w,c).
    # Permute fc1's input dimension once so results match PyTorch exactly.
    w1 = p["fc1_w"].T.reshape(32, 4, 4, 64).transpose(1, 2, 0, 3).reshape(512, 64)
    out["fc1_w"] = w1.astype(jnp.bfloat16)
    out["fc1_b"] = p["fc1_b"][None, :].astype(jnp.float32)
    out["fc2_w"] = p["fc2_w"].T.astype(jnp.bfloat16)         # (64, 32)
    out["fc2_b"] = p["fc2_b"][None, :].astype(jnp.float32)
    out["fc3_w"] = p["fc3_w"].T.astype(jnp.bfloat16)         # (32, 5)
    out["fc3_b"] = p["fc3_b"][None, :].astype(jnp.float32)
    return out


# --------------------------------------------------------------------------- #
# forward pass (matches CNN.forward)
# --------------------------------------------------------------------------- #
@jax.jit
def cnn_forward(params, x):
    # x: (N, 3, 32, 32) NCHW f32 -> (N, 5) f32
    N = x.shape[0]
    h = x.transpose(0, 2, 3, 1).astype(jnp.bfloat16)                       # NHWC bf16, once
    h = conv5x5s2_relu(h, params["conv1_w"], params["conv1_b"], rows_target=2048)  # (N,16,16,16)
    h = conv5x5s2_relu(h, params["conv2_w"], params["conv2_b"], rows_target=1024)  # (N, 8, 8,64)
    h = conv5x5s2_relu(h, params["conv3_w"], params["conv3_b"], rows_target=512)   # (N, 4, 4,32)
    h = h.reshape(N, 512)                                                  # NHWC flatten, free
    return mlp_head(h, params["fc1_w"], params["fc1_b"],
                    params["fc2_w"], params["fc2_b"],
                    params["fc3_w"], params["fc3_b"])                      # (N, 5) f32


if __name__ == "__main__":
    key = jax.random.PRNGKey(0)
    pkey, xkey = jax.random.split(key)
    params = prepare_params(init_params(pkey))
    # 32x32 spatial / 3 channels so the flatten yields 512 = 32 * 4 * 4.
    x = jax.random.normal(xkey, (2, 3, 32, 32), jnp.float32)
    z = cnn_forward(params, x)
    jax.block_until_ready(z)
    assert z.shape == (2, 5)
    assert bool(jnp.all(jnp.isfinite(z)))
    print("KERNEL_OK")
</pallas_src>

<mosaic_0001>
module attributes {stable_mosaic.version = 11 : i64} {
  func.func @_conv_row_kernel(%arg0: i32, %arg1: memref<16x540xbf16, #tpu.memory_space<vmem>>, %arg2: memref<540x256xbf16, #tpu.memory_space<vmem>>, %arg3: memref<1x256xf32, #tpu.memory_space<vmem>>, %arg4: memref<16x256xbf16, #tpu.memory_space<vmem>>) attributes {dimension_semantics = [#tpu.dimension_semantics<parallel>], iteration_bounds = array<i64: 2>, scalar_prefetch = 0 : i64, scratch_operands = 0 : i64, tpu.core_type = #tpu.core_type<tc>, window_params = [{transform_indices = @transform_0, window_bounds = array<i64: 16, 540>}, {pipeline_mode = #tpu.pipeline_mode<synchronous>, transform_indices = @transform_1, window_bounds = array<i64: 540, 256>}, {pipeline_mode = #tpu.pipeline_mode<synchronous>, transform_indices = @transform_2, window_bounds = array<i64: 1, 256>}, {transform_indices = @transform_3, window_bounds = array<i64: 16, 256>}]} {
    %c0 = arith.constant 0 : index
    %c0_0 = arith.constant 0 : index
    %0 = vector.load %arg1[%c0, %c0_0] : memref<16x540xbf16, #tpu.memory_space<vmem>>, vector<16x540xbf16>
    %c0_1 = arith.constant 0 : index
    %c0_2 = arith.constant 0 : index
    %1 = vector.load %arg2[%c0_1, %c0_2] : memref<540x256xbf16, #tpu.memory_space<vmem>>, vector<540x256xbf16>
    %cst = arith.constant dense<0.000000e+00> : vector<16x256xf32>
    %2 = tpu.matmul %0, %1, %cst {dimension_numbers = #tpu.dot_dimension_numbers<[1], [0], [0], [1], [0, 0, 1, 1], [], []>} : vector<16x540xbf16>, vector<540x256xbf16>, vector<16x256xf32> -> vector<16x256xf32>
    %c0_3 = arith.constant 0 : index
    %c0_4 = arith.constant 0 : index
    %3 = vector.load %arg3[%c0_3, %c0_4] : memref<1x256xf32, #tpu.memory_space<vmem>>, vector<1x256xf32>
    %4 = vector.broadcast %3 : vector<1x256xf32> to vector<16x256xf32>
    %5 = arith.addf %2, %4 : vector<16x256xf32>
    %cst_5 = arith.constant 0.000000e+00 : f32
    %6 = vector.broadcast %cst_5 : f32 to vector<16x256xf32>
    %7 = arith.maximumf %5, %6 : vector<16x256xf32>
    %8 = arith.truncf %7 : vector<16x256xf32> to vector<16x256xbf16>
    %c0_6 = arith.constant 0 : index
    %c0_7 = arith.constant 0 : index
    %9 = vector.load %arg4[%c0_6, %c0_7] : memref<16x256xbf16, #tpu.memory_space<vmem>>, vector<16x256xbf16>
    tpu.vector_store %arg4[%c0_6, %c0_7], %8 {strides = array<i32>} : memref<16x256xbf16, #tpu.memory_space<vmem>>, vector<16x256xbf16>,
    return
  }
  func.func @transform_0(%arg0: i32) -> (i32, i32) {
    %c0_i32 = arith.constant 0 : i32
    %c0_i32_0 = arith.constant 0 : i32
    return %arg0, %c0_i32 : i32, i32
  }
  func.func @transform_1(%arg0: i32) -> (i32, i32) {
    %c0_i32 = arith.constant 0 : i32
    %c0_i32_0 = arith.constant 0 : i32
    %c0_i32_1 = arith.constant 0 : i32
    return %c0_i32, %c0_i32_0 : i32, i32
  }
  func.func @transform_2(%arg0: i32) -> (i32, i32) {
    %c0_i32 = arith.constant 0 : i32
    %c0_i32_0 = arith.constant 0 : i32
    %c0_i32_1 = arith.constant 0 : i32
    return %c0_i32, %c0_i32_0 : i32, i32
  }
  func.func @transform_3(%arg0: i32) -> (i32, i32) {
    %c0_i32 = arith.constant 0 : i32
    %c0_i32_0 = arith.constant 0 : i32
    return %arg0, %c0_i32 : i32, i32
  }
}

module attributes {stable_mosaic.version = 11 : i64} {
  func.func @_conv_row_kernel(%arg0: i32, %arg1: memref<8x1600xbf16, #tpu.memory_space<vmem>>, %arg2: memref<1600x512xbf16, #tpu.memory_space<vmem>>, %arg3: memref<1x512xf32, #tpu.memory_space<vmem>>, %arg4: memref<8x512xbf16, #tpu.memory_space<vmem>>) attributes {dimension_semantics = [#tpu.dimension_semantics<parallel>], iteration_bounds = array<i64: 2>, scalar_prefetch = 0 : i64, scratch_operands = 0 : i64, tpu.core_type = #tpu.core_type<tc>, window_params = [{transform_indices = @transform_0, window_bounds = array<i64: 8, 1600>}, {pipeline_mode = #tpu.pipeline_mode<synchronous>, transform_indices = @transform_1, window_bounds = array<i64: 1600, 512>}, {pipeline_mode = #tpu.pipeline_mode<synchronous>, transform_indices = @transform_2, window_bounds = array<i64: 1, 512>}, {transform_indices = @transform_3, window_bounds = array<i64: 8, 512>}]} {
    %c0 = arith.constant 0 : index
    %c0_0 = arith.constant 0 : index
    %0 = vector.load %arg1[%c0, %c0_0] : memref<8x1600xbf16, #tpu.memory_space<vmem>>, vector<8x1600xbf16>
    %c0_1 = arith.constant 0 : index
    %c0_2 = arith.constant 0 : index
    %1 = vector.load %arg2[%c0_1, %c0_2] : memref<1600x512xbf16, #tpu.memory_space<vmem>>, vector<1600x512xbf16>
    %cst = arith.constant dense<0.000000e+00> : vector<8x512xf32>
    %2 = tpu.matmul %0, %1, %cst {dimension_numbers = #tpu.dot_dimension_numbers<[1], [0], [0], [1], [0, 0, 1, 1], [], []>} : vector<8x1600xbf16>, vector<1600x512xbf16>, vector<8x512xf32> -> vector<8x512xf32>
    %c0_3 = arith.constant 0 : index
    %c0_4 = arith.constant 0 : index
    %3 = vector.load %arg3[%c0_3, %c0_4] : memref<1x512xf32, #tpu.memory_space<vmem>>, vector<1x512xf32>
    %4 = vector.broadcast %3 : vector<1x512xf32> to vector<8x512xf32>
    %5 = arith.addf %2, %4 : vector<8x512xf32>
    %cst_5 = arith.constant 0.000000e+00 : f32
    %6 = vector.broadcast %cst_5 : f32 to vector<8x512xf32>
    %7 = arith.maximumf %5, %6 : vector<8x512xf32>
    %8 = arith.truncf %7 : vector<8x512xf32> to vector<8x512xbf16>
    %c0_6 = arith.constant 0 : index
    %c0_7 = arith.constant 0 : index
    %9 = vector.load %arg4[%c0_6, %c0_7] : memref<8x512xbf16, #tpu.memory_space<vmem>>, vector<8x512xbf16>
    tpu.vector_store %arg4[%c0_6, %c0_7], %8 {strides = array<i32>} : memref<8x512xbf16, #tpu.memory_space<vmem>>, vector<8x512xbf16>,
    return
  }
  func.func @transform_0(%arg0: i32) -> (i32, i32) {
    %c0_i32 = arith.constant 0 : i32
    %c0_i32_0 = arith.constant 0 : i32
    return %arg0, %c0_i32 : i32, i32
  }
  func.func @transform_1(%arg0: i32) -> (i32, i32) {
    %c0_i32 = arith.constant 0 : i32
    %c0_i32_0 = arith.constant 0 : i32
    %c0_i32_1 = arith.constant 0 : i32
    return %c0_i32, %c0_i32_0 : i32, i32
  }
  func.func @transform_2(%arg0: i32) -> (i32, i32) {
    %c0_i32 = arith.constant 0 : i32
    %c0_i32_0 = arith.constant 0 : i32
    %c0_i32_1 = arith.constant 0 : i32
    return %c0_i32, %c0_i32_0 : i32, i32
  }
  func.func @transform_3(%arg0: i32) -> (i32, i32) {
    %c0_i32 = arith.constant 0 : i32
    %c0_i32_0 = arith.constant 0 : i32
    return %arg0, %c0_i32 : i32, i32
  }
}

module attributes {stable_mosaic.version = 11 : i64} {
  func.func @_conv_row_kernel(%arg0: i32, %arg1: memref<8x3840xbf16, #tpu.memory_space<vmem>>, %arg2: memref<3840x128xbf16, #tpu.memory_space<vmem>>, %arg3: memref<1x128xf32, #tpu.memory_space<vmem>>, %arg4: memref<8x128xbf16, #tpu.memory_space<vmem>>) attributes {dimension_semantics = [#tpu.dimension_semantics<parallel>], iteration_bounds = array<i64: 1>, scalar_prefetch = 0 : i64, scratch_operands = 0 : i64, tpu.core_type = #tpu.core_type<tc>, window_params = [{transform_indices = @transform_0, window_bounds = array<i64: 8, 3840>}, {pipeline_mode = #tpu.pipeline_mode<synchronous>, transform_indices = @transform_1, window_bounds = array<i64: 3840, 128>}, {pipeline_mode = #tpu.pipeline_mode<synchronous>, transform_indices = @transform_2, window_bounds = array<i64: 1, 128>}, {transform_indices = @transform_3, window_bounds = array<i64: 8, 128>}]} {
    %c0 = arith.constant 0 : index
    %c0_0 = arith.constant 0 : index
    %0 = vector.load %arg1[%c0, %c0_0] : memref<8x3840xbf16, #tpu.memory_space<vmem>>, vector<8x3840xbf16>
    %c0_1 = arith.constant 0 : index
    %c0_2 = arith.constant 0 : index
    %1 = vector.load %arg2[%c0_1, %c0_2] : memref<3840x128xbf16, #tpu.memory_space<vmem>>, vector<3840x128xbf16>
    %cst = arith.constant dense<0.000000e+00> : vector<8x128xf32>
    %2 = tpu.matmul %0, %1, %cst {dimension_numbers = #tpu.dot_dimension_numbers<[1], [0], [0], [1], [0, 0, 1, 1], [], []>} : vector<8x3840xbf16>, vector<3840x128xbf16>, vector<8x128xf32> -> vector<8x128xf32>
    %c0_3 = arith.constant 0 : index
    %c0_4 = arith.constant 0 : index
    %3 = vector.load %arg3[%c0_3, %c0_4] : memref<1x128xf32, #tpu.memory_space<vmem>>, vector<1x128xf32>
    %4 = vector.broadcast %3 : vector<1x128xf32> to vector<8x128xf32>
    %5 = arith.addf %2, %4 : vector<8x128xf32>
    %cst_5 = arith.constant 0.000000e+00 : f32
    %6 = vector.broadcast %cst_5 : f32 to vector<8x128xf32>
    %7 = arith.maximumf %5, %6 : vector<8x128xf32>
    %8 = arith.truncf %7 : vector<8x128xf32> to vector<8x128xbf16>
    %c0_6 = arith.constant 0 : index
    %c0_7 = arith.constant 0 : index
    %9 = vector.load %arg4[%c0_6, %c0_7] : memref<8x128xbf16, #tpu.memory_space<vmem>>, vector<8x128xbf16>
    tpu.vector_store %arg4[%c0_6, %c0_7], %8 {strides = array<i32>} : memref<8x128xbf16, #tpu.memory_space<vmem>>, vector<8x128xbf16>,
    return
  }
  func.func @transform_0(%arg0: i32) -> (i32, i32) {
    %c0_i32 = arith.constant 0 : i32
    %c0_i32_0 = arith.constant 0 : i32
    return %arg0, %c0_i32 : i32, i32
  }
  func.func @transform_1(%arg0: i32) -> (i32, i32) {
    %c0_i32 = arith.constant 0 : i32
    %c0_i32_0 = arith.constant 0 : i32
    %c0_i32_1 = arith.constant 0 : i32
    return %c0_i32, %c0_i32_0 : i32, i32
  }
  func.func @transform_2(%arg0: i32) -> (i32, i32) {
    %c0_i32 = arith.constant 0 : i32
    %c0_i32_0 = arith.constant 0 : i32
    %c0_i32_1 = arith.constant 0 : i32
    return %c0_i32, %c0_i32_0 : i32, i32
  }
  func.func @transform_3(%arg0: i32) -> (i32, i32) {
    %c0_i32 = arith.constant 0 : i32
    %c0_i32_0 = arith.constant 0 : i32
    return %arg0, %c0_i32 : i32, i32
  }
}

module attributes {stable_mosaic.version = 11 : i64} {
  func.func @_mlp_kernel(%arg0: i32, %arg1: memref<2x512xbf16, #tpu.memory_space<vmem>>, %arg2: memref<512x64xbf16, #tpu.memory_space<vmem>>, %arg3: memref<1x64xf32, #tpu.memory_space<vmem>>, %arg4: memref<64x32xbf16, #tpu.memory_space<vmem>>, %arg5: memref<1x32xf32, #tpu.memory_space<vmem>>, %arg6: memref<32x5xbf16, #tpu.memory_space<vmem>>, %arg7: memref<1x5xf32, #tpu.memory_space<vmem>>, %arg8: memref<2x5xf32, #tpu.memory_space<vmem>>) attributes {dimension_semantics = [#tpu.dimension_semantics<parallel>], iteration_bounds = array<i64: 1>, scalar_prefetch = 0 : i64, scratch_operands = 0 : i64, tpu.core_type = #tpu.core_type<tc>, window_params = [{transform_indices = @transform_0, window_bounds = array<i64: 2, 512>}, {pipeline_mode = #tpu.pipeline_mode<synchronous>, transform_indices = @transform_1, window_bounds = array<i64: 512, 64>}, {pipeline_mode = #tpu.pipeline_mode<synchronous>, transform_indices = @transform_2, window_bounds = array<i64: 1, 64>}, {pipeline_mode = #tpu.pipeline_mode<synchronous>, transform_indices = @transform_3, window_bounds = array<i64: 64, 32>}, {pipeline_mode = #tpu.pipeline_mode<synchronous>, transform_indices = @transform_4, window_bounds = array<i64: 1, 32>}, {pipeline_mode = #tpu.pipeline_mode<synchronous>, transform_indices = @transform_5, window_bounds = array<i64: 32, 5>}, {pipeline_mode = #tpu.pipeline_mode<synchronous>, transform_indices = @transform_6, window_bounds = array<i64: 1, 5>}, {transform_indices = @transform_7, window_bounds = array<i64: 2, 5>}]} {
    %c0 = arith.constant 0 : index
    %c0_0 = arith.constant 0 : index
    %0 = vector.load %arg1[%c0, %c0_0] : memref<2x512xbf16, #tpu.memory_space<vmem>>, vector<2x512xbf16>
    %c0_1 = arith.constant 0 : index
    %c0_2 = arith.constant 0 : index
    %1 = vector.load %arg2[%c0_1, %c0_2] : memref<512x64xbf16, #tpu.memory_space<vmem>>, vector<512x64xbf16>
    %cst = arith.constant dense<0.000000e+00> : vector<2x64xf32>
    %2 = tpu.matmul %0, %1, %cst {dimension_numbers = #tpu.dot_dimension_numbers<[1], [0], [0], [1], [0, 0, 1, 1], [], []>} : vector<2x512xbf16>, vector<512x64xbf16>, vector<2x64xf32> -> vector<2x64xf32>
    %c0_3 = arith.constant 0 : index
    %c0_4 = arith.constant 0 : index
    %3 = vector.load %arg3[%c0_3, %c0_4] : memref<1x64xf32, #tpu.memory_space<vmem>>, vector<1x64xf32>
    %4 = vector.broadcast %3 : vector<1x64xf32> to vector<2x64xf32>
    %5 = arith.addf %2, %4 : vector<2x64xf32>
    %cst_5 = arith.constant 0.000000e+00 : f32
    %6 = vector.broadcast %cst_5 : f32 to vector<2x64xf32>
    %7 = arith.maximumf %5, %6 : vector<2x64xf32>
    %8 = arith.truncf %7 : vector<2x64xf32> to vector<2x64xbf16>
    %c0_6 = arith.constant 0 : index
    %c0_7 = arith.constant 0 : index
    %9 = vector.load %arg4[%c0_6, %c0_7] : memref<64x32xbf16, #tpu.memory_space<vmem>>, vector<64x32xbf16>
    %cst_8 = arith.constant dense<0.000000e+00> : vector<2x32xf32>
    %10 = tpu.matmul %8, %9, %cst_8 {dimension_numbers = #tpu.dot_dimension_numbers<[1], [0], [0], [1], [0, 0, 1, 1], [], []>} : vector<2x64xbf16>, vector<64x32xbf16>, vector<2x32xf32> -> vector<2x32xf32>
    %c0_9 = arith.constant 0 : index
    %c0_10 = arith.constant 0 : index
    %11 = vector.load %arg5[%c0_9, %c0_10] : memref<1x32xf32, #tpu.memory_space<vmem>>, vector<1x32xf32>
    %12 = vector.broadcast %11 : vector<1x32xf32> to vector<2x32xf32>
    %13 = arith.addf %10, %12 : vector<2x32xf32>
    %cst_11 = arith.constant 0.000000e+00 : f32
    %14 = vector.broadcast %cst_11 : f32 to vector<2x32xf32>
    %15 = arith.maximumf %13, %14 : vector<2x32xf32>
    %16 = arith.truncf %15 : vector<2x32xf32> to vector<2x32xbf16>
    %c0_12 = arith.constant 0 : index
    %c0_13 = arith.constant 0 : index
    %17 = vector.load %arg6[%c0_12, %c0_13] : memref<32x5xbf16, #tpu.memory_space<vmem>>, vector<32x5xbf16>
    %cst_14 = arith.constant dense<0.000000e+00> : vector<2x5xf32>
    %18 = tpu.matmul %16, %17, %cst_14 {dimension_numbers = #tpu.dot_dimension_numbers<[1], [0], [0], [1], [0, 0, 1, 1], [], []>} : vector<2x32xbf16>, vector<32x5xbf16>, vector<2x5xf32> -> vector<2x5xf32>
    %c0_15 = arith.constant 0 : index
    %c0_16 = arith.constant 0 : index
    %19 = vector.load %arg7[%c0_15, %c0_16] : memref<1x5xf32, #tpu.memory_space<vmem>>, vector<1x5xf32>
    %20 = vector.broadcast %19 : vector<1x5xf32> to vector<2x5xf32>
    %21 = arith.addf %18, %20 : vector<2x5xf32>
    %c0_17 = arith.constant 0 : index
    %c0_18 = arith.constant 0 : index
    %22 = vector.load %arg8[%c0_17, %c0_18] : memref<2x5xf32, #tpu.memory_space<vmem>>, vector<2x5xf32>
    tpu.vector_store %arg8[%c0_17, %c0_18], %21 {strides = array<i32>} : memref<2x5xf32, #tpu.memory_space<vmem>>, vector<2x5xf32>,
    return
  }
  func.func @transform_0(%arg0: i32) -> (i32, i32) {
    %c0_i32 = arith.constant 0 : i32
    %c0_i32_0 = arith.constant 0 : i32
    return %arg0, %c0_i32 : i32, i32
  }
  func.func @transform_1(%arg0: i32) -> (i32, i32) {
    %c0_i32 = arith.constant 0 : i32
    %c0_i32_0 = arith.constant 0 : i32
    %c0_i32_1 = arith.constant 0 : i32
    return %c0_i32, %c0_i32_0 : i32, i32
  }
  func.func @transform_2(%arg0: i32) -> (i32, i32) {
    %c0_i32 = arith.constant 0 : i32
    %c0_i32_0 = arith.constant 0 : i32
    %c0_i32_1 = arith.constant 0 : i32
    return %c0_i32, %c0_i32_0 : i32, i32
  }
  func.func @transform_3(%arg0: i32) -> (i32, i32) {
    %c0_i32 = arith.constant 0 : i32
    %c0_i32_0 = arith.constant 0 : i32
    %c0_i32_1 = arith.constant 0 : i32
    return %c0_i32, %c0_i32_0 : i32, i32
  }
  func.func @transform_4(%arg0: i32) -> (i32, i32) {
    %c0_i32 = arith.constant 0 : i32
    %c0_i32_0 = arith.constant 0 : i32
    %c0_i32_1 = arith.constant 0 : i32
    return %c0_i32, %c0_i32_0 : i32, i32
  }
  func.func @transform_5(%arg0: i32) -> (i32, i32) {
    %c0_i32 = arith.constant 0 : i32
    %c0_i32_0 = arith.constant 0 : i32
    %c0_i32_1 = arith.constant 0 : i32
    return %c0_i32, %c0_i32_0 : i32, i32
  }
  func.func @transform_6(%arg0: i32) -> (i32, i32) {
    %c0_i32 = arith.constant 0 : i32
    %c0_i32_0 = arith.constant 0 : i32
    %c0_i32_1 = arith.constant 0 : i32
    return %c0_i32, %c0_i32_0 : i32, i32
  }
  func.func @transform_7(%arg0: i32) -> (i32, i32) {
    %c0_i32 = arith.constant 0 : i32
    %c0_i32_0 = arith.constant 0 : i32
    return %arg0, %c0_i32 : i32, i32
  }
}

</mosaic_0001>

<bundles_post_ra>
// kernel: cnn_forward.4
= control target key start
LH: loop header
LB: loop body
LE: loop exit
PB: predicated region body
PF: predicated region fallthrough
CT: control target
= control target key end

     0   :  { %s1257_s12 = smov 0   ;;  %s1727_s0 = inlined_call_operand.vmem [shape: bf16[32,540], index: 0, kind: input, shape index: {}]   ;;  %s1728_s1 = inlined_call_operand.vmem [shape: bf16[540,256], index: 1, kind: input, shape index: {}]   ;;  %s1729_s2 = inlined_call_operand.vmem [shape: f32[1,256], index: 2, kind: input, shape index: {}]   ;;  %s1730_s3 = inlined_call_operand.vmem [shape: bf16[32,256], index: 3, kind: output, shape index: {}]  }
   0x1 LB: > { %s840_s13 = sadd.s32 4294967295, %s1235_s12   ;;  %p844_p0 = scmp.ge.s32.totalorder %s1235_s12, 1  ;;  %s1235_s12 = sphi %s1257_s12, %s13_s12  }
   0x2   : > { %p139_p1 = scmp.lt.s32.totalorder %s1235_s12, 3 }
   0x4   : > { %p140_p2 = pnand %p844_p0, %p139_p1 }
   0x5   : > { %s845_s19 = sshll.u32 (!%p140_p2), %s840_s13, 1 }
   0x6   : > { %143 = sbr.rel (%p140_p2) target bundleno = 235 (0xeb), region = 32  ;;  %p166_p3 = scmp.lt.s32.totalorder (!%p140_p2), %s845_s19, 3 }
   0xb   : > { %v928_v0 = vld [vmem:[%s1728_s1 + $0x70] sm:$0xf]  ;;  %v1167_v1 = vld [vmem:[%s1728_s1 + $0x74] sm:$0xf0]  ;;  %v920_v11 = vld [vmem:[%s1728_s1 + $0x60] sm:$0xf] }
   0xc   : > { %v992_v2 = vld [vmem:[%s1728_s1 + $0xf0] sm:$0xf]  ;;  %v929_v3 = vor.u32 %v1167_v1, %v928_v0  ;;  %v1183_v4 = vld [vmem:[%s1728_s1 + $0xf4] sm:$0xf0]  ;;  %v1165_v13 = vld [vmem:[%s1728_s1 + $0x64] sm:$0xf0] }
   0xd   : > { %v1056_v5 = vld [vmem:[%s1728_s1 + $0x170] sm:$0xf]  ;;  %v1199_v6 = vld [vmem:[%s1728_s1 + $0x174] sm:$0xf0]  ;;  %v993_v7 = vor.u32 %v1183_v4, %v992_v2  ;;  %v984_v14 = vld [vmem:[%s1728_s1 + $0xe0] sm:$0xf]  ;;  %v921_v16 = vor.u32 %v1165_v13, %v920_v11 }
   0xe   : > { %v1057_v8 = vor.u32 %v1199_v6, %v1056_v5  ;;  %v1120_v9 = vld [vmem:[%s1728_s1 + $0x1f0] sm:$0xf]  ;;  %v1215_v10 = vld [vmem:[%s1728_s1 + $0x1f4] sm:$0xf0]  ;;  %634 = vmatpush.bf16.msra.mxu0 %v929_v3  ;;  %v1181_v15 = vld [vmem:[%s1728_s1 + $0xe4] sm:$0xf0] }
   0xf   : > { %v1121_v12 = vor.u32 %v1215_v10, %v1120_v9  ;;  %648 = vmatpush.bf16.msra.mxu1 %v993_v7  ;;  %v985_v17 = vor.u32 %v1181_v15, %v984_v14  ;;  %v1048_v18 = vld [vmem:[%s1728_s1 + $0x160] sm:$0xf]  ;;  %v1197_v19 = vld [vmem:[%s1728_s1 + $0x164] sm:$0xf0]  ;;  %v912_v23 = vld [vmem:[%s1728_s1 + $0x50] sm:$0xf] }
  0x10   : > { %662 = vmatpush.bf16.msra.mxu2 %v1057_v8  ;;  %v1112_v20 = vld [vmem:[%s1728_s1 + $0x1e0] sm:$0xf]  ;;  %v1049_v21 = vor.u32 %v1197_v19, %v1048_v18  ;;  %v1213_v22 = vld [vmem:[%s1728_s1 + $0x1e4] sm:$0xf0]  ;;  %v1163_v24 = vld [vmem:[%s1728_s1 + $0x54] sm:$0xf0] }
  0x11   : > { %676 = vmatpush.bf16.msra.mxu3 %v1121_v12  ;;  %v1113_v25 = vor.u32 %v1213_v22, %v1112_v20  ;;  %v976_v26 = vld [vmem:[%s1728_s1 + $0xd0] sm:$0xf]  ;;  %v1179_v27 = vld [vmem:[%s1728_s1 + $0xd4] sm:$0xf0]  ;;  %v913_v29 = vor.u32 %v1163_v24, %v912_v23  ;;  %v904_v35 = vld [vmem:[%s1728_s1 + $0x40] sm:$0xf] }
  0x12   : > { %v1040_v28 = vld [vmem:[%s1728_s1 + $0x150] sm:$0xf]  ;;  %635 = vmatpush.bf16.msra.mxu0 %v921_v16  ;;  %v1195_v30 = vld [vmem:[%s1728_s1 + $0x154] sm:$0xf0]  ;;  %v977_v33 = vor.u32 %v1179_v27, %v976_v26  ;;  %v1161_v36 = vld [vmem:[%s1728_s1 + $0x44] sm:$0xf0] }
  0x13   : > { %v1104_v31 = vld [vmem:[%s1728_s1 + $0x1d0] sm:$0xf]  ;;  %v1211_v32 = vld [vmem:[%s1728_s1 + $0x1d4] sm:$0xf0]  ;;  %649 = vmatpush.bf16.msra.mxu1 %v985_v17  ;;  %v1041_v34 = vor.u32 %v1195_v30, %v1040_v28  ;;  %v968_v37 = vld [vmem:[%s1728_s1 + $0xc0] sm:$0xf]  ;;  %v905_v44 = vor.u32 %v1161_v36, %v904_v35 }
  0x14   : > { %663 = vmatpush.bf16.msra.mxu2 %v1049_v21  ;;  %v1105_v38 = vor.u32 %v1211_v32, %v1104_v31  ;;  %v1177_v39 = vld [vmem:[%s1728_s1 + $0xc4] sm:$0xf0]  ;;  %v1032_v40 = vld [vmem:[%s1728_s1 + $0x140] sm:$0xf]  ;;  %v896_v47 = vld [vmem:[%s1728_s1 + $0x30] sm:$0xf] }
  0x15   : > { %677 = vmatpush.bf16.msra.mxu3 %v1113_v25  ;;  %v1193_v41 = vld [vmem:[%s1728_s1 + $0x144] sm:$0xf0]  ;;  %v1096_v42 = vld [vmem:[%s1728_s1 + $0x1c0] sm:$0xf]  ;;  %v969_v45 = vor.u32 %v1177_v39, %v968_v37  ;;  %v1159_v48 = vld [vmem:[%s1728_s1 + $0x34] sm:$0xf0] }
  0x16   : > { %v1209_v43 = vld [vmem:[%s1728_s1 + $0x1c4] sm:$0xf0]  ;;  %636 = vmatpush.bf16.msra.mxu0 %v913_v29  ;;  %v1033_v46 = vor.u32 %v1193_v41, %v1032_v40  ;;  %v960_v49 = vld [vmem:[%s1728_s1 + $0xb0] sm:$0xf]  ;;  %v1175_v51 = vld [vmem:[%s1728_s1 + $0xb4] sm:$0xf0]  ;;  %v897_v56 = vor.u32 %v1159_v48, %v896_v47 }
  0x17   : > { %650 = vmatpush.bf16.msra.mxu1 %v977_v33  ;;  %v1097_v50 = vor.u32 %v1209_v43, %v1096_v42  ;;  %v1024_v52 = vld [vmem:[%s1728_s1 + $0x130] sm:$0xf]  ;;  %v1191_v53 = vld [vmem:[%s1728_s1 + $0x134] sm:$0xf0]  ;;  %v961_v57 = vor.u32 %v1175_v51, %v960_v49  ;;  %v888_v59 = vld [vmem:[%s1728_s1 + $0x20] sm:$0xf] }
  0x18   : > { %664 = vmatpush.bf16.msra.mxu2 %v1041_v34  ;;  %v1088_v54 = vld [vmem:[%s1728_s1 + $0x1b0] sm:$0xf]  ;;  %v1207_v55 = vld [vmem:[%s1728_s1 + $0x1b4] sm:$0xf0]  ;;  %v1025_v58 = vor.u32 %v1191_v53, %v1024_v52  ;;  %v1157_v60 = vld [vmem:[%s1728_s1 + $0x24] sm:$0xf0] }
  0x19   : > { %678 = vmatpush.bf16.msra.mxu3 %v1105_v38  ;;  %v952_v61 = vld [vmem:[%s1728_s1 + $0xa0] sm:$0xf]  ;;  %v1089_v62 = vor.u32 %v1207_v55, %v1088_v54  ;;  %v1173_v63 = vld [vmem:[%s1728_s1 + $0xa4] sm:$0xf0]  ;;  %v889_v4 = vor.u32 %v1157_v60, %v888_v59  ;;  %v880_v5 = vld [vmem:[%s1728_s1 + $0x10] sm:$0xf] }
  0x1a   : > { %637 = vmatpush.bf16.msra.mxu0 %v905_v44  ;;  %v1016_v0 = vld [vmem:[%s1728_s1 + $0x120] sm:$0xf]  ;;  %v1189_v1 = vld [vmem:[%s1728_s1 + $0x124] sm:$0xf0]  ;;  %v953_v6 = vor.u32 %v1173_v63, %v952_v61  ;;  %v1155_v8 = vld [vmem:[%s1728_s1 + $0x14] sm:$0xf0] }
  0x1b   : > { %651 = vmatpush.bf16.msra.mxu1 %v969_v45  ;;  %v1080_v2 = vld [vmem:[%s1728_s1 + $0x1a0] sm:$0xf]  ;;  %v1205_v3 = vld [vmem:[%s1728_s1 + $0x1a4] sm:$0xf0]  ;;  %v1017_v7 = vor.u32 %v1189_v1, %v1016_v0  ;;  %v944_v9 = vld [vmem:[%s1728_s1 + $0x90] sm:$0xf]  ;;  %v881_v18 = vor.u32 %v1155_v8, %v880_v5 }
  0x1c   : > { %665 = vmatpush.bf16.msra.mxu2 %v1033_v46  ;;  %v1171_v10 = vld [vmem:[%s1728_s1 + $0x94] sm:$0xf0]  ;;  %v1081_v11 = vor.u32 %v1205_v3, %v1080_v2  ;;  %v1008_v12 = vld [vmem:[%s1728_s1 + $0x110] sm:$0xf]  ;;  %v872_v16 = vld [vmem:[%s1728_s1] sm:$0xf] }
  0x1d   : > { %679 = vmatpush.bf16.msra.mxu3 %v1097_v50  ;;  %v1187_v13 = vld [vmem:[%s1728_s1 + $0x114] sm:$0xf0]  ;;  %v1072_v14 = vld [vmem:[%s1728_s1 + $0x190] sm:$0xf]  ;;  %v1153_v17 = vld [vmem:[%s1728_s1 + $0x4] sm:$0xf0]  ;;  %v945_v24 = vor.u32 %v1171_v10, %v944_v9 }
  0x1e   : > { %638 = vmatpush.bf16.msra.mxu0 %v897_v56  ;;  %v1203_v15 = vld [vmem:[%s1728_s1 + $0x194] sm:$0xf0]  ;;  %v936_v19 = vld [vmem:[%s1728_s1 + $0x80] sm:$0xf]  ;;  %v1169_v20 = vld [vmem:[%s1728_s1 + $0x84] sm:$0xf0]  ;;  %v1009_v25 = vor.u32 %v1187_v13, %v1008_v12  ;;  %v873_v35 = vor.u32 %v1153_v17, %v872_v16 }
  0x1f   : > { %652 = vmatpush.bf16.msra.mxu1 %v961_v57  ;;  %v1000_v21 = vld [vmem:[%s1728_s1 + $0x100] sm:$0xf]  ;;  %v1185_v22 = vld [vmem:[%s1728_s1 + $0x104] sm:$0xf0]  ;;  %v1136_v23 = vld [vmem:[%s1728_s1 + $0x210] sm:$0xf]  ;;  %v1073_v28 = vor.u32 %v1203_v15, %v1072_v14  ;;  %v937_v38 = vor.u32 %v1169_v20, %v936_v19 }
  0x20   : > { %666 = vmatpush.bf16.msra.mxu2 %v1025_v58  ;;  %v1064_v26 = vld [vmem:[%s1728_s1 + $0x180] sm:$0xf]  ;;  %v1219_v27 = vld [vmem:[%s1728_s1 + $0x214] sm:$0x30]  ;;  %v1201_v29 = vld [vmem:[%s1728_s1 + $0x184] sm:$0xf0]  ;;  %v1001_v39 = vor.u32 %v1185_v22, %v1000_v21 }
  0x21   : > { %680 = vmatpush.bf16.msra.mxu3 %v1089_v62  ;;  %v1166_v30 = vld [vmem:[%s1728_s1 + $0x74] sm:$0xf]  ;;  %v930_v31 = vld [vmem:[%s1728_s1 + $0x78] sm:$0xf0]  ;;  %v1137_v34 = vor.u32 %v1219_v27, %v1136_v23  ;;  %vm627_vm0 = vcmask 1045504   ;;  %s1732_s19 = smov (!%p166_p3, %s845_s19), 3  ;;  %v1065_v43 = vor.u32 %v1201_v29, %v1064_v26 }
  0x22   : > { %639 = vmatpush.bf16.msra.mxu0 %v889_v4  ;;  %v1182_v32 = vld [vmem:[%s1728_s1 + $0xf4] sm:$0xf]  ;;  %v994_v33 = vld [vmem:[%s1728_s1 + $0xf8] sm:$0xf0]  ;;  %v1164_v40 = vld [vmem:[%s1728_s1 + $0x64] sm:$0xf]  ;;  %v933_v44 = vor.u32 %v1166_v30, %v930_v31 }
  0x23   : > { %653 = vmatpush.bf16.msra.mxu1 %v953_v6  ;;  %v1198_v36 = vld [vmem:[%s1728_s1 + $0x174] sm:$0xf]  ;;  %v1058_v37 = vld [vmem:[%s1728_s1 + $0x178] sm:$0xf0]  ;;  %v922_v41 = vld [vmem:[%s1728_s1 + $0x68] sm:$0xf0]  ;;  %v997_v47 = vor.u32 %v1182_v32, %v994_v33 }
  0x24   : > { %667 = vmatpush.bf16.msra.mxu2 %v1017_v7  ;;  %v1180_v42 = vld [vmem:[%s1728_s1 + $0xe4] sm:$0xf]  ;;  %s1220_s14 = smul.u32 20, %s1732_s19  ;;  %v986_v45 = vld [vmem:[%s1728_s1 + $0xe8] sm:$0xf0]  ;;  %v1061_v48 = vor.u32 %v1198_v36, %v1058_v37  ;;  %v629_v49 = vsel %vm627_vm0, %v1137_v34, 0  ;;  %v925_v62 = vor.u32 %v1164_v40, %v922_v41 }
  0x25   : > { %681 = vmatpush.bf16.msra.mxu3 %v1081_v11  ;;  %v1196_v46 = vld [vmem:[%s1728_s1 + $0x164] sm:$0xf]  ;;  %v1050_v50 = vld [vmem:[%s1728_s1 + $0x168] sm:$0xf0]  ;;  %v1128_v51 = vld [vmem:[%s1728_s1 + $0x200] sm:$0xf]  ;;  %v989_v63 = vor.u32 %v1180_v42, %v986_v45 }
  0x26   : > { %640 = vmatpush.bf16.msra.mxu0 %v881_v18  ;;  %s1511_s26 = scalar_lea.vmem %s1727_s0, %s1220_s14  ;;  %v1217_v52 = vld [vmem:[%s1728_s1 + $0x204] sm:$0xf0]  ;;  %v1214_v53 = vld [vmem:[%s1728_s1 + $0x1f4] sm:$0xf]  ;;  %v1122_v54 = vld [vmem:[%s1728_s1 + $0x1f8] sm:$0xf0]  ;;  %v1053_v3 = vor.u32 %v1196_v46, %v1050_v50 }
  0x27   : > { %654 = vmatpush.bf16.msra.mxu1 %v945_v24  ;;  %v852_v55 = vld [vmem:[%s1511_s26] sm:$0xf]  ;;  %v1149_v56 = vld [vmem:[%s1511_s26 + $0x10] sm:$0xf0]  ;;  %v860_v57 = vld [vmem:[%s1511_s26 + $0x8] sm:$0xf]  ;;  %v1129_v8 = vor.u32 %v1217_v52, %v1128_v51  ;;  %v1125_v13 = vor.u32 %v1214_v53, %v1122_v54 }
  0x28   : > { %668 = vmatpush.bf16.msra.mxu2 %v1009_v25  ;;  %v1162_v58 = vld [vmem:[%s1728_s1 + $0x54] sm:$0xf]  ;;  %v914_v59 = vld [vmem:[%s1728_s1 + $0x58] sm:$0xf0]  ;;  %v1531_v60 = vor.u32 %v1149_v56, %v852_v55  ;;  %v1148_v0 = vld [vmem:[%s1511_s26 + $0xc] sm:$0xf] }
  0x29   : > { %682 = vmatpush.bf16.msra.mxu3 %v1073_v28  ;;  %v1150_v61 = vld [vmem:[%s1511_s26 + $0x18] sm:$0xf0]  ;;  %v862_v1 = vld [vmem:[%s1511_s26 + $0x1c] sm:$0xf0]  ;;  %v1147_v5 = vld [vmem:[%s1511_s26 + $0x4] sm:$0xf]  ;;  %v917_v14 = vor.u32 %v1162_v58, %v914_v59 }
  0x2a   : > { %641 = vmatpush.bf16.msra.mxu0 %v873_v35  ;;  %v1536_v2 = vor.u32 %v1150_v61, %v860_v57  ;;  %v1538_v4 = vor.u32 %v1148_v0, %v862_v1  ;;  %v854_v6 = vld [vmem:[%s1511_s26 + $0x14] sm:$0xf0]  ;;  %v1178_v7 = vld [vmem:[%s1728_s1 + $0xd4] sm:$0xf]  ;;  %v978_v10 = vld [vmem:[%s1728_s1 + $0xd8] sm:$0xf0] }
  0x2b   : > { %655 = vmatpush.bf16.msra.mxu1 %v937_v38  ;;  %v1545_v9 = vor.u32 %v1147_v5, %v854_v6  ;;  %v1194_v11 = vld [vmem:[%s1728_s1 + $0x154] sm:$0xf]  ;;  %v1042_v12 = vld [vmem:[%s1728_s1 + $0x158] sm:$0xf0]  ;;  %v1212_v15 = vld [vmem:[%s1728_s1 + $0x1e4] sm:$0xf]  ;;  %v981_v17 = vor.u32 %v1178_v7, %v978_v10 }
  0x2c   : > { %669 = vmatpush.bf16.msra.mxu2 %v1001_v39  ;;  %v1114_v16 = vld [vmem:[%s1728_s1 + $0x1e8] sm:$0xf0]  ;;  %v1045_v18 = vor.u32 %v1194_v11, %v1042_v12  ;;  %v1160_v19 = vld [vmem:[%s1728_s1 + $0x44] sm:$0xf]  ;;  %v1210_v27 = vld [vmem:[%s1728_s1 + $0x1d4] sm:$0xf] }
  0x2d   : > { %683 = vmatpush.bf16.msra.mxu3 %v1065_v43  ;;  %642 = vmatmul.bf16.vlgmr.msra.gmra.mxu0 %v1531_v60  ;;  %v906_v20 = vld [vmem:[%s1728_s1 + $0x48] sm:$0xf0]  ;;  %v1176_v21 = vld [vmem:[%s1728_s1 + $0xc4] sm:$0xf]  ;;  %v1117_v25 = vor.u32 %v1212_v15, %v1114_v16  ;;  %v1106_v28 = vld [vmem:[%s1728_s1 + $0x1d8] sm:$0xf0] }
  0x2e   : > { %696 = vmatpush.bf16.msrb.mxu0 %v629_v49  ;;  %656 = vmatmul.bf16.vlgmr.msra.gmra.mxu1 %v1545_v9  ;;  %v970_v22 = vld [vmem:[%s1728_s1 + $0xc8] sm:$0xf0]  ;;  %v1192_v23 = vld [vmem:[%s1728_s1 + $0x144] sm:$0xf]  ;;  %v909_v26 = vor.u32 %v1160_v19, %v906_v20  ;;  %v1158_v31 = vld [vmem:[%s1728_s1 + $0x34] sm:$0xf]  ;;  %v1109_v37 = vor.u32 %v1210_v27, %v1106_v28 }
  0x2f   : > { %704 = vmatpush.bf16.msrb.mxu1 %v933_v44  ;;  %670 = vmatmul.bf16.vlgmr.msra.gmra.mxu2 %v1536_v2  ;;  %v1034_v24 = vld [vmem:[%s1728_s1 + $0x148] sm:$0xf0]  ;;  %v973_v29 = vor.u32 %v1176_v21, %v970_v22  ;;  %v898_v32 = vld [vmem:[%s1728_s1 + $0x38] sm:$0xf0]  ;;  %v1174_v33 = vld [vmem:[%s1728_s1 + $0xb4] sm:$0xf] }
  0x30   : > { %718 = vmatpush.bf16.msrb.mxu2 %v997_v47  ;;  %684 = vmatmul.bf16.vlgmr.msra.gmra.mxu3 %v1538_v4  ;;  %v1037_v30 = vor.u32 %v1192_v23, %v1034_v24  ;;  %v962_v34 = vld [vmem:[%s1728_s1 + $0xb8] sm:$0xf0]  ;;  %v1190_v35 = vld [vmem:[%s1728_s1 + $0x134] sm:$0xf]  ;;  %v868_v38 = vld [vmem:[%s1511_s26 + $0x10] sm:$0xf]  ;;  %v901_v39 = vor.u32 %v1158_v31, %v898_v32 }
  0x31   : > { %732 = vmatpush.bf16.msrb.mxu3 %v1061_v48  ;;  %v1026_v36 = vld [vmem:[%s1728_s1 + $0x138] sm:$0xf0]  ;;  %v1151_v40 = vld [vmem:[%s1511_s26 + $0x20] sm:$0xf0]  ;;  %v1098_v42 = vld [vmem:[%s1728_s1 + $0x1c8] sm:$0xf0]  ;;  %v965_v43 = vor.u32 %v1174_v33, %v962_v34 }
  0x32   : > { %697 = vmatpush.bf16.msrb.mxu0 %v1129_v8  ;;  %v1208_v41 = vld [vmem:[%s1728_s1 + $0x1c4] sm:$0xf]  ;;  %v1029_v44 = vor.u32 %v1190_v35, %v1026_v36  ;;  %v890_v46 = vld [vmem:[%s1728_s1 + $0x28] sm:$0xf0]  ;;  %v1634_v51 = vor.u32 %v1151_v40, %v868_v38  ;;  %vm623_vm1 = vcmask 228352   ;;  %s1146_s18 = sshll.u32 %s1732_s19, 3 }
  0x33   : > { %705 = vmatpush.bf16.msrb.mxu1 %v925_v62  ;;  %v1156_v45 = vld [vmem:[%s1728_s1 + $0x24] sm:$0xf]  ;;  %v954_v48 = vld [vmem:[%s1728_s1 + $0xa8] sm:$0xf0]  ;;  %v1101_v52 = vor.u32 %v1208_v41, %v1098_v42  ;;  %v1206_v54 = vld [vmem:[%s1728_s1 + $0x1b4] sm:$0xf]  ;;  %s177_s22 = scalar_lea.vmem %s1730_s3, %s1146_s18 }
  0x34   : > { %719 = vmatpush.bf16.msrb.mxu2 %v989_v63  ;;  %v1172_v47 = vld [vmem:[%s1728_s1 + $0xa4] sm:$0xf]  ;;  %v1018_v50 = vld [vmem:[%s1728_s1 + $0x128] sm:$0xf0]  ;;  %v893_v53 = vor.u32 %v1156_v45, %v890_v46  ;;  %v1090_v55 = vld [vmem:[%s1728_s1 + $0x1b8] sm:$0xf0] }
  0x35   : > { %733 = vmatpush.bf16.msrb.mxu3 %v1053_v3  ;;  %v1188_v49 = vld [vmem:[%s1728_s1 + $0x124] sm:$0xf]  ;;  %v957_v56 = vor.u32 %v1172_v47, %v954_v48  ;;  %v1154_v58 = vld [vmem:[%s1728_s1 + $0x14] sm:$0xf]  ;;  %v882_v59 = vld [vmem:[%s1728_s1 + $0x18] sm:$0xf0]  ;;  %v1093_v5 = vor.u32 %v1206_v54, %v1090_v55 }
  0x36   : > { %746 = vmatpush.bf16.msra.mxu0 %v1125_v13  ;;  %v1021_v57 = vor.u32 %v1188_v49, %v1018_v50  ;;  %v1170_v61 = vld [vmem:[%s1728_s1 + $0x94] sm:$0xf]  ;;  %v946_v62 = vld [vmem:[%s1728_s1 + $0x98] sm:$0xf0]  ;;  %v885_v6 = vor.u32 %v1154_v58, %v882_v59  ;;  %v1204_v7 = vld [vmem:[%s1728_s1 + $0x1a4] sm:$0xf] }
  0x37   : > { %706 = vmatpush.bf16.msrb.mxu1 %v917_v14  ;;  %v1186_v63 = vld [vmem:[%s1728_s1 + $0x114] sm:$0xf]  ;;  %v1010_v0 = vld [vmem:[%s1728_s1 + $0x118] sm:$0xf0]  ;;  %v1082_v8 = vld [vmem:[%s1728_s1 + $0x1a8] sm:$0xf0]  ;;  %v949_v10 = vor.u32 %v1170_v61, %v946_v62 }
  0x38   : > { %720 = vmatpush.bf16.msrb.mxu2 %v981_v17  ;;  %v1218_v1 = vld [vmem:[%s1728_s1 + $0x214] sm:$0xf]  ;;  %v1138_v3 = vld [vmem:[%s1728_s1 + $0x218] sm:$0x30]  ;;  %v1013_v11 = vor.u32 %v1186_v63, %v1010_v0  ;;  %v1152_v12 = vld [vmem:[%s1728_s1 + $0x4] sm:$0xf]  ;;  %v1085_v19 = vor.u32 %v1204_v7, %v1082_v8 }
  0x39   : > { %734 = vmatpush.bf16.msrb.mxu3 %v1045_v18  ;;  %v874_v13 = vld [vmem:[%s1728_s1 + $0x8] sm:$0xf0]  ;;  %v1168_v14 = vld [vmem:[%s1728_s1 + $0x84] sm:$0xf]  ;;  %v1141_v18 = vor.u32 %v1218_v1, %v1138_v3  ;;  %v1202_v23 = vld [vmem:[%s1728_s1 + $0x194] sm:$0xf] }
  0x3a   : > { %747 = vmatpush.bf16.msra.mxu0 %v1117_v25  ;;  %v938_v15 = vld [vmem:[%s1728_s1 + $0x88] sm:$0xf0]  ;;  %v1184_v16 = vld [vmem:[%s1728_s1 + $0x104] sm:$0xf]  ;;  %v877_v20 = vor.u32 %v1152_v12, %v874_v13  ;;  %v1074_v24 = vld [vmem:[%s1728_s1 + $0x198] sm:$0xf0] }
  0x3b   : > { %707 = vmatpush.bf16.msrb.mxu1 %v909_v26  ;;  %v1002_v17 = vld [vmem:[%s1728_s1 + $0x108] sm:$0xf0]  ;;  %v941_v21 = vor.u32 %v1168_v14, %v938_v15  ;;  %v632_v25 = vsel %vm627_vm0, %v1141_v18, 0  ;;  %v1216_v26 = vld [vmem:[%s1728_s1 + $0x204] sm:$0xf]  ;;  %v1077_v28 = vor.u32 %v1202_v23, %v1074_v24 }
  0x3c   : > { %721 = vmatpush.bf16.msrb.mxu2 %v973_v29  ;;  %v1005_v22 = vor.u32 %v1184_v16, %v1002_v17  ;;  %v1130_v27 = vld [vmem:[%s1728_s1 + $0x208] sm:$0xf0]  ;;  %v1200_v29 = vld [vmem:[%s1728_s1 + $0x184] sm:$0xf] }
  0x3d   : > { %735 = vmatpush.bf16.msrb.mxu3 %v1037_v30  ;;  %1142 = vmatmul.msk.bf16.vlgmr.msrb.gmra.mxu0 %vm623_vm1, %v1634_v51  ;;  %v1066_v30 = vld [vmem:[%s1728_s1 + $0x188] sm:$0xf0]  ;;  %v1133_v31 = vor.u32 %v1216_v26, %v1130_v27 }
  0x3e   : > { %748 = vmatpush.bf16.msra.mxu0 %v1109_v37  ;;  %v1069_v32 = vor.u32 %v1200_v29, %v1066_v30 }
  0x3f   : > { %708 = vmatpush.bf16.msrb.mxu1 %v901_v39 }
  0x40   : > { %722 = vmatpush.bf16.msrb.mxu2 %v965_v43 }
  0x41   : > { %736 = vmatpush.bf16.msrb.mxu3 %v1029_v44 }
  0x42   : > { %749 = vmatpush.bf16.msra.mxu0 %v1101_v52 }
  0x43   : > { %709 = vmatpush.bf16.msrb.mxu1 %v893_v53 }
  0x44   : > { %723 = vmatpush.bf16.msrb.mxu2 %v957_v56 }
  0x45   : > { %737 = vmatpush.bf16.msrb.mxu3 %v1021_v57 }
  0x46   : > { %750 = vmatpush.bf16.msra.mxu0 %v1093_v5 }
  0x47   : > { %710 = vmatpush.bf16.msrb.mxu1 %v885_v6 }
  0x48   : > { %724 = vmatpush.bf16.msrb.mxu2 %v949_v10 }
  0x49   : > { %738 = vmatpush.bf16.msrb.mxu3 %v1013_v11 }
  0x4a   : > { %751 = vmatpush.bf16.msra.mxu0 %v1085_v19 }
  0x4b   : > { %711 = vmatpush.bf16.msrb.mxu1 %v877_v20 }
  0x4c   : > { %725 = vmatpush.bf16.msrb.mxu2 %v941_v21 }
  0x4d   : > { %739 = vmatpush.bf16.msrb.mxu3 %v1005_v22 }
  0x4e   : > { %712 = vmatmul.bf16.vlgmr.msrb.gmra.mxu1 %v1531_v60  ;;  %752 = vmatpush.bf16.msra.mxu0 %v1077_v28  ;;  %v254_v60 = vld [vmem:[%s1729_s2] sm:$0x3] }
  0x4f   : > { %766 = vmatpush.bf16.msra.mxu1 %v632_v25  ;;  %726 = vmatmul.bf16.vlgmr.msrb.gmra.mxu2 %v1545_v9  ;;  %v256_v39 = vperm.slane %v254_v60, 0 }
  0x50   : > { %740 = vmatmul.bf16.vlgmr.msrb.gmra.mxu3 %v1536_v2 }
  0x52   : > { %753 = vmatpush.bf16.msra.mxu0 %v1069_v32 }
  0x53   : > { %767 = vmatpush.bf16.msra.mxu1 %v1133_v31 }
  0x55   : > { %754 = vmatmul.bf16.vlgmr.msra.gmra.mxu0 %v1538_v4  ;;  %v257_v4 = vperm.slane %v254_v60, 1 }
  0x5e   : > { %1143 = vmatmul.msk.bf16.vlgmr.msra.gmra.mxu1 %vm623_vm1, %v1634_v51 }
  0xaa   : > { %v643_v33 = vpop.f32.mrf.mxu0 }
  0xab   : > { %v657_v34 = vpop.f32.mrf.mxu1  ;;  %v644_v40 = vadd.f32 %v643_v33, %v256_v39 }
  0xad   : > { %v658_v43 = vadd.f32 %v657_v34, %v644_v40 }
  0xb2   : > { %v645_v35 = vpop.f32.mrf.mxu0  ;;  %v671_v36 = vpop.f32.mrf.mxu2 }
  0xb3   : > { %v685_v37 = vpop.f32.mrf.mxu3  ;;  %v659_v38 = vpop.f32.mrf.mxu1  ;;  %v672_v47 = vadd.f32 %v671_v36, %v658_v43  ;;  %v646_v51 = vadd.f32 %v645_v35, %v256_v39 }
  0xb5   : > { %v686_v52 = vadd.f32 %v685_v37, %v672_v47  ;;  %v660_v55 = vadd.f32 %v659_v38, %v646_v51 }
  0xba   : > { %v699_v9 = vpop.f32.mrf.mxu0  ;;  %v673_v2 = vpop.f32.mrf.mxu2 }
  0xbb   : > { %v687_v42 = vpop.f32.mrf.mxu3  ;;  %v700_v58 = vadd.f32 %v699_v9, %v686_v52  ;;  %v674_v63 = vadd.f32 %v673_v2, %v660_v55 }
  0xbd   : > { %v774_v3 = vmax.f32 %v700_v58, 0.0  ;;  %v688_v7 = vadd.f32 %v687_v42, %v674_v63 }
  0xc2   : > { %v701_v44 = vpop.f32.mrf.mxu0 }
  0xc3   : > { %v702_v11 = vadd.f32 %v701_v44, %v688_v7 }
  0xc5   : > { %v776_v15 = vmax.f32 %v702_v11, 0.0 }
  0xcb   : > { %v713_v41 = vpop.f32.mrf.mxu1 }
  0xcc   : > { %v714_v45 = vadd.f32 %v713_v41, %v257_v4 }
  0xd2   : > { %v727_v46 = vpop.f32.mrf.mxu2  ;;  %v755_v54 = vpop.f32.mrf.mxu0 }
  0xd3   : > { %v728_v48 = vadd.f32 %v727_v46, %v714_v45  ;;  %v741_v49 = vpop.f32.mrf.mxu3  ;;  %v715_v50 = vpop.f32.mrf.mxu1 }
  0xd4   : > { %v716_v56 = vadd.f32 %v715_v50, %v257_v4 }
  0xd5   : > { %v742_v53 = vadd.f32 %v741_v49, %v728_v48 }
  0xd7   : > { %v756_v59 = vadd.f32 %v755_v54, %v742_v53 }
  0xda   : > { %v729_v57 = vpop.f32.mrf.mxu2  ;;  %v757_v10 = vpop.f32.mrf.mxu0 }
  0xdb   : > { %v730_v61 = vadd.f32 %v729_v57, %v716_v56  ;;  %v769_v62 = vpop.f32.mrf.mxu1  ;;  %v743_v1 = vpop.f32.mrf.mxu3 }
  0xdc   : > { %v770_v0 = vadd.f32 %v769_v62, %v756_v59 }
  0xdd   : > { %v744_v5 = vadd.f32 %v743_v1, %v730_v61 }
  0xde   : > { %v775_v6 = vmax.f32 %v770_v0, 0.0 }
  0xdf   : > { %v758_v12 = vadd.f32 %v757_v10, %v744_v5 }
  0xe0   : > { %v778_v8 = vpack.c.bf16 %v775_v6, %v774_v3 }
  0xe2   : > { %780 = vst [vmem:[%s177_s22] sm:$0xff] %v778_v8 }
  0xe3   : > { %v771_v13 = vpop.f32.mrf.mxu1 }
  0xe4   : > { %v772_v14 = vadd.f32 %v771_v13, %v758_v12 }
  0xe6   : > { %v777_v16 = vmax.f32 %v772_v14, 0.0 }
  0xe8   : > { %v779_v17 = vpack.c.bf16 %v777_v16, %v776_v15 }
  0xea   : > { %781 = vst [vmem:[%s177_s22 + $0x8] sm:$0xff] %v779_v17 }
  0xeb PF: > { %s13_s12 = sadd.s32 1, %s1235_s12  }
  0xec   : > { %p10_p4 = scmp.ge.s32.totalorder %s13_s12, 4  }
  0xee   :  { %12 = sbr.rel (!%p10_p4) target bundleno = 1 (0x1), region = 62 }

// kernel: cnn_forward.5
= control target key start
LH: loop header
LB: loop body
LE: loop exit
PB: predicated region body
PF: predicated region fallthrough
CT: control target
= control target key end

     0   :  { %s5430_s12 = smov 0   ;;  %s7994_s0 = inlined_call_operand.vmem [shape: bf16[16,1600], index: 0, kind: input, shape index: {}]   ;;  %s7995_s1 = inlined_call_operand.vmem [shape: bf16[1600,512], index: 1, kind: input, shape index: {}]   ;;  %s7996_s2 = inlined_call_operand.vmem [shape: f32[1,512], index: 2, kind: input, shape index: {}]   ;;  %s7997_s3 = inlined_call_operand.vmem [shape: bf16[16,512], index: 3, kind: output, shape index: {}]  }
   0x1 LB: > { %s3377_s13 = sadd.s32 4294967295, %s5408_s12   ;;  %p3381_p0 = scmp.ge.s32.totalorder %s5408_s12, 1  ;;  %s5408_s12 = sphi %s5430_s12, %s13_s12  }
   0x2   : > { %p137_p1 = scmp.lt.s32.totalorder %s5408_s12, 3 }
   0x4   : > { %p138_p2 = pnand %p3381_p0, %p137_p1 }
   0x5   : > { %p161_p3 = scmp.lt.s32.totalorder (!%p138_p2), %s3377_s13, 1 }
   0x6   : > { %141 = sbr.rel (%p138_p2) target bundleno = 558 (0x22e), region = 32 }
   0xb   : > { %v3499_v0 = vld [vmem:[%s7995_s1 + $0xe0] sm:$0xf]  ;;  %v5022_v1 = vld [vmem:[%s7995_s1 + $0xec] sm:$0xf0]  ;;  %s7999_s13 = smov (!%p161_p3, %s3377_s13), 1  ;;  %vm2634_vm0 = vcmask 523264  }
   0xc   : > { %v3627_v2 = vld [vmem:[%s7995_s1 + $0x1e0] sm:$0xf]  ;;  %v3500_v3 = vor.u32 %v5022_v1, %v3499_v0  ;;  %v5054_v4 = vld [vmem:[%s7995_s1 + $0x1ec] sm:$0xf0]  ;;  %s5392_s27 = smul.u32 52, %s7999_s13  ;;  %s4991_s4 = sshll.u32 %s7999_s13, 4 }
   0xd   : > { %v3755_v5 = vld [vmem:[%s7995_s1 + $0x2e0] sm:$0xf]  ;;  %v5086_v6 = vld [vmem:[%s7995_s1 + $0x2ec] sm:$0xf0]  ;;  %v3628_v7 = vor.u32 %v5054_v4, %v3627_v2  ;;  %s7726_s20 = scalar_lea.vmem %s7997_s3, %s4991_s4 }
   0xe   : > { %v3756_v8 = vor.u32 %v5086_v6, %v3755_v5  ;;  %v3883_v9 = vld [vmem:[%s7995_s1 + $0x3e0] sm:$0xf]  ;;  %v5118_v10 = vld [vmem:[%s7995_s1 + $0x3ec] sm:$0xf0]  ;;  %2638 = vmatpush.bf16.msra.mxu0 %v3500_v3  ;;  %s5736_s7 = scalar_lea.vmem %s7994_s0, %s5392_s27 }
   0xf   : > { %v3483_v11 = vld [vmem:[%s7995_s1 + $0xc0] sm:$0xf]  ;;  %v3884_v12 = vor.u32 %v5118_v10, %v3883_v9  ;;  %v5018_v13 = vld [vmem:[%s7995_s1 + $0xcc] sm:$0xf0]  ;;  %2651 = vmatpush.bf16.msra.mxu1 %v3628_v7 }
  0x10   : > { %v3611_v14 = vld [vmem:[%s7995_s1 + $0x1c0] sm:$0xf]  ;;  %v5050_v15 = vld [vmem:[%s7995_s1 + $0x1cc] sm:$0xf0]  ;;  %2664 = vmatpush.bf16.msra.mxu2 %v3756_v8  ;;  %v3484_v16 = vor.u32 %v5018_v13, %v3483_v11 }
  0x11   : > { %v3612_v17 = vor.u32 %v5050_v15, %v3611_v14  ;;  %v3739_v18 = vld [vmem:[%s7995_s1 + $0x2c0] sm:$0xf]  ;;  %v5082_v19 = vld [vmem:[%s7995_s1 + $0x2cc] sm:$0xf0]  ;;  %2677 = vmatpush.bf16.msra.mxu3 %v3884_v12 }
  0x12   : > { %v3867_v20 = vld [vmem:[%s7995_s1 + $0x3c0] sm:$0xf]  ;;  %v3740_v21 = vor.u32 %v5082_v19, %v3739_v18  ;;  %v5114_v22 = vld [vmem:[%s7995_s1 + $0x3cc] sm:$0xf0]  ;;  %2639 = vmatpush.bf16.msra.mxu0 %v3484_v16 }
  0x13   : > { %v3467_v23 = vld [vmem:[%s7995_s1 + $0xa0] sm:$0xf]  ;;  %v5014_v24 = vld [vmem:[%s7995_s1 + $0xac] sm:$0xf0]  ;;  %v3868_v25 = vor.u32 %v5114_v22, %v3867_v20  ;;  %2652 = vmatpush.bf16.msra.mxu1 %v3612_v17 }
  0x14   : > { %v3595_v26 = vld [vmem:[%s7995_s1 + $0x1a0] sm:$0xf]  ;;  %v5046_v27 = vld [vmem:[%s7995_s1 + $0x1ac] sm:$0xf0]  ;;  %v3468_v29 = vor.u32 %v5014_v24, %v3467_v23  ;;  %2665 = vmatpush.bf16.msra.mxu2 %v3740_v21 }
  0x15   : > { %v3723_v28 = vld [vmem:[%s7995_s1 + $0x2a0] sm:$0xf]  ;;  %v5078_v30 = vld [vmem:[%s7995_s1 + $0x2ac] sm:$0xf0]  ;;  %v3596_v33 = vor.u32 %v5046_v27, %v3595_v26  ;;  %2678 = vmatpush.bf16.msra.mxu3 %v3868_v25 }
  0x16   : > { %v3851_v31 = vld [vmem:[%s7995_s1 + $0x3a0] sm:$0xf]  ;;  %v5110_v32 = vld [vmem:[%s7995_s1 + $0x3ac] sm:$0xf0]  ;;  %v3724_v34 = vor.u32 %v5078_v30, %v3723_v28  ;;  %2640 = vmatpush.bf16.msra.mxu0 %v3468_v29 }
  0x17   : > { %v3451_v35 = vld [vmem:[%s7995_s1 + $0x80] sm:$0xf]  ;;  %v5010_v36 = vld [vmem:[%s7995_s1 + $0x8c] sm:$0xf0]  ;;  %v3852_v38 = vor.u32 %v5110_v32, %v3851_v31  ;;  %2653 = vmatpush.bf16.msra.mxu1 %v3596_v33 }
  0x18   : > { %v3579_v37 = vld [vmem:[%s7995_s1 + $0x180] sm:$0xf]  ;;  %v5042_v39 = vld [vmem:[%s7995_s1 + $0x18c] sm:$0xf0]  ;;  %v3452_v44 = vor.u32 %v5010_v36, %v3451_v35  ;;  %2666 = vmatpush.bf16.msra.mxu2 %v3724_v34 }
  0x19   : > { %v3707_v40 = vld [vmem:[%s7995_s1 + $0x280] sm:$0xf]  ;;  %v5074_v41 = vld [vmem:[%s7995_s1 + $0x28c] sm:$0xf0]  ;;  %v3580_v45 = vor.u32 %v5042_v39, %v3579_v37  ;;  %2679 = vmatpush.bf16.msra.mxu3 %v3852_v38 }
  0x1a   : > { %v3835_v42 = vld [vmem:[%s7995_s1 + $0x380] sm:$0xf]  ;;  %v5106_v43 = vld [vmem:[%s7995_s1 + $0x38c] sm:$0xf0]  ;;  %v3708_v46 = vor.u32 %v5074_v41, %v3707_v40  ;;  %2641 = vmatpush.bf16.msra.mxu0 %v3452_v44 }
  0x1b   : > { %v3435_v47 = vld [vmem:[%s7995_s1 + $0x60] sm:$0xf]  ;;  %v5006_v48 = vld [vmem:[%s7995_s1 + $0x6c] sm:$0xf0]  ;;  %v3836_v50 = vor.u32 %v5106_v43, %v3835_v42  ;;  %2654 = vmatpush.bf16.msra.mxu1 %v3580_v45 }
  0x1c   : > { %v3563_v49 = vld [vmem:[%s7995_s1 + $0x160] sm:$0xf]  ;;  %v5038_v51 = vld [vmem:[%s7995_s1 + $0x16c] sm:$0xf0]  ;;  %v3436_v56 = vor.u32 %v5006_v48, %v3435_v47  ;;  %2667 = vmatpush.bf16.msra.mxu2 %v3708_v46 }
  0x1d   : > { %v3691_v52 = vld [vmem:[%s7995_s1 + $0x260] sm:$0xf]  ;;  %v5070_v53 = vld [vmem:[%s7995_s1 + $0x26c] sm:$0xf0]  ;;  %v3564_v57 = vor.u32 %v5038_v51, %v3563_v49  ;;  %2680 = vmatpush.bf16.msra.mxu3 %v3836_v50 }
  0x1e   : > { %v3819_v54 = vld [vmem:[%s7995_s1 + $0x360] sm:$0xf]  ;;  %v5102_v55 = vld [vmem:[%s7995_s1 + $0x36c] sm:$0xf0]  ;;  %v3692_v58 = vor.u32 %v5070_v53, %v3691_v52  ;;  %2642 = vmatpush.bf16.msra.mxu0 %v3436_v56 }
  0x1f   : > { %v3419_v59 = vld [vmem:[%s7995_s1 + $0x40] sm:$0xf]  ;;  %v5002_v60 = vld [vmem:[%s7995_s1 + $0x4c] sm:$0xf0]  ;;  %v3820_v62 = vor.u32 %v5102_v55, %v3819_v54  ;;  %2655 = vmatpush.bf16.msra.mxu1 %v3564_v57 }
  0x20   : > { %v3547_v61 = vld [vmem:[%s7995_s1 + $0x140] sm:$0xf]  ;;  %v5034_v63 = vld [vmem:[%s7995_s1 + $0x14c] sm:$0xf0]  ;;  %v3420_v4 = vor.u32 %v5002_v60, %v3419_v59  ;;  %2668 = vmatpush.bf16.msra.mxu2 %v3692_v58 }
  0x21   : > { %v3675_v0 = vld [vmem:[%s7995_s1 + $0x240] sm:$0xf]  ;;  %v5066_v1 = vld [vmem:[%s7995_s1 + $0x24c] sm:$0xf0]  ;;  %v3548_v5 = vor.u32 %v5034_v63, %v3547_v61  ;;  %2681 = vmatpush.bf16.msra.mxu3 %v3820_v62 }
  0x22   : > { %v3803_v2 = vld [vmem:[%s7995_s1 + $0x340] sm:$0xf]  ;;  %v5098_v3 = vld [vmem:[%s7995_s1 + $0x34c] sm:$0xf0]  ;;  %v3676_v6 = vor.u32 %v5066_v1, %v3675_v0  ;;  %2643 = vmatpush.bf16.msra.mxu0 %v3420_v4 }
  0x23   : > { %v3403_v7 = vld [vmem:[%s7995_s1 + $0x20] sm:$0xf]  ;;  %v4998_v8 = vld [vmem:[%s7995_s1 + $0x2c] sm:$0xf0]  ;;  %v3804_v10 = vor.u32 %v5098_v3, %v3803_v2  ;;  %2656 = vmatpush.bf16.msra.mxu1 %v3548_v5 }
  0x24   : > { %v3531_v9 = vld [vmem:[%s7995_s1 + $0x120] sm:$0xf]  ;;  %v5030_v11 = vld [vmem:[%s7995_s1 + $0x12c] sm:$0xf0]  ;;  %v3404_v16 = vor.u32 %v4998_v8, %v3403_v7  ;;  %2669 = vmatpush.bf16.msra.mxu2 %v3676_v6 }
  0x25   : > { %v3659_v12 = vld [vmem:[%s7995_s1 + $0x220] sm:$0xf]  ;;  %v5062_v13 = vld [vmem:[%s7995_s1 + $0x22c] sm:$0xf0]  ;;  %v3532_v19 = vor.u32 %v5030_v11, %v3531_v9  ;;  %2682 = vmatpush.bf16.msra.mxu3 %v3804_v10 }
  0x26   : > { %v3787_v14 = vld [vmem:[%s7995_s1 + $0x320] sm:$0xf]  ;;  %v5094_v15 = vld [vmem:[%s7995_s1 + $0x32c] sm:$0xf0]  ;;  %v3660_v20 = vor.u32 %v5062_v13, %v3659_v12  ;;  %2644 = vmatpush.bf16.msra.mxu0 %v3404_v16 }
  0x27   : > { %v3387_v17 = vld [vmem:[%s7995_s1] sm:$0xf]  ;;  %v4994_v18 = vld [vmem:[%s7995_s1 + $0xc] sm:$0xf0]  ;;  %v3788_v24 = vor.u32 %v5094_v15, %v3787_v14  ;;  %2657 = vmatpush.bf16.msra.mxu1 %v3532_v19  ;;  %v173_v15 = vld [vmem:[%s5736_s7 + $0x8] sm:$0xff] }
  0x28   : > { %v3515_v21 = vld [vmem:[%s7995_s1 + $0x100] sm:$0xf]  ;;  %v5026_v22 = vld [vmem:[%s7995_s1 + $0x10c] sm:$0xf0]  ;;  %v3388_v31 = vor.u32 %v4994_v18, %v3387_v17  ;;  %2670 = vmatpush.bf16.msra.mxu2 %v3660_v20  ;;  %v598_v20 = vunpack.c.l.b16 %v173_v15 }
  0x29   : > { %v3643_v23 = vld [vmem:[%s7995_s1 + $0x200] sm:$0xf]  ;;  %v5058_v25 = vld [vmem:[%s7995_s1 + $0x20c] sm:$0xf0]  ;;  %v3516_v35 = vor.u32 %v5026_v22, %v3515_v21  ;;  %2683 = vmatpush.bf16.msra.mxu3 %v3788_v24  ;;  %v599_v22 = vunpack.c.h.b16 %v173_v15 }
  0x2a   : > { %v3771_v26 = vld [vmem:[%s7995_s1 + $0x300] sm:$0xf]  ;;  %v5090_v27 = vld [vmem:[%s7995_s1 + $0x30c] sm:$0xf0]  ;;  %v3644_v36 = vor.u32 %v5058_v25, %v3643_v23  ;;  %2645 = vmatpush.bf16.msra.mxu0 %v3388_v31 }
  0x2b   : > { %v4011_v28 = vld [vmem:[%s7995_s1 + $0x4e0] sm:$0xf]  ;;  %v5150_v29 = vld [vmem:[%s7995_s1 + $0x4ec] sm:$0xf0]  ;;  %v3772_v39 = vor.u32 %v5090_v27, %v3771_v26  ;;  %2658 = vmatpush.bf16.msra.mxu1 %v3516_v35 }
  0x2c   : > { %v4139_v30 = vld [vmem:[%s7995_s1 + $0x5e0] sm:$0xf]  ;;  %v5182_v32 = vld [vmem:[%s7995_s1 + $0x5ec] sm:$0xf0]  ;;  %v4012_v40 = vor.u32 %v5150_v29, %v4011_v28  ;;  %2671 = vmatpush.bf16.msra.mxu2 %v3644_v36 }
  0x2d   : > { %v4267_v33 = vld [vmem:[%s7995_s1 + $0x6e0] sm:$0xf]  ;;  %v5214_v34 = vld [vmem:[%s7995_s1 + $0x6ec] sm:$0xf0]  ;;  %v4140_v41 = vor.u32 %v5182_v32, %v4139_v30  ;;  %2684 = vmatpush.bf16.msra.mxu3 %v3772_v39  ;;  %v5764_v30 = vpack.c.b16 %v598_v20, %v598_v20  ;;  %v5768_v32 = vpack.c.b16 %v599_v22, %v599_v22 }
  0x2e   : > { %v4395_v37 = vld [vmem:[%s7995_s1 + $0x7e0] sm:$0xf]  ;;  %v5246_v38 = vld [vmem:[%s7995_s1 + $0x7ec] sm:$0xf0]  ;;  %v4268_v42 = vor.u32 %v5214_v34, %v4267_v33  ;;  %2690 = vmatpush.bf16.msrb.mxu0 %v4012_v40 }
  0x2f   : > { %v3995_v43 = vld [vmem:[%s7995_s1 + $0x4c0] sm:$0xf]  ;;  %v5146_v44 = vld [vmem:[%s7995_s1 + $0x4cc] sm:$0xf0]  ;;  %v4396_v46 = vor.u32 %v5246_v38, %v4395_v37  ;;  %2703 = vmatpush.bf16.msrb.mxu1 %v4140_v41  ;;  %2672 = vmatmul.bf16.vlgmr.msra.gmra.mxu2 %v5764_v30 }
  0x30   : > { %v4123_v45 = vld [vmem:[%s7995_s1 + $0x5c0] sm:$0xf]  ;;  %v5178_v47 = vld [vmem:[%s7995_s1 + $0x5cc] sm:$0xf0]  ;;  %v3996_v52 = vor.u32 %v5146_v44, %v3995_v43  ;;  %2716 = vmatpush.bf16.msrb.mxu2 %v4268_v42  ;;  %2685 = vmatmul.bf16.vlgmr.msra.gmra.mxu3 %v5768_v32 }
  0x31   : > { %v4251_v48 = vld [vmem:[%s7995_s1 + $0x6c0] sm:$0xf]  ;;  %v5210_v49 = vld [vmem:[%s7995_s1 + $0x6cc] sm:$0xf0]  ;;  %v4124_v55 = vor.u32 %v5178_v47, %v4123_v45  ;;  %2729 = vmatpush.bf16.msrb.mxu3 %v4396_v46 }
  0x32   : > { %v4379_v50 = vld [vmem:[%s7995_s1 + $0x7c0] sm:$0xf]  ;;  %v5242_v51 = vld [vmem:[%s7995_s1 + $0x7cc] sm:$0xf0]  ;;  %v4252_v56 = vor.u32 %v5210_v49, %v4251_v48  ;;  %2691 = vmatpush.bf16.msrb.mxu0 %v3996_v52 }
  0x33   : > { %v3979_v53 = vld [vmem:[%s7995_s1 + $0x4a0] sm:$0xf]  ;;  %v5142_v54 = vld [vmem:[%s7995_s1 + $0x4ac] sm:$0xf0]  ;;  %v4380_v59 = vor.u32 %v5242_v51, %v4379_v50  ;;  %2704 = vmatpush.bf16.msrb.mxu1 %v4124_v55 }
  0x34   : > { %v4107_v57 = vld [vmem:[%s7995_s1 + $0x5a0] sm:$0xf]  ;;  %v5174_v58 = vld [vmem:[%s7995_s1 + $0x5ac] sm:$0xf0]  ;;  %v3980_v1 = vor.u32 %v5142_v54, %v3979_v53  ;;  %2717 = vmatpush.bf16.msrb.mxu2 %v4252_v56 }
  0x35   : > { %v4235_v60 = vld [vmem:[%s7995_s1 + $0x6a0] sm:$0xf]  ;;  %v5206_v61 = vld [vmem:[%s7995_s1 + $0x6ac] sm:$0xf0]  ;;  %v4108_v5 = vor.u32 %v5174_v58, %v4107_v57  ;;  %2730 = vmatpush.bf16.msrb.mxu3 %v4380_v59 }
  0x36   : > { %v4363_v62 = vld [vmem:[%s7995_s1 + $0x7a0] sm:$0xf]  ;;  %v5238_v63 = vld [vmem:[%s7995_s1 + $0x7ac] sm:$0xf0]  ;;  %v4236_v6 = vor.u32 %v5206_v61, %v4235_v60  ;;  %2692 = vmatpush.bf16.msrb.mxu0 %v3980_v1 }
  0x37   : > { %v3963_v0 = vld [vmem:[%s7995_s1 + $0x480] sm:$0xf]  ;;  %v5138_v2 = vld [vmem:[%s7995_s1 + $0x48c] sm:$0xf0]  ;;  %v4364_v9 = vor.u32 %v5238_v63, %v4363_v62  ;;  %2705 = vmatpush.bf16.msrb.mxu1 %v4108_v5 }
  0x38   : > { %v4091_v3 = vld [vmem:[%s7995_s1 + $0x580] sm:$0xf]  ;;  %v5170_v4 = vld [vmem:[%s7995_s1 + $0x58c] sm:$0xf0]  ;;  %v3964_v12 = vor.u32 %v5138_v2, %v3963_v0  ;;  %2718 = vmatpush.bf16.msrb.mxu2 %v4236_v6 }
  0x39   : > { %v4219_v7 = vld [vmem:[%s7995_s1 + $0x680] sm:$0xf]  ;;  %v5202_v8 = vld [vmem:[%s7995_s1 + $0x68c] sm:$0xf0]  ;;  %v4092_v13 = vor.u32 %v5170_v4, %v4091_v3  ;;  %2731 = vmatpush.bf16.msrb.mxu3 %v4364_v9  ;;  %v175_v3 = vld [vmem:[%s5736_s7 + $0x18] sm:$0xff] }
  0x3a   : > { %v4347_v10 = vld [vmem:[%s7995_s1 + $0x780] sm:$0xf]  ;;  %v5234_v11 = vld [vmem:[%s7995_s1 + $0x78c] sm:$0xf0]  ;;  %v4220_v14 = vor.u32 %v5202_v8, %v4219_v7  ;;  %2693 = vmatpush.bf16.msrb.mxu0 %v3964_v12  ;;  %v602_v15 = vunpack.c.l.b16 %v175_v3 }
  0x3b   : > { %v172_v16 = vld [vmem:[%s5736_s7] sm:$0xff]  ;;  %v5134_v18 = vld [vmem:[%s7995_s1 + $0x46c] sm:$0xf0]  ;;  %v4348_v24 = vor.u32 %v5234_v11, %v4347_v10  ;;  %2706 = vmatpush.bf16.msrb.mxu1 %v4092_v13 }
  0x3c   : > { %v3947_v17 = vld [vmem:[%s7995_s1 + $0x460] sm:$0xf]  ;;  %v596_v21 = vunpack.c.l.b16 %v172_v16  ;;  %v597_v23 = vunpack.c.h.b16 %v172_v16  ;;  %v5166_v25 = vld [vmem:[%s7995_s1 + $0x56c] sm:$0xf0]  ;;  %2719 = vmatpush.bf16.msrb.mxu2 %v4220_v14 }
  0x3d   : > { %v4075_v19 = vld [vmem:[%s7995_s1 + $0x560] sm:$0xf]  ;;  %v5198_v27 = vld [vmem:[%s7995_s1 + $0x66c] sm:$0xf0]  ;;  %v3948_v33 = vor.u32 %v5134_v18, %v3947_v17  ;;  %2732 = vmatpush.bf16.msrb.mxu3 %v4348_v24 }
  0x3e   : > { %v4203_v26 = vld [vmem:[%s7995_s1 + $0x660] sm:$0xf]  ;;  %v5230_v29 = vld [vmem:[%s7995_s1 + $0x76c] sm:$0xf0]  ;;  %v5766_v31 = vpack.c.b16 %v596_v21, %v596_v21  ;;  %v5770_v34 = vpack.c.b16 %v597_v23, %v597_v23  ;;  %v4076_v35 = vor.u32 %v5166_v25, %v4075_v19  ;;  %v603_v21 = vunpack.c.h.b16 %v175_v3 }
  0x3f   : > { %v4331_v28 = vld [vmem:[%s7995_s1 + $0x760] sm:$0xf]  ;;  %v4204_v36 = vor.u32 %v5198_v27, %v4203_v26  ;;  %v5130_v38 = vld [vmem:[%s7995_s1 + $0x44c] sm:$0xf0]  ;;  %2694 = vmatpush.bf16.msrb.mxu0 %v3948_v33 }
  0x40   : > { %v3931_v37 = vld [vmem:[%s7995_s1 + $0x440] sm:$0xf]  ;;  %v4332_v40 = vor.u32 %v5230_v29, %v4331_v28  ;;  %v5162_v41 = vld [vmem:[%s7995_s1 + $0x54c] sm:$0xf0]  ;;  %2646 = vmatmul.bf16.vlgmr.msra.gmra.mxu0 %v5766_v31  ;;  %2659 = vmatmul.bf16.vlgmr.msra.gmra.mxu1 %v5770_v34 }
  0x41   : > { %v4059_v39 = vld [vmem:[%s7995_s1 + $0x540] sm:$0xf]  ;;  %v5194_v43 = vld [vmem:[%s7995_s1 + $0x64c] sm:$0xf0]  ;;  %v3932_v46 = vor.u32 %v5130_v38, %v3931_v37  ;;  %2707 = vmatpush.bf16.msrb.mxu1 %v4076_v35  ;;  %2720 = vmatpush.bf16.msrb.mxu2 %v4204_v36  ;;  %v5892_v38 = vpack.c.b16 %v602_v15, %v602_v15 }
  0x42   : > { %v4187_v42 = vld [vmem:[%s7995_s1 + $0x640] sm:$0xf]  ;;  %v5226_v45 = vld [vmem:[%s7995_s1 + $0x74c] sm:$0xf0]  ;;  %v4060_v47 = vor.u32 %v5162_v41, %v4059_v39  ;;  %2733 = vmatpush.bf16.msrb.mxu3 %v4332_v40 }
  0x43   : > { %v4315_v44 = vld [vmem:[%s7995_s1 + $0x740] sm:$0xf]  ;;  %v4188_v48 = vor.u32 %v5194_v43, %v4187_v42  ;;  %v5126_v50 = vld [vmem:[%s7995_s1 + $0x42c] sm:$0xf0]  ;;  %2695 = vmatpush.bf16.msrb.mxu0 %v3932_v46  ;;  %v5902_v42 = vpack.c.b16 %v603_v21, %v603_v21 }
  0x44   : > { %v3915_v49 = vld [vmem:[%s7995_s1 + $0x420] sm:$0xf]  ;;  %v4316_v52 = vor.u32 %v5226_v45, %v4315_v44  ;;  %v5158_v53 = vld [vmem:[%s7995_s1 + $0x52c] sm:$0xf0] }
  0x45   : > { %v4043_v51 = vld [vmem:[%s7995_s1 + $0x520] sm:$0xf]  ;;  %v5190_v55 = vld [vmem:[%s7995_s1 + $0x62c] sm:$0xf0]  ;;  %v3916_v59 = vor.u32 %v5126_v50, %v3915_v49  ;;  %2708 = vmatpush.bf16.msrb.mxu1 %v4060_v47  ;;  %2721 = vmatpush.bf16.msrb.mxu2 %v4188_v48 }
  0x46   : > { %v4171_v54 = vld [vmem:[%s7995_s1 + $0x620] sm:$0xf]  ;;  %v5222_v57 = vld [vmem:[%s7995_s1 + $0x72c] sm:$0xf0]  ;;  %v4044_v63 = vor.u32 %v5158_v53, %v4043_v51  ;;  %2734 = vmatpush.bf16.msrb.mxu3 %v4316_v52 }
  0x47   : > { %v4299_v56 = vld [vmem:[%s7995_s1 + $0x720] sm:$0xf]  ;;  %v5122_v60 = vld [vmem:[%s7995_s1 + $0x40c] sm:$0xf0]  ;;  %v4172_v0 = vor.u32 %v5190_v55, %v4171_v54  ;;  %2696 = vmatpush.bf16.msrb.mxu0 %v3916_v59 }
  0x48   : > { %v3899_v58 = vld [vmem:[%s7995_s1 + $0x400] sm:$0xf]  ;;  %v5154_v62 = vld [vmem:[%s7995_s1 + $0x50c] sm:$0xf0]  ;;  %v4300_v4 = vor.u32 %v5222_v57, %v4299_v56 }
  0x49   : > { %v4027_v61 = vld [vmem:[%s7995_s1 + $0x500] sm:$0xf]  ;;  %v5186_v2 = vld [vmem:[%s7995_s1 + $0x60c] sm:$0xf0]  ;;  %v3900_v11 = vor.u32 %v5122_v60, %v3899_v58  ;;  %2709 = vmatpush.bf16.msrb.mxu1 %v4044_v63  ;;  %2722 = vmatpush.bf16.msrb.mxu2 %v4172_v0 }
  0x4a   : > { %v4155_v1 = vld [vmem:[%s7995_s1 + $0x600] sm:$0xf]  ;;  %v5218_v6 = vld [vmem:[%s7995_s1 + $0x70c] sm:$0xf0]  ;;  %v4028_v16 = vor.u32 %v5154_v62, %v4027_v61  ;;  %2735 = vmatpush.bf16.msrb.mxu3 %v4300_v4 }
  0x4b   : > { %v4283_v5 = vld [vmem:[%s7995_s1 + $0x700] sm:$0xf]  ;;  %v174_v7 = vld [vmem:[%s5736_s7 + $0x10] sm:$0xff]  ;;  %v4156_v17 = vor.u32 %v5186_v2, %v4155_v1  ;;  %2697 = vmatpush.bf16.msrb.mxu0 %v3900_v11 }
  0x4c   : > { %v4523_v8 = vld [vmem:[%s7995_s1 + $0x8e0] sm:$0xf]  ;;  %v5278_v9 = vld [vmem:[%s7995_s1 + $0x8ec] sm:$0xf0]  ;;  %v600_v20 = vunpack.c.l.b16 %v174_v7  ;;  %v4284_v22 = vor.u32 %v5218_v6, %v4283_v5  ;;  %v601_v24 = vunpack.c.h.b16 %v174_v7 }
  0x4d   : > { %v4651_v10 = vld [vmem:[%s7995_s1 + $0x9e0] sm:$0xf]  ;;  %v5310_v12 = vld [vmem:[%s7995_s1 + $0x9ec] sm:$0xf0]  ;;  %v4524_v23 = vor.u32 %v5278_v9, %v4523_v8  ;;  %2710 = vmatpush.bf16.msrb.mxu1 %v4028_v16  ;;  %2723 = vmatpush.bf16.msrb.mxu2 %v4156_v17 }
  0x4e   : > { %v4779_v13 = vld [vmem:[%s7995_s1 + $0xae0] sm:$0xf]  ;;  %v5342_v14 = vld [vmem:[%s7995_s1 + $0xaec] sm:$0xf0]  ;;  %v4652_v25 = vor.u32 %v5310_v12, %v4651_v10  ;;  %v5900_v41 = vpack.c.b16 %v600_v20, %v600_v20  ;;  %2736 = vmatpush.bf16.msrb.mxu3 %v4284_v22  ;;  %v5904_v44 = vpack.c.b16 %v601_v24, %v601_v24 }
  0x4f   : > { %v4907_v18 = vld [vmem:[%s7995_s1 + $0xbe0] sm:$0xf]  ;;  %v5374_v19 = vld [vmem:[%s7995_s1 + $0xbec] sm:$0xf0]  ;;  %v4780_v26 = vor.u32 %v5342_v14, %v4779_v13  ;;  %2742 = vmatpush.bf16.msra.mxu0 %v4524_v23 }
  0x50   : > { %v4507_v27 = vld [vmem:[%s7995_s1 + $0x8c0] sm:$0xf]  ;;  %v5274_v28 = vld [vmem:[%s7995_s1 + $0x8cc] sm:$0xf0]  ;;  %v4908_v33 = vor.u32 %v5374_v19, %v4907_v18  ;;  %2724 = vmatmul.bf16.vlgmr.msrb.gmra.mxu2 %v5892_v38  ;;  %2698 = vmatmul.bf16.vlgmr.msrb.gmra.mxu0 %v5900_v41 }
  0x51   : > { %v4635_v29 = vld [vmem:[%s7995_s1 + $0x9c0] sm:$0xf]  ;;  %v5306_v35 = vld [vmem:[%s7995_s1 + $0x9cc] sm:$0xf0]  ;;  %v4508_v43 = vor.u32 %v5274_v28, %v4507_v27  ;;  %2755 = vmatpush.bf16.msra.mxu1 %v4652_v25  ;;  %2768 = vmatpush.bf16.msra.mxu2 %v4780_v26 }
  0x52   : > { %v4763_v36 = vld [vmem:[%s7995_s1 + $0xac0] sm:$0xf]  ;;  %v5338_v37 = vld [vmem:[%s7995_s1 + $0xacc] sm:$0xf0]  ;;  %v4636_v45 = vor.u32 %v5306_v35, %v4635_v29  ;;  %2781 = vmatpush.bf16.msra.mxu3 %v4908_v33  ;;  %2711 = vmatmul.bf16.vlgmr.msrb.gmra.mxu1 %v5904_v44 }
  0x53   : > { %v4891_v39 = vld [vmem:[%s7995_s1 + $0xbc0] sm:$0xf]  ;;  %v5370_v40 = vld [vmem:[%s7995_s1 + $0xbcc] sm:$0xf0]  ;;  %v4764_v46 = vor.u32 %v5338_v37, %v4763_v36  ;;  %2737 = vmatmul.bf16.vlgmr.msrb.gmra.mxu3 %v5902_v42  ;;  %2743 = vmatpush.bf16.msra.mxu0 %v4508_v43 }
  0x54   : > { %v4491_v47 = vld [vmem:[%s7995_s1 + $0x8a0] sm:$0xf]  ;;  %v5270_v48 = vld [vmem:[%s7995_s1 + $0x8ac] sm:$0xf0]  ;;  %v4892_v50 = vor.u32 %v5370_v40, %v4891_v39 }
  0x55   : > { %v4619_v49 = vld [vmem:[%s7995_s1 + $0x9a0] sm:$0xf]  ;;  %v5302_v51 = vld [vmem:[%s7995_s1 + $0x9ac] sm:$0xf0]  ;;  %v4492_v56 = vor.u32 %v5270_v48, %v4491_v47  ;;  %2756 = vmatpush.bf16.msra.mxu1 %v4636_v45  ;;  %2769 = vmatpush.bf16.msra.mxu2 %v4764_v46 }
  0x56   : > { %v4747_v52 = vld [vmem:[%s7995_s1 + $0xaa0] sm:$0xf]  ;;  %v5334_v53 = vld [vmem:[%s7995_s1 + $0xaac] sm:$0xf0]  ;;  %v4620_v57 = vor.u32 %v5302_v51, %v4619_v49  ;;  %2782 = vmatpush.bf16.msra.mxu3 %v4892_v50 }
  0x57   : > { %v4875_v54 = vld [vmem:[%s7995_s1 + $0xba0] sm:$0xf]  ;;  %v5366_v55 = vld [vmem:[%s7995_s1 + $0xbac] sm:$0xf0]  ;;  %v4748_v58 = vor.u32 %v5334_v53, %v4747_v52  ;;  %2744 = vmatpush.bf16.msra.mxu0 %v4492_v56 }
  0x58   : > { %v4475_v59 = vld [vmem:[%s7995_s1 + $0x880] sm:$0xf]  ;;  %v5266_v60 = vld [vmem:[%s7995_s1 + $0x88c] sm:$0xf0]  ;;  %v4876_v62 = vor.u32 %v5366_v55, %v4875_v54 }
  0x59   : > { %v4603_v61 = vld [vmem:[%s7995_s1 + $0x980] sm:$0xf]  ;;  %v5298_v63 = vld [vmem:[%s7995_s1 + $0x98c] sm:$0xf0]  ;;  %v4476_v4 = vor.u32 %v5266_v60, %v4475_v59  ;;  %2757 = vmatpush.bf16.msra.mxu1 %v4620_v57  ;;  %2770 = vmatpush.bf16.msra.mxu2 %v4748_v58 }
  0x5a   : > { %v4731_v0 = vld [vmem:[%s7995_s1 + $0xa80] sm:$0xf]  ;;  %v5330_v1 = vld [vmem:[%s7995_s1 + $0xa8c] sm:$0xf0]  ;;  %v4604_v5 = vor.u32 %v5298_v63, %v4603_v61  ;;  %2783 = vmatpush.bf16.msra.mxu3 %v4876_v62  ;;  %v177_v61 = vld [vmem:[%s5736_s7 + $0x28] sm:$0xff] }
  0x5b   : > { %v4859_v2 = vld [vmem:[%s7995_s1 + $0xb80] sm:$0xf]  ;;  %v5362_v3 = vld [vmem:[%s7995_s1 + $0xb8c] sm:$0xf0]  ;;  %v4732_v6 = vor.u32 %v5330_v1, %v4731_v0  ;;  %2745 = vmatpush.bf16.msra.mxu0 %v4476_v4  ;;  %v5020_v0 = vld [vmem:[%s7995_s1 + $0xe4] sm:$0xf] }
  0x5c   : > { %v4459_v7 = vld [vmem:[%s7995_s1 + $0x860] sm:$0xf]  ;;  %v5262_v8 = vld [vmem:[%s7995_s1 + $0x86c] sm:$0xf0]  ;;  %v4860_v10 = vor.u32 %v5362_v3, %v4859_v2  ;;  %v3501_v2 = vld [vmem:[%s7995_s1 + $0xf0] sm:$0xf0] }
  0x5d   : > { %v4587_v9 = vld [vmem:[%s7995_s1 + $0x960] sm:$0xf]  ;;  %v5294_v11 = vld [vmem:[%s7995_s1 + $0x96c] sm:$0xf0]  ;;  %v4460_v16 = vor.u32 %v5262_v8, %v4459_v7  ;;  %2758 = vmatpush.bf16.msra.mxu1 %v4604_v5  ;;  %2771 = vmatpush.bf16.msra.mxu2 %v4732_v6  ;;  %v5052_v3 = vld [vmem:[%s7995_s1 + $0x1e4] sm:$0xf] }
  0x5e   : > { %v4715_v12 = vld [vmem:[%s7995_s1 + $0xa60] sm:$0xf]  ;;  %v5326_v13 = vld [vmem:[%s7995_s1 + $0xa6c] sm:$0xf0]  ;;  %v4588_v17 = vor.u32 %v5294_v11, %v4587_v9  ;;  %2784 = vmatpush.bf16.msra.mxu3 %v4860_v10  ;;  %v3629_v4 = vld [vmem:[%s7995_s1 + $0x1f0] sm:$0xf0]  ;;  %v606_v10 = vunpack.c.l.b16 %v177_v61 }
  0x5f   : > { %v4843_v14 = vld [vmem:[%s7995_s1 + $0xb60] sm:$0xf]  ;;  %v5358_v15 = vld [vmem:[%s7995_s1 + $0xb6c] sm:$0xf0]  ;;  %v4716_v18 = vor.u32 %v5326_v13, %v4715_v12  ;;  %2746 = vmatpush.bf16.msra.mxu0 %v4460_v16  ;;  %v5084_v8 = vld [vmem:[%s7995_s1 + $0x2e4] sm:$0xf]  ;;  %v3632_v16 = vor.u32 %v5052_v3, %v3629_v4 }
  0x60   : > { %v4443_v19 = vld [vmem:[%s7995_s1 + $0x840] sm:$0xf]  ;;  %v5258_v20 = vld [vmem:[%s7995_s1 + $0x84c] sm:$0xf0]  ;;  %v4844_v22 = vor.u32 %v5358_v15, %v4843_v14  ;;  %v3757_v9 = vld [vmem:[%s7995_s1 + $0x2f0] sm:$0xf0]  ;;  %v607_v14 = vunpack.c.h.b16 %v177_v61  ;;  %v3504_v15 = vor.u32 %v5020_v0, %v3501_v2 }
  0x61   : > { %v4571_v21 = vld [vmem:[%s7995_s1 + $0x940] sm:$0xf]  ;;  %v5290_v23 = vld [vmem:[%s7995_s1 + $0x94c] sm:$0xf0]  ;;  %v4444_v28 = vor.u32 %v5258_v20, %v4443_v19  ;;  %2759 = vmatpush.bf16.msra.mxu1 %v4588_v17  ;;  %2772 = vmatpush.bf16.msra.mxu2 %v4716_v18  ;;  %v5016_v19 = vld [vmem:[%s7995_s1 + $0xc4] sm:$0xf]  ;;  %v3760_v20 = vor.u32 %v5084_v8, %v3757_v9 }
  0x62   : > { %v4699_v24 = vld [vmem:[%s7995_s1 + $0xa40] sm:$0xf]  ;;  %v5322_v25 = vld [vmem:[%s7995_s1 + $0xa4c] sm:$0xf0]  ;;  %v4572_v29 = vor.u32 %v5290_v23, %v4571_v21  ;;  %2785 = vmatpush.bf16.msra.mxu3 %v4844_v22  ;;  %v3485_v22 = vld [vmem:[%s7995_s1 + $0xd0] sm:$0xf0] }
  0x63   : > { %v4827_v26 = vld [vmem:[%s7995_s1 + $0xb40] sm:$0xf]  ;;  %v5354_v27 = vld [vmem:[%s7995_s1 + $0xb4c] sm:$0xf0]  ;;  %v4700_v33 = vor.u32 %v5322_v25, %v4699_v24  ;;  %2747 = vmatpush.bf16.msra.mxu0 %v4444_v28  ;;  %v5048_v23 = vld [vmem:[%s7995_s1 + $0x1c4] sm:$0xf]  ;;  %v6100_v25 = vpack.c.b16 %v606_v10, %v606_v10 }
  0x64   : > { %v4427_v35 = vld [vmem:[%s7995_s1 + $0x820] sm:$0xf]  ;;  %v5254_v36 = vld [vmem:[%s7995_s1 + $0x82c] sm:$0xf0]  ;;  %v4828_v39 = vor.u32 %v5354_v27, %v4827_v26  ;;  %v3613_v24 = vld [vmem:[%s7995_s1 + $0x1d0] sm:$0xf0] }
  0x65   : > { %v4555_v37 = vld [vmem:[%s7995_s1 + $0x920] sm:$0xf]  ;;  %v5286_v40 = vld [vmem:[%s7995_s1 + $0x92c] sm:$0xf0]  ;;  %v4428_v49 = vor.u32 %v5254_v36, %v4427_v35  ;;  %2760 = vmatpush.bf16.msra.mxu1 %v4572_v29  ;;  %2773 = vmatpush.bf16.msra.mxu2 %v4700_v33  ;;  %v5080_v27 = vld [vmem:[%s7995_s1 + $0x2c4] sm:$0xf]  ;;  %v6110_v29 = vpack.c.b16 %v607_v14, %v607_v14  ;;  %v3488_v35 = vor.u32 %v5016_v19, %v3485_v22 }
  0x66   : > { %v4683_v43 = vld [vmem:[%s7995_s1 + $0xa20] sm:$0xf]  ;;  %v5318_v45 = vld [vmem:[%s7995_s1 + $0xa2c] sm:$0xf0]  ;;  %v4556_v53 = vor.u32 %v5286_v40, %v4555_v37  ;;  %2786 = vmatpush.bf16.msra.mxu3 %v4828_v39  ;;  %v3741_v28 = vld [vmem:[%s7995_s1 + $0x2d0] sm:$0xf0]  ;;  %v3616_v36 = vor.u32 %v5048_v23, %v3613_v24 }
  0x67   : > { %v4811_v46 = vld [vmem:[%s7995_s1 + $0xb20] sm:$0xf]  ;;  %v5350_v47 = vld [vmem:[%s7995_s1 + $0xb2c] sm:$0xf0]  ;;  %v4684_v54 = vor.u32 %v5318_v45, %v4683_v43  ;;  %2748 = vmatpush.bf16.msra.mxu0 %v4428_v49  ;;  %v5012_v40 = vld [vmem:[%s7995_s1 + $0xa4] sm:$0xf]  ;;  %v3744_v43 = vor.u32 %v5080_v27, %v3741_v28 }
  0x68   : > { %v4411_v48 = vld [vmem:[%s7995_s1 + $0x800] sm:$0xf]  ;;  %v5250_v50 = vld [vmem:[%s7995_s1 + $0x80c] sm:$0xf0]  ;;  %v4812_v58 = vor.u32 %v5350_v47, %v4811_v46  ;;  %v3469_v45 = vld [vmem:[%s7995_s1 + $0xb0] sm:$0xf0] }
  0x69   : > { %v4539_v51 = vld [vmem:[%s7995_s1 + $0x900] sm:$0xf]  ;;  %v5282_v52 = vld [vmem:[%s7995_s1 + $0x90c] sm:$0xf0]  ;;  %v4412_v1 = vor.u32 %v5250_v50, %v4411_v48  ;;  %2761 = vmatpush.bf16.msra.mxu1 %v4556_v53  ;;  %2774 = vmatpush.bf16.msra.mxu2 %v4684_v54  ;;  %v5044_v46 = vld [vmem:[%s7995_s1 + $0x1a4] sm:$0xf] }
  0x6a   : > { %v4667_v55 = vld [vmem:[%s7995_s1 + $0xa00] sm:$0xf]  ;;  %v5314_v56 = vld [vmem:[%s7995_s1 + $0xa0c] sm:$0xf0]  ;;  %v4540_v6 = vor.u32 %v5282_v52, %v4539_v51  ;;  %2787 = vmatpush.bf16.msra.mxu3 %v4812_v58  ;;  %v3597_v47 = vld [vmem:[%s7995_s1 + $0x1b0] sm:$0xf0]  ;;  %v3472_v52 = vor.u32 %v5012_v40, %v3469_v45 }
  0x6b   : > { %v176_v57 = vld [vmem:[%s5736_s7 + $0x20] sm:$0xff]  ;;  %v5346_v60 = vld [vmem:[%s7995_s1 + $0xb0c] sm:$0xf0]  ;;  %v4668_v7 = vor.u32 %v5314_v56, %v4667_v55  ;;  %2749 = vmatpush.bf16.msra.mxu0 %v4412_v1  ;;  %v3725_v49 = vld [vmem:[%s7995_s1 + $0x2b0] sm:$0xf0]  ;;  %v3600_v53 = vor.u32 %v5044_v46, %v3597_v47 }
  0x6c   : > { %v4795_v59 = vld [vmem:[%s7995_s1 + $0xb00] sm:$0xf]  ;;  %v5390_v63 = vld [vmem:[%s7995_s1 + $0xc6c] sm:$0xf0]  ;;  %v604_v5 = vunpack.c.l.b16 %v176_v57  ;;  %v605_v11 = vunpack.c.h.b16 %v176_v57  ;;  %v5076_v48 = vld [vmem:[%s7995_s1 + $0x2a4] sm:$0xf] }
  0x6d   : > { %v4971_v62 = vld [vmem:[%s7995_s1 + $0xc60] sm:$0xf]  ;;  %v4796_v12 = vor.u32 %v5346_v60, %v4795_v59  ;;  %v5386_v18 = vld [vmem:[%s7995_s1 + $0xc4c] sm:$0xf0]  ;;  %2762 = vmatpush.bf16.msra.mxu1 %v4540_v6  ;;  %2775 = vmatpush.bf16.msra.mxu2 %v4668_v7  ;;  %v5008_v55 = vld [vmem:[%s7995_s1 + $0x84] sm:$0xf]  ;;  %v3728_v57 = vor.u32 %v5076_v48, %v3725_v49 }
  0x6e   : > { %v4972_v13 = vor.u32 %v5390_v63, %v4971_v62  ;;  %v4955_v17 = vld [vmem:[%s7995_s1 + $0xc40] sm:$0xf]  ;;  %v6089_v21 = vpack.c.b16 %v604_v5, %v604_v5  ;;  %v6102_v26 = vpack.c.b16 %v605_v11, %v605_v11  ;;  %v5382_v39 = vld [vmem:[%s7995_s1 + $0xc2c] sm:$0xf0]  ;;  %v3453_v56 = vld [vmem:[%s7995_s1 + $0x90] sm:$0xf0] }
  0x6f   : > { %2788 = vmatpush.bf16.msra.mxu3 %v4796_v12  ;;  %v4956_v33 = vor.u32 %v5386_v18, %v4955_v17  ;;  %v4939_v37 = vld [vmem:[%s7995_s1 + $0xc20] sm:$0xf]  ;;  %v5378_v54 = vld [vmem:[%s7995_s1 + $0xc0c] sm:$0xf0]  ;;  %v5040_v58 = vld [vmem:[%s7995_s1 + $0x184] sm:$0xf]  ;;  %v3456_v2 = vor.u32 %v5008_v55, %v3453_v56 }
  0x70   : > { %2798 = vmatpush.bf16.msrb.mxu0 %v4972_v13  ;;  %2776 = vmatmul.bf16.vlgmr.msra.gmra.mxu2 %v6100_v25  ;;  %v4940_v50 = vor.u32 %v5382_v39, %v4939_v37  ;;  %v4923_v51 = vld [vmem:[%s7995_s1 + $0xc00] sm:$0xf]  ;;  %v3581_v59 = vld [vmem:[%s7995_s1 + $0x190] sm:$0xf0]  ;;  %v5072_v60 = vld [vmem:[%s7995_s1 + $0x284] sm:$0xf] }
  0x71   : > { %2807 = vmatpush.bf16.msrb.mxu1 %v3504_v15  ;;  %2820 = vmatpush.bf16.msrb.mxu2 %v3632_v16  ;;  %v3709_v61 = vld [vmem:[%s7995_s1 + $0x290] sm:$0xf0]  ;;  %v5116_v62 = vld [vmem:[%s7995_s1 + $0x3e4] sm:$0xf]  ;;  %v4924_v0 = vor.u32 %v5378_v54, %v4923_v51  ;;  %v178_v1 = vld [vmem:[%s5736_s7 + $0x30] sm:$0xf]  ;;  %v3584_v3 = vor.u32 %v5040_v58, %v3581_v59 }
  0x72   : > { %2750 = vmatmul.bf16.vlgmr.msra.gmra.mxu0 %v6089_v21  ;;  %2763 = vmatmul.bf16.vlgmr.msra.gmra.mxu1 %v6102_v26  ;;  %v3885_v63 = vld [vmem:[%s7995_s1 + $0x3f0] sm:$0xf0]  ;;  %v5004_v4 = vld [vmem:[%s7995_s1 + $0x64] sm:$0xf]  ;;  %v3712_v6 = vor.u32 %v5072_v60, %v3709_v61  ;;  %v608_v14 = vunpack.c.l.b16 %v178_v1 }
  0x73   : > { %2833 = vmatpush.bf16.msrb.mxu3 %v3760_v20  ;;  %v3437_v5 = vld [vmem:[%s7995_s1 + $0x70] sm:$0xf0]  ;;  %v3888_v7 = vor.u32 %v5116_v62, %v3885_v63  ;;  %v5036_v8 = vld [vmem:[%s7995_s1 + $0x164] sm:$0xf] }
  0x74   : > { %2789 = vmatmul.bf16.vlgmr.msra.gmra.mxu3 %v6110_v29  ;;  %2799 = vmatpush.bf16.msrb.mxu0 %v4956_v33  ;;  %v3565_v9 = vld [vmem:[%s7995_s1 + $0x170] sm:$0xf0]  ;;  %v5068_v10 = vld [vmem:[%s7995_s1 + $0x264] sm:$0xf]  ;;  %v3440_v15 = vor.u32 %v5004_v4, %v3437_v5  ;;  %v6210_v27 = vpack.c.b16 %v608_v14, %v608_v14 }
  0x75   : > { %2808 = vmatpush.bf16.msrb.mxu1 %v3488_v35  ;;  %2821 = vmatpush.bf16.msrb.mxu2 %v3616_v36  ;;  %v3693_v11 = vld [vmem:[%s7995_s1 + $0x270] sm:$0xf0]  ;;  %v5112_v12 = vld [vmem:[%s7995_s1 + $0x3c4] sm:$0xf]  ;;  %v3568_v16 = vor.u32 %v5036_v8, %v3565_v9 }
  0x76   : > { %v3869_v13 = vld [vmem:[%s7995_s1 + $0x3d0] sm:$0xf0]  ;;  %v5000_v17 = vld [vmem:[%s7995_s1 + $0x44] sm:$0xf]  ;;  %v3696_v19 = vor.u32 %v5068_v10, %v3693_v11 }
  0x77   : > { %2834 = vmatpush.bf16.msrb.mxu3 %v3744_v43  ;;  %v3421_v18 = vld [vmem:[%s7995_s1 + $0x50] sm:$0xf0]  ;;  %v3872_v20 = vor.u32 %v5112_v12, %v3869_v13  ;;  %v5032_v22 = vld [vmem:[%s7995_s1 + $0x144] sm:$0xf] }
  0x78   : > { %2800 = vmatpush.bf16.msrb.mxu0 %v4940_v50  ;;  %v3549_v23 = vld [vmem:[%s7995_s1 + $0x150] sm:$0xf0]  ;;  %v5064_v24 = vld [vmem:[%s7995_s1 + $0x244] sm:$0xf]  ;;  %v3424_v36 = vor.u32 %v5000_v17, %v3421_v18 }
  0x79   : > { %2809 = vmatpush.bf16.msrb.mxu1 %v3472_v52  ;;  %2822 = vmatpush.bf16.msrb.mxu2 %v3600_v53  ;;  %v3677_v28 = vld [vmem:[%s7995_s1 + $0x250] sm:$0xf0]  ;;  %v5108_v33 = vld [vmem:[%s7995_s1 + $0x3a4] sm:$0xf]  ;;  %v3552_v37 = vor.u32 %v5032_v22, %v3549_v23 }
  0x7a   : > { %v3853_v35 = vld [vmem:[%s7995_s1 + $0x3b0] sm:$0xf0]  ;;  %v4996_v39 = vld [vmem:[%s7995_s1 + $0x24] sm:$0xf]  ;;  %v3680_v43 = vor.u32 %v5064_v24, %v3677_v28 }
  0x7b   : > { %2835 = vmatpush.bf16.msrb.mxu3 %v3728_v57  ;;  %v3405_v40 = vld [vmem:[%s7995_s1 + $0x30] sm:$0xf0]  ;;  %v3856_v45 = vor.u32 %v5108_v33, %v3853_v35  ;;  %v5028_v46 = vld [vmem:[%s7995_s1 + $0x124] sm:$0xf] }
  0x7c   : > { %2801 = vmatpush.bf16.msrb.mxu0 %v4924_v0  ;;  %v3533_v47 = vld [vmem:[%s7995_s1 + $0x130] sm:$0xf0]  ;;  %v5060_v48 = vld [vmem:[%s7995_s1 + $0x224] sm:$0xf]  ;;  %v3408_v52 = vor.u32 %v4996_v39, %v3405_v40 }
  0x7d   : > { %2810 = vmatpush.bf16.msrb.mxu1 %v3456_v2  ;;  %2823 = vmatpush.bf16.msrb.mxu2 %v3584_v3  ;;  %v3661_v49 = vld [vmem:[%s7995_s1 + $0x230] sm:$0xf0]  ;;  %v5104_v50 = vld [vmem:[%s7995_s1 + $0x384] sm:$0xf]  ;;  %v3536_v53 = vor.u32 %v5028_v46, %v3533_v47 }
  0x7e   : > { %v3837_v51 = vld [vmem:[%s7995_s1 + $0x390] sm:$0xf0]  ;;  %v4992_v54 = vld [vmem:[%s7995_s1 + $0x4] sm:$0xf]  ;;  %v3664_v57 = vor.u32 %v5060_v48, %v3661_v49 }
  0x7f   : > { %2836 = vmatpush.bf16.msrb.mxu3 %v3712_v6  ;;  %v3389_v55 = vld [vmem:[%s7995_s1 + $0x10] sm:$0xf0]  ;;  %v5024_v56 = vld [vmem:[%s7995_s1 + $0x104] sm:$0xf]  ;;  %v3840_v58 = vor.u32 %v5104_v50, %v3837_v51 }
  0x80   : > { %2846 = vmatpush.bf16.msra.mxu0 %v3888_v7  ;;  %v3517_v59 = vld [vmem:[%s7995_s1 + $0x110] sm:$0xf0]  ;;  %v5056_v60 = vld [vmem:[%s7995_s1 + $0x204] sm:$0xf]  ;;  %v3392_v4 = vor.u32 %v4992_v54, %v3389_v55 }
  0x81   : > { %2811 = vmatpush.bf16.msrb.mxu1 %v3440_v15  ;;  %2824 = vmatpush.bf16.msrb.mxu2 %v3568_v16  ;;  %v3645_v61 = vld [vmem:[%s7995_s1 + $0x210] sm:$0xf0]  ;;  %v5100_v62 = vld [vmem:[%s7995_s1 + $0x364] sm:$0xf]  ;;  %v3520_v5 = vor.u32 %v5024_v56, %v3517_v59 }
  0x82   : > { %4985 = vmatmul.msk.bf16.vlgmr.msrb.gmra.mxu0 %vm2634_vm0, %v6210_v27  ;;  %v3821_v63 = vld [vmem:[%s7995_s1 + $0x370] sm:$0xf0]  ;;  %v5148_v0 = vld [vmem:[%s7995_s1 + $0x4e4] sm:$0xf]  ;;  %v3648_v8 = vor.u32 %v5056_v60, %v3645_v61 }
  0x83   : > { %2837 = vmatpush.bf16.msrb.mxu3 %v3696_v19  ;;  %v4013_v1 = vld [vmem:[%s7995_s1 + $0x4f0] sm:$0xf0]  ;;  %v5180_v2 = vld [vmem:[%s7995_s1 + $0x5e4] sm:$0xf]  ;;  %v3824_v9 = vor.u32 %v5100_v62, %v3821_v63 }
  0x84   : > { %2847 = vmatpush.bf16.msra.mxu0 %v3872_v20  ;;  %v4141_v3 = vld [vmem:[%s7995_s1 + $0x5f0] sm:$0xf0]  ;;  %v5212_v6 = vld [vmem:[%s7995_s1 + $0x6e4] sm:$0xf]  ;;  %v4016_v10 = vor.u32 %v5148_v0, %v4013_v1 }
  0x85   : > { %2812 = vmatpush.bf16.msrb.mxu1 %v3424_v36  ;;  %2825 = vmatpush.bf16.msrb.mxu2 %v3552_v37  ;;  %v4269_v7 = vld [vmem:[%s7995_s1 + $0x6f0] sm:$0xf0]  ;;  %v4144_v11 = vor.u32 %v5180_v2, %v4141_v3  ;;  %v5096_v12 = vld [vmem:[%s7995_s1 + $0x344] sm:$0xf] }
  0x86   : > { %v3805_v13 = vld [vmem:[%s7995_s1 + $0x350] sm:$0xf0]  ;;  %v5144_v14 = vld [vmem:[%s7995_s1 + $0x4c4] sm:$0xf]  ;;  %v4272_v15 = vor.u32 %v5212_v6, %v4269_v7 }
  0x87   : > { %2838 = vmatpush.bf16.msrb.mxu3 %v3680_v43  ;;  %v3997_v16 = vld [vmem:[%s7995_s1 + $0x4d0] sm:$0xf0]  ;;  %v5176_v17 = vld [vmem:[%s7995_s1 + $0x5c4] sm:$0xf]  ;;  %v3808_v22 = vor.u32 %v5096_v12, %v3805_v13 }
  0x88   : > { %2848 = vmatpush.bf16.msra.mxu0 %v3856_v45  ;;  %v4125_v18 = vld [vmem:[%s7995_s1 + $0x5d0] sm:$0xf0]  ;;  %v5208_v19 = vld [vmem:[%s7995_s1 + $0x6c4] sm:$0xf]  ;;  %v4000_v23 = vor.u32 %v5144_v14, %v3997_v16 }
  0x89   : > { %2813 = vmatpush.bf16.msrb.mxu1 %v3408_v52  ;;  %2826 = vmatpush.bf16.msrb.mxu2 %v3536_v53  ;;  %v4253_v20 = vld [vmem:[%s7995_s1 + $0x6d0] sm:$0xf0]  ;;  %v4128_v24 = vor.u32 %v5176_v17, %v4125_v18  ;;  %v5092_v28 = vld [vmem:[%s7995_s1 + $0x324] sm:$0xf] }
  0x8a   : > { %v3789_v33 = vld [vmem:[%s7995_s1 + $0x330] sm:$0xf0]  ;;  %v5140_v35 = vld [vmem:[%s7995_s1 + $0x4a4] sm:$0xf]  ;;  %v4256_v36 = vor.u32 %v5208_v19, %v4253_v20 }
  0x8b   : > { %2839 = vmatpush.bf16.msrb.mxu3 %v3664_v57  ;;  %v3981_v37 = vld [vmem:[%s7995_s1 + $0x4b0] sm:$0xf0]  ;;  %v5172_v39 = vld [vmem:[%s7995_s1 + $0x5a4] sm:$0xf]  ;;  %v3792_v46 = vor.u32 %v5092_v28, %v3789_v33 }
  0x8c   : > { %2849 = vmatpush.bf16.msra.mxu0 %v3840_v58  ;;  %v4109_v40 = vld [vmem:[%s7995_s1 + $0x5b0] sm:$0xf0]  ;;  %v5204_v43 = vld [vmem:[%s7995_s1 + $0x6a4] sm:$0xf]  ;;  %v3984_v48 = vor.u32 %v5140_v35, %v3981_v37 }
  0x8d   : > { %2814 = vmatpush.bf16.msrb.mxu1 %v3392_v4  ;;  %2827 = vmatpush.bf16.msrb.mxu2 %v3520_v5  ;;  %v4237_v45 = vld [vmem:[%s7995_s1 + $0x6b0] sm:$0xf0]  ;;  %v5088_v47 = vld [vmem:[%s7995_s1 + $0x304] sm:$0xf]  ;;  %v4112_v49 = vor.u32 %v5172_v39, %v4109_v40 }
  0x8e   : > { %v3773_v50 = vld [vmem:[%s7995_s1 + $0x310] sm:$0xf0]  ;;  %v5136_v51 = vld [vmem:[%s7995_s1 + $0x484] sm:$0xf]  ;;  %v4240_v53 = vor.u32 %v5204_v43, %v4237_v45 }
  0x8f   : > { %2840 = vmatpush.bf16.msrb.mxu3 %v3648_v8  ;;  %v3965_v52 = vld [vmem:[%s7995_s1 + $0x490] sm:$0xf0]  ;;  %v5168_v54 = vld [vmem:[%s7995_s1 + $0x584] sm:$0xf]  ;;  %v3776_v60 = vor.u32 %v5088_v47, %v3773_v50 }
  0x90   : > { %2850 = vmatpush.bf16.msra.mxu0 %v3824_v9  ;;  %2828 = vmatmul.bf16.vlgmr.msrb.gmra.mxu2 %v5770_v34  ;;  %v4093_v55 = vld [vmem:[%s7995_s1 + $0x590] sm:$0xf0]  ;;  %v5200_v56 = vld [vmem:[%s7995_s1 + $0x684] sm:$0xf]  ;;  %v3968_v61 = vor.u32 %v5136_v51, %v3965_v52 }
  0x91   : > { %2859 = vmatpush.bf16.msra.mxu1 %v4016_v10  ;;  %2872 = vmatpush.bf16.msra.mxu2 %v4144_v11  ;;  %v4221_v57 = vld [vmem:[%s7995_s1 + $0x690] sm:$0xf0]  ;;  %v5244_v58 = vld [vmem:[%s7995_s1 + $0x7e4] sm:$0xf]  ;;  %v4096_v62 = vor.u32 %v5168_v54, %v4093_v55 }
  0x92   : > { %2841 = vmatmul.bf16.vlgmr.msrb.gmra.mxu3 %v5764_v30  ;;  %2815 = vmatmul.bf16.vlgmr.msrb.gmra.mxu1 %v5766_v31  ;;  %v4397_v59 = vld [vmem:[%s7995_s1 + $0x7f0] sm:$0xf0]  ;;  %v5132_v63 = vld [vmem:[%s7995_s1 + $0x464] sm:$0xf]  ;;  %v4224_v1 = vor.u32 %v5200_v56, %v4221_v57 }
  0x93   : > { %2885 = vmatpush.bf16.msra.mxu3 %v4272_v15  ;;  %v3949_v0 = vld [vmem:[%s7995_s1 + $0x470] sm:$0xf0]  ;;  %v4400_v2 = vor.u32 %v5244_v58, %v4397_v59  ;;  %v5164_v3 = vld [vmem:[%s7995_s1 + $0x564] sm:$0xf] }
  0x94   : > { %2851 = vmatpush.bf16.msra.mxu0 %v3808_v22  ;;  %v4077_v4 = vld [vmem:[%s7995_s1 + $0x570] sm:$0xf0]  ;;  %v5196_v5 = vld [vmem:[%s7995_s1 + $0x664] sm:$0xf]  ;;  %v3952_v9 = vor.u32 %v5132_v63, %v3949_v0 }
  0x95   : > { %2860 = vmatpush.bf16.msra.mxu1 %v4000_v23  ;;  %2873 = vmatpush.bf16.msra.mxu2 %v4128_v24  ;;  %v4205_v6 = vld [vmem:[%s7995_s1 + $0x670] sm:$0xf0]  ;;  %v5240_v7 = vld [vmem:[%s7995_s1 + $0x7c4] sm:$0xf]  ;;  %v4080_v10 = vor.u32 %v5164_v3, %v4077_v4 }
  0x96   : > { %v4381_v8 = vld [vmem:[%s7995_s1 + $0x7d0] sm:$0xf0]  ;;  %v5128_v11 = vld [vmem:[%s7995_s1 + $0x444] sm:$0xf]  ;;  %v4208_v13 = vor.u32 %v5196_v5, %v4205_v6 }
  0x97   : > { %2886 = vmatpush.bf16.msra.mxu3 %v4256_v36  ;;  %v3933_v12 = vld [vmem:[%s7995_s1 + $0x450] sm:$0xf0]  ;;  %v4384_v14 = vor.u32 %v5240_v7, %v4381_v8  ;;  %v5160_v15 = vld [vmem:[%s7995_s1 + $0x544] sm:$0xf] }
  0x98   : > { %2852 = vmatpush.bf16.msra.mxu0 %v3792_v46  ;;  %v4061_v16 = vld [vmem:[%s7995_s1 + $0x550] sm:$0xf0]  ;;  %v5192_v17 = vld [vmem:[%s7995_s1 + $0x644] sm:$0xf]  ;;  %v3936_v22 = vor.u32 %v5128_v11, %v3933_v12 }
  0x99   : > { %2861 = vmatpush.bf16.msra.mxu1 %v3984_v48  ;;  %2874 = vmatpush.bf16.msra.mxu2 %v4112_v49  ;;  %v4189_v18 = vld [vmem:[%s7995_s1 + $0x650] sm:$0xf0]  ;;  %v5236_v19 = vld [vmem:[%s7995_s1 + $0x7a4] sm:$0xf]  ;;  %v4064_v23 = vor.u32 %v5160_v15, %v4061_v16 }
  0x9a   : > { %v4365_v20 = vld [vmem:[%s7995_s1 + $0x7b0] sm:$0xf0]  ;;  %v5124_v24 = vld [vmem:[%s7995_s1 + $0x424] sm:$0xf]  ;;  %v4192_v33 = vor.u32 %v5192_v17, %v4189_v18 }
  0x9b   : > { %2887 = vmatpush.bf16.msra.mxu3 %v4240_v53  ;;  %v3917_v28 = vld [vmem:[%s7995_s1 + $0x430] sm:$0xf0]  ;;  %v4368_v35 = vor.u32 %v5236_v19, %v4365_v20  ;;  %v5156_v36 = vld [vmem:[%s7995_s1 + $0x524] sm:$0xf] }
  0x9c   : > { %2853 = vmatpush.bf16.msra.mxu0 %v3776_v60  ;;  %v4045_v37 = vld [vmem:[%s7995_s1 + $0x530] sm:$0xf0]  ;;  %v5188_v39 = vld [vmem:[%s7995_s1 + $0x624] sm:$0xf]  ;;  %v3920_v46 = vor.u32 %v5124_v24, %v3917_v28 }
  0x9d   : > { %2862 = vmatpush.bf16.msra.mxu1 %v3968_v61  ;;  %2875 = vmatpush.bf16.msra.mxu2 %v4096_v62  ;;  %v4173_v40 = vld [vmem:[%s7995_s1 + $0x630] sm:$0xf0]  ;;  %v5232_v43 = vld [vmem:[%s7995_s1 + $0x784] sm:$0xf]  ;;  %v4048_v47 = vor.u32 %v5156_v36, %v4045_v37 }
  0x9e   : > { %v4349_v45 = vld [vmem:[%s7995_s1 + $0x790] sm:$0xf0]  ;;  %v5120_v48 = vld [vmem:[%s7995_s1 + $0x404] sm:$0xf]  ;;  %v4176_v51 = vor.u32 %v5188_v39, %v4173_v40 }
  0x9f   : > { %2888 = vmatpush.bf16.msra.mxu3 %v4224_v1  ;;  %2854 = vmatmul.bf16.vlgmr.msra.gmra.mxu0 %v5768_v32  ;;  %v3901_v49 = vld [vmem:[%s7995_s1 + $0x410] sm:$0xf0]  ;;  %v5152_v50 = vld [vmem:[%s7995_s1 + $0x504] sm:$0xf]  ;;  %v4352_v52 = vor.u32 %v5232_v43, %v4349_v45 }
  0xa0   : > { %2898 = vmatpush.bf16.msrb.mxu0 %v4400_v2  ;;  %v4029_v53 = vld [vmem:[%s7995_s1 + $0x510] sm:$0xf0]  ;;  %v5184_v54 = vld [vmem:[%s7995_s1 + $0x604] sm:$0xf]  ;;  %v3904_v62 = vor.u32 %v5120_v48, %v3901_v49 }
  0xa1   : > { %2863 = vmatpush.bf16.msra.mxu1 %v3952_v9  ;;  %2876 = vmatpush.bf16.msra.mxu2 %v4080_v10  ;;  %v4157_v55 = vld [vmem:[%s7995_s1 + $0x610] sm:$0xf0]  ;;  %v5228_v56 = vld [vmem:[%s7995_s1 + $0x764] sm:$0xf]  ;;  %v4032_v63 = vor.u32 %v5152_v50, %v4029_v53 }
  0xa2   : > { %v4333_v57 = vld [vmem:[%s7995_s1 + $0x770] sm:$0xf0]  ;;  %v5276_v58 = vld [vmem:[%s7995_s1 + $0x8e4] sm:$0xf]  ;;  %v4160_v2 = vor.u32 %v5184_v54, %v4157_v55 }
  0xa3   : > { %2889 = vmatpush.bf16.msra.mxu3 %v4208_v13  ;;  %v4525_v59 = vld [vmem:[%s7995_s1 + $0x8f0] sm:$0xf0]  ;;  %v5308_v60 = vld [vmem:[%s7995_s1 + $0x9e4] sm:$0xf]  ;;  %v4336_v3 = vor.u32 %v5228_v56, %v4333_v57 }
  0xa4   : > { %2899 = vmatpush.bf16.msrb.mxu0 %v4384_v14  ;;  %v4653_v61 = vld [vmem:[%s7995_s1 + $0x9f0] sm:$0xf0]  ;;  %v5340_v0 = vld [vmem:[%s7995_s1 + $0xae4] sm:$0xf]  ;;  %v4528_v4 = vor.u32 %v5276_v58, %v4525_v59 }
  0xa5   : > { %2864 = vmatpush.bf16.msra.mxu1 %v3936_v22  ;;  %2877 = vmatpush.bf16.msra.mxu2 %v4064_v23  ;;  %v4781_v1 = vld [vmem:[%s7995_s1 + $0xaf0] sm:$0xf0]  ;;  %v4656_v5 = vor.u32 %v5308_v60, %v4653_v61  ;;  %v5224_v6 = vld [vmem:[%s7995_s1 + $0x744] sm:$0xf] }
  0xa6   : > { %v4317_v7 = vld [vmem:[%s7995_s1 + $0x750] sm:$0xf0]  ;;  %v5272_v8 = vld [vmem:[%s7995_s1 + $0x8c4] sm:$0xf]  ;;  %v4784_v9 = vor.u32 %v5340_v0, %v4781_v1 }
  0xa7   : > { %2890 = vmatpush.bf16.msra.mxu3 %v4192_v33  ;;  %v4509_v10 = vld [vmem:[%s7995_s1 + $0x8d0] sm:$0xf0]  ;;  %v5304_v11 = vld [vmem:[%s7995_s1 + $0x9c4] sm:$0xf]  ;;  %v4320_v15 = vor.u32 %v5224_v6, %v4317_v7 }
  0xa8   : > { %2900 = vmatpush.bf16.msrb.mxu0 %v4368_v35  ;;  %v4637_v12 = vld [vmem:[%s7995_s1 + $0x9d0] sm:$0xf0]  ;;  %v5336_v13 = vld [vmem:[%s7995_s1 + $0xac4] sm:$0xf]  ;;  %v4512_v16 = vor.u32 %v5272_v8, %v4509_v10 }
  0xa9   : > { %2865 = vmatpush.bf16.msra.mxu1 %v3920_v46  ;;  %2878 = vmatpush.bf16.msra.mxu2 %v4048_v47  ;;  %v4765_v14 = vld [vmem:[%s7995_s1 + $0xad0] sm:$0xf0]  ;;  %v4640_v17 = vor.u32 %v5304_v11, %v4637_v12  ;;  %v5220_v18 = vld [vmem:[%s7995_s1 + $0x724] sm:$0xf]  ;;  %v579_v12 = vld [vmem:[%s7996_s2] sm:$0xf] }
  0xaa   : > { %v4301_v19 = vld [vmem:[%s7995_s1 + $0x730] sm:$0xf0]  ;;  %v5268_v20 = vld [vmem:[%s7995_s1 + $0x8a4] sm:$0xf]  ;;  %v4768_v22 = vor.u32 %v5336_v13, %v4765_v14 }
  0xab   : > { %2891 = vmatpush.bf16.msra.mxu3 %v4176_v51  ;;  %v4493_v23 = vld [vmem:[%s7995_s1 + $0x8b0] sm:$0xf0]  ;;  %v5300_v24 = vld [vmem:[%s7995_s1 + $0x9a4] sm:$0xf]  ;;  %v4304_v36 = vor.u32 %v5220_v18, %v4301_v19 }
  0xac   : > { %2901 = vmatpush.bf16.msrb.mxu0 %v4352_v52  ;;  %v4621_v28 = vld [vmem:[%s7995_s1 + $0x9b0] sm:$0xf0]  ;;  %v5332_v33 = vld [vmem:[%s7995_s1 + $0xaa4] sm:$0xf]  ;;  %v4496_v39 = vor.u32 %v5268_v20, %v4493_v23  ;;  %v581_v20 = vperm.slane %v579_v12, 0 }
  0xad   : > { %2866 = vmatpush.bf16.msra.mxu1 %v3904_v62  ;;  %2879 = vmatpush.bf16.msra.mxu2 %v4032_v63  ;;  %v4749_v35 = vld [vmem:[%s7995_s1 + $0xab0] sm:$0xf0]  ;;  %v5216_v37 = vld [vmem:[%s7995_s1 + $0x704] sm:$0xf]  ;;  %v4624_v40 = vor.u32 %v5300_v24, %v4621_v28 }
  0xae   : > { %v4285_v43 = vld [vmem:[%s7995_s1 + $0x710] sm:$0xf0]  ;;  %v5264_v45 = vld [vmem:[%s7995_s1 + $0x884] sm:$0xf]  ;;  %v4752_v47 = vor.u32 %v5332_v33, %v4749_v35 }
  0xaf   : > { %2892 = vmatpush.bf16.msra.mxu3 %v4160_v2  ;;  %v4477_v46 = vld [vmem:[%s7995_s1 + $0x890] sm:$0xf0]  ;;  %v5296_v48 = vld [vmem:[%s7995_s1 + $0x984] sm:$0xf]  ;;  %v4288_v54 = vor.u32 %v5216_v37, %v4285_v43 }
  0xb0   : > { %2902 = vmatpush.bf16.msrb.mxu0 %v4336_v3  ;;  %2880 = vmatmul.bf16.vlgmr.msra.gmra.mxu2 %v5904_v44  ;;  %v4605_v49 = vld [vmem:[%s7995_s1 + $0x990] sm:$0xf0]  ;;  %v5328_v50 = vld [vmem:[%s7995_s1 + $0xa84] sm:$0xf]  ;;  %v4480_v55 = vor.u32 %v5264_v45, %v4477_v46 }
  0xb1   : > { %2911 = vmatpush.bf16.msrb.mxu1 %v4528_v4  ;;  %2924 = vmatpush.bf16.msrb.mxu2 %v4656_v5  ;;  %v4733_v51 = vld [vmem:[%s7995_s1 + $0xa90] sm:$0xf0]  ;;  %v5372_v52 = vld [vmem:[%s7995_s1 + $0xbe4] sm:$0xf]  ;;  %v4608_v56 = vor.u32 %v5296_v48, %v4605_v49 }
  0xb2   : > { %2893 = vmatmul.bf16.vlgmr.msra.gmra.mxu3 %v5892_v38  ;;  %2867 = vmatmul.bf16.vlgmr.msra.gmra.mxu1 %v5900_v41  ;;  %v4909_v53 = vld [vmem:[%s7995_s1 + $0xbf0] sm:$0xf0]  ;;  %v5260_v57 = vld [vmem:[%s7995_s1 + $0x864] sm:$0xf]  ;;  %v4736_v59 = vor.u32 %v5328_v50, %v4733_v51 }
  0xb3   : > { %2937 = vmatpush.bf16.msrb.mxu3 %v4784_v9  ;;  %v4461_v58 = vld [vmem:[%s7995_s1 + $0x870] sm:$0xf0]  ;;  %v4912_v60 = vor.u32 %v5372_v52, %v4909_v53  ;;  %v5292_v61 = vld [vmem:[%s7995_s1 + $0x964] sm:$0xf] }
  0xb4   : > { %2903 = vmatpush.bf16.msrb.mxu0 %v4320_v15  ;;  %v4589_v62 = vld [vmem:[%s7995_s1 + $0x970] sm:$0xf0]  ;;  %v5324_v63 = vld [vmem:[%s7995_s1 + $0xa64] sm:$0xf]  ;;  %v4464_v3 = vor.u32 %v5260_v57, %v4461_v58 }
  0xb5   : > { %2912 = vmatpush.bf16.msrb.mxu1 %v4512_v16  ;;  %2925 = vmatpush.bf16.msrb.mxu2 %v4640_v17  ;;  %v4717_v0 = vld [vmem:[%s7995_s1 + $0xa70] sm:$0xf0]  ;;  %v5368_v1 = vld [vmem:[%s7995_s1 + $0xbc4] sm:$0xf]  ;;  %v4592_v4 = vor.u32 %v5292_v61, %v4589_v62  ;;  %v5023_v61 = vld [vmem:[%s7995_s1 + $0xf4] sm:$0xf0] }
  0xb6   : > { %v4893_v2 = vld [vmem:[%s7995_s1 + $0xbd0] sm:$0xf0]  ;;  %v5256_v5 = vld [vmem:[%s7995_s1 + $0x844] sm:$0xf]  ;;  %v4720_v8 = vor.u32 %v5324_v63, %v4717_v0  ;;  %v3635_v0 = vld [vmem:[%s7995_s1 + $0x1e8] sm:$0xf] }
  0xb7   : > { %2938 = vmatpush.bf16.msrb.mxu3 %v4768_v22  ;;  %v4445_v6 = vld [vmem:[%s7995_s1 + $0x850] sm:$0xf0]  ;;  %v5288_v7 = vld [vmem:[%s7995_s1 + $0x944] sm:$0xf]  ;;  %v4896_v9 = vor.u32 %v5368_v1, %v4893_v2  ;;  %v5055_v1 = vld [vmem:[%s7995_s1 + $0x1f4] sm:$0xf0]  ;;  %v2673_v2 = vpop.f32.mrf.mxu2 }
  0xb8   : > { %2904 = vmatpush.bf16.msrb.mxu0 %v4304_v36  ;;  %v4573_v10 = vld [vmem:[%s7995_s1 + $0x950] sm:$0xf0]  ;;  %v5320_v11 = vld [vmem:[%s7995_s1 + $0xa44] sm:$0xf]  ;;  %v4448_v16 = vor.u32 %v5256_v5, %v4445_v6  ;;  %v2686_v6 = vpop.f32.mrf.mxu3  ;;  %v3636_v12 = vor.u32 %v5055_v1, %v3635_v0  ;;  %v5119_v0 = vld [vmem:[%s7995_s1 + $0x3f4] sm:$0xf0] }
  0xb9   : > { %2913 = vmatpush.bf16.msrb.mxu1 %v4496_v39  ;;  %2926 = vmatpush.bf16.msrb.mxu2 %v4624_v40  ;;  %v4701_v13 = vld [vmem:[%s7995_s1 + $0xa50] sm:$0xf0]  ;;  %v5364_v14 = vld [vmem:[%s7995_s1 + $0xba4] sm:$0xf]  ;;  %v4576_v17 = vor.u32 %v5288_v7, %v4573_v10 }
  0xba   : > { %v4877_v15 = vld [vmem:[%s7995_s1 + $0xbb0] sm:$0xf0]  ;;  %v5252_v18 = vld [vmem:[%s7995_s1 + $0x824] sm:$0xf]  ;;  %v4704_v22 = vor.u32 %v5320_v11, %v4701_v13 }
  0xbb   : > { %2939 = vmatpush.bf16.msrb.mxu3 %v4752_v47  ;;  %v4429_v19 = vld [vmem:[%s7995_s1 + $0x830] sm:$0xf0]  ;;  %v4880_v23 = vor.u32 %v5364_v14, %v4877_v15  ;;  %v5284_v24 = vld [vmem:[%s7995_s1 + $0x924] sm:$0xf]  ;;  %v3491_v14 = vld [vmem:[%s7995_s1 + $0xc8] sm:$0xf] }
  0xbc   : > { %2905 = vmatpush.bf16.msrb.mxu0 %v4288_v54  ;;  %v4557_v28 = vld [vmem:[%s7995_s1 + $0x930] sm:$0xf0]  ;;  %v5316_v33 = vld [vmem:[%s7995_s1 + $0xa24] sm:$0xf]  ;;  %v4432_v40 = vor.u32 %v5252_v18, %v4429_v19  ;;  %v5019_v15 = vld [vmem:[%s7995_s1 + $0xd4] sm:$0xf0] }
  0xbd   : > { %2914 = vmatpush.bf16.msrb.mxu1 %v4480_v55  ;;  %2927 = vmatpush.bf16.msrb.mxu2 %v4608_v56  ;;  %v4685_v35 = vld [vmem:[%s7995_s1 + $0xa30] sm:$0xf0]  ;;  %v5360_v36 = vld [vmem:[%s7995_s1 + $0xb84] sm:$0xf]  ;;  %v2647_v39 = vpop.f32.mrf.mxu0  ;;  %v4560_v43 = vor.u32 %v5284_v24, %v4557_v28  ;;  %v2660_v49 = vpop.f32.mrf.mxu1  ;;  %v3619_v18 = vld [vmem:[%s7995_s1 + $0x1c8] sm:$0xf]  ;;  %v3492_v24 = vor.u32 %v5019_v15, %v3491_v14 }
  0xbe   : > { %v4861_v37 = vld [vmem:[%s7995_s1 + $0xb90] sm:$0xf0]  ;;  %v5248_v45 = vld [vmem:[%s7995_s1 + $0x804] sm:$0xf]  ;;  %v2648_v48 = vadd.f32 %v2647_v39, %v581_v20  ;;  %v4688_v50 = vor.u32 %v5316_v33, %v4685_v35  ;;  %v5051_v19 = vld [vmem:[%s7995_s1 + $0x1d4] sm:$0xf0] }
  0xbf   : > { %2940 = vmatpush.bf16.msrb.mxu3 %v4736_v59  ;;  %2906 = vmatmul.bf16.vlgmr.msrb.gmra.mxu0 %v5902_v42  ;;  %v4413_v46 = vld [vmem:[%s7995_s1 + $0x810] sm:$0xf0]  ;;  %v5280_v47 = vld [vmem:[%s7995_s1 + $0x904] sm:$0xf]  ;;  %v4864_v51 = vor.u32 %v5360_v36, %v4861_v37  ;;  %v3620_v36 = vor.u32 %v5051_v19, %v3619_v18  ;;  %v3475_v39 = vld [vmem:[%s7995_s1 + $0xa8] sm:$0xf] }
  0xc0   : > { %2950 = vmatpush.bf16.msra.mxu0 %v4912_v60  ;;  %v4541_v52 = vld [vmem:[%s7995_s1 + $0x910] sm:$0xf0]  ;;  %v5312_v53 = vld [vmem:[%s7995_s1 + $0xa04] sm:$0xf]  ;;  %v2661_v58 = vadd.f32 %v2660_v49, %v2648_v48  ;;  %v3507_v60 = vld [vmem:[%s7995_s1 + $0xe8] sm:$0xf]  ;;  %v4416_v62 = vor.u32 %v5248_v45, %v4413_v46  ;;  %v2675_v46 = vpop.f32.mrf.mxu2  ;;  %v2688_v49 = vpop.f32.mrf.mxu3 }
  0xc1   : > { %2915 = vmatpush.bf16.msrb.mxu1 %v4464_v3  ;;  %2928 = vmatpush.bf16.msrb.mxu2 %v4592_v4  ;;  %v4669_v54 = vld [vmem:[%s7995_s1 + $0xa10] sm:$0xf0]  ;;  %v5356_v55 = vld [vmem:[%s7995_s1 + $0xb64] sm:$0xf]  ;;  %v4544_v63 = vor.u32 %v5280_v47, %v4541_v52  ;;  %v5047_v45 = vld [vmem:[%s7995_s1 + $0x1b4] sm:$0xf0] }
  0xc2   : > { %v4845_v56 = vld [vmem:[%s7995_s1 + $0xb70] sm:$0xf0]  ;;  %v5388_v57 = vld [vmem:[%s7995_s1 + $0xc64] sm:$0xf]  ;;  %v4672_v3 = vor.u32 %v5312_v53, %v4669_v54  ;;  %v2674_v5 = vadd.f32 %v2673_v2, %v2661_v58  ;;  %v3587_v58 = vld [vmem:[%s7995_s1 + $0x188] sm:$0xf] }
  0xc3   : > { %2941 = vmatpush.bf16.msrb.mxu3 %v4720_v8  ;;  %v4973_v59 = vld [vmem:[%s7995_s1 + $0xc70] sm:$0xf0]  ;;  %v4848_v4 = vor.u32 %v5356_v55, %v4845_v56  ;;  %v3508_v8 = vor.u32 %v5023_v61, %v3507_v60  ;;  %v5384_v11 = vld [vmem:[%s7995_s1 + $0xc44] sm:$0xf]  ;;  %v3459_v56 = vld [vmem:[%s7995_s1 + $0x88] sm:$0xf] }
  0xc4   : > { %2951 = vmatpush.bf16.msra.mxu0 %v4896_v9  ;;  %v4976_v7 = vor.u32 %v5388_v57, %v4973_v59  ;;  %v5352_v9 = vld [vmem:[%s7995_s1 + $0xb44] sm:$0xf]  ;;  %v4829_v10 = vld [vmem:[%s7995_s1 + $0xb50] sm:$0xf0]  ;;  %v5011_v57 = vld [vmem:[%s7995_s1 + $0x94] sm:$0xf0] }
  0xc5   : > { %2916 = vmatpush.bf16.msrb.mxu1 %v4448_v16  ;;  %2929 = vmatpush.bf16.msrb.mxu2 %v4576_v17  ;;  %v4957_v13 = vld [vmem:[%s7995_s1 + $0xc50] sm:$0xf0]  ;;  %v2687_v16 = vadd.f32 %v2686_v6, %v2674_v5  ;;  %v2649_v17 = vpop.f32.mrf.mxu0  ;;  %v2662_v20 = vpop.f32.mrf.mxu1  ;;  %v5348_v28 = vld [vmem:[%s7995_s1 + $0xb24] sm:$0xf]  ;;  %v5043_v59 = vld [vmem:[%s7995_s1 + $0x194] sm:$0xf0] }
  0xc6   : > { %v4813_v33 = vld [vmem:[%s7995_s1 + $0xb30] sm:$0xf0]  ;;  %v5380_v35 = vld [vmem:[%s7995_s1 + $0xc24] sm:$0xf]  ;;  %v3763_v60 = vld [vmem:[%s7995_s1 + $0x2e8] sm:$0xf]  ;;  %v3588_v6 = vor.u32 %v5043_v59, %v3587_v58 }
  0xc7   : > { %2942 = vmatpush.bf16.msrb.mxu3 %v4704_v22  ;;  %v4832_v22 = vor.u32 %v5352_v9, %v4829_v10  ;;  %v4941_v37 = vld [vmem:[%s7995_s1 + $0xc30] sm:$0xf0]  ;;  %v4816_v47 = vor.u32 %v5348_v28, %v4813_v33  ;;  %v5344_v48 = vld [vmem:[%s7995_s1 + $0xb04] sm:$0xf]  ;;  %v5087_v61 = vld [vmem:[%s7995_s1 + $0x2f4] sm:$0xf0] }
  0xc8   : > { %2952 = vmatpush.bf16.msra.mxu0 %v4880_v23  ;;  %v4960_v23 = vor.u32 %v5384_v11, %v4957_v13  ;;  %v4797_v52 = vld [vmem:[%s7995_s1 + $0xb10] sm:$0xf0]  ;;  %v5376_v53 = vld [vmem:[%s7995_s1 + $0xc04] sm:$0xf]  ;;  %v5007_v9 = vld [vmem:[%s7995_s1 + $0x74] sm:$0xf0] }
  0xc9   : > { %2917 = vmatpush.bf16.msrb.mxu1 %v4432_v40  ;;  %2930 = vmatpush.bf16.msrb.mxu2 %v4560_v43  ;;  %v5015_v40 = vld [vmem:[%s7995_s1 + $0xb4] sm:$0xf0]  ;;  %v3603_v43 = vld [vmem:[%s7995_s1 + $0x1a8] sm:$0xf]  ;;  %v4925_v54 = vld [vmem:[%s7995_s1 + $0xc10] sm:$0xf0] }
  0xca   : > { %v3604_v55 = vor.u32 %v5047_v45, %v3603_v43  ;;  %v4928_v2 = vor.u32 %v5376_v53, %v4925_v54  ;;  %v3571_v10 = vld [vmem:[%s7995_s1 + $0x168] sm:$0xf]  ;;  %v5083_v14 = vld [vmem:[%s7995_s1 + $0x2d4] sm:$0xf0] }
  0xcb   : > { %2943 = vmatpush.bf16.msrb.mxu3 %v4688_v50  ;;  %v4944_v50 = vor.u32 %v5380_v35, %v4941_v37  ;;  %v3747_v13 = vld [vmem:[%s7995_s1 + $0x2c8] sm:$0xf]  ;;  %v5115_v17 = vld [vmem:[%s7995_s1 + $0x3d4] sm:$0xf0] }
  0xcc   : > { %2953 = vmatpush.bf16.msra.mxu0 %v4864_v51  ;;  %v3476_v51 = vor.u32 %v5015_v40, %v3475_v39  ;;  %v3555_v28 = vld [vmem:[%s7995_s1 + $0x148] sm:$0xf]  ;;  %v5035_v37 = vld [vmem:[%s7995_s1 + $0x154] sm:$0xf0] }
  0xcd   : > { %2918 = vmatpush.bf16.msrb.mxu1 %v4416_v62  ;;  %2931 = vmatpush.bf16.msrb.mxu2 %v4544_v63  ;;  %v4800_v62 = vor.u32 %v5344_v48, %v4797_v52  ;;  %v3891_v63 = vld [vmem:[%s7995_s1 + $0x3e8] sm:$0xf]  ;;  %v2699_v1 = vpop.f32.mrf.mxu0  ;;  %v5079_v40 = vld [vmem:[%s7995_s1 + $0x2b4] sm:$0xf0] }
  0xce   : > { %v3892_v11 = vor.u32 %v5119_v0, %v3891_v63  ;;  %v3731_v39 = vld [vmem:[%s7995_s1 + $0x2a8] sm:$0xf]  ;;  %v5111_v45 = vld [vmem:[%s7995_s1 + $0x3b4] sm:$0xf0] }
  0xcf   : > { %2944 = vmatpush.bf16.msrb.mxu3 %v4672_v3  ;;  %v3460_v3 = vor.u32 %v5011_v57, %v3459_v56  ;;  %v2712_v5 = vpop.f32.mrf.mxu1  ;;  %v3859_v43 = vld [vmem:[%s7995_s1 + $0x3a8] sm:$0xf]  ;;  %v4999_v53 = vld [vmem:[%s7995_s1 + $0x34] sm:$0xf0] }
  0xd0   : > { %2954 = vmatpush.bf16.msra.mxu0 %v4848_v4  ;;  %2919 = vmatmul.bf16.vlgmr.msrb.gmra.mxu1 %v6089_v21  ;;  %v2700_v4 = vadd.f32 %v2699_v1, %v2687_v16  ;;  %v3875_v16 = vld [vmem:[%s7995_s1 + $0x3c8] sm:$0xf]  ;;  %v5031_v56 = vld [vmem:[%s7995_s1 + $0x134] sm:$0xf0] }
  0xd1   : > { %2967 = vmatpush.bf16.msra.mxu1 %v4976_v7  ;;  %2976 = vmatpush.bf16.msra.mxu2 %v3508_v8  ;;  %v3764_v7 = vor.u32 %v5087_v61, %v3763_v60  ;;  %v3443_v8 = vld [vmem:[%s7995_s1 + $0x68] sm:$0xf]  ;;  %v5075_v58 = vld [vmem:[%s7995_s1 + $0x294] sm:$0xf0] }
  0xd2   : > { %2932 = vmatmul.bf16.vlgmr.msrb.gmra.mxu2 %v6102_v26  ;;  %2945 = vmatmul.bf16.vlgmr.msrb.gmra.mxu3 %v6100_v25  ;;  %v2713_v15 = vadd.f32 %v2712_v5, %v2700_v4  ;;  %v3444_v18 = vor.u32 %v5007_v9, %v3443_v8  ;;  %v3411_v52 = vld [vmem:[%s7995_s1 + $0x28] sm:$0xf]  ;;  %v5107_v60 = vld [vmem:[%s7995_s1 + $0x394] sm:$0xf0] }
  0xd3   : > { %2989 = vmatpush.bf16.msra.mxu3 %v3636_v12  ;;  %v5039_v12 = vld [vmem:[%s7995_s1 + $0x174] sm:$0xf0]  ;;  %v2725_v19 = vpop.f32.mrf.mxu2  ;;  %v3539_v54 = vld [vmem:[%s7995_s1 + $0x128] sm:$0xf]  ;;  %v3412_v61 = vor.u32 %v4999_v53, %v3411_v52 }
  0xd4   : > { %2955 = vmatpush.bf16.msra.mxu0 %v4832_v22  ;;  %v3572_v20 = vor.u32 %v5039_v12, %v3571_v10  ;;  %v3748_v22 = vor.u32 %v5083_v14, %v3747_v13  ;;  %v2726_v33 = vadd.f32 %v2725_v19, %v2713_v15  ;;  %v3715_v57 = vld [vmem:[%s7995_s1 + $0x288] sm:$0xf]  ;;  %v3540_v0 = vor.u32 %v5031_v56, %v3539_v54  ;;  %v5027_v4 = vld [vmem:[%s7995_s1 + $0x114] sm:$0xf0] }
  0xd5   : > { %2968 = vmatpush.bf16.msra.mxu1 %v4960_v23  ;;  %2977 = vmatpush.bf16.msra.mxu2 %v3492_v24  ;;  %v3427_v23 = vld [vmem:[%s7995_s1 + $0x48] sm:$0xf]  ;;  %v5003_v24 = vld [vmem:[%s7995_s1 + $0x54] sm:$0xf0]  ;;  %v3716_v1 = vor.u32 %v5075_v58, %v3715_v57 }
  0xd6   : > { %v2738_v35 = vpop.f32.mrf.mxu3  ;;  %v3428_v48 = vor.u32 %v5003_v24, %v3427_v23  ;;  %v3843_v59 = vld [vmem:[%s7995_s1 + $0x388] sm:$0xf]  ;;  %v5071_v8 = vld [vmem:[%s7995_s1 + $0x274] sm:$0xf0] }
  0xd7   : > { %2990 = vmatpush.bf16.msra.mxu3 %v3620_v36  ;;  %v3876_v36 = vor.u32 %v5115_v17, %v3875_v16  ;;  %v6820_v46 = vadd.f32 %v2738_v35, %v2726_v33  ;;  %v2714_v49 = vpop.f32.mrf.mxu1  ;;  %v3827_v9 = vld [vmem:[%s7995_s1 + $0x368] sm:$0xf]  ;;  %v5103_v10 = vld [vmem:[%s7995_s1 + $0x374] sm:$0xf0] }
  0xd8   : > { %2956 = vmatpush.bf16.msra.mxu0 %v4816_v47  ;;  %v2701_v47 = vpop.f32.mrf.mxu0  ;;  %v5151_v12 = vld [vmem:[%s7995_s1 + $0x4f4] sm:$0xf0]  ;;  %v4147_v14 = vld [vmem:[%s7995_s1 + $0x5e8] sm:$0xf] }
  0xd9   : > { %2969 = vmatpush.bf16.msra.mxu1 %v4944_v50  ;;  %2978 = vmatpush.bf16.msra.mxu2 %v3476_v51  ;;  %v3556_v50 = vor.u32 %v5035_v37, %v3555_v28  ;;  %v3732_v51 = vor.u32 %v5079_v40, %v3731_v39  ;;  %v5183_v15 = vld [vmem:[%s7995_s1 + $0x5f4] sm:$0xf0]  ;;  %v3811_v23 = vld [vmem:[%s7995_s1 + $0x348] sm:$0xf] }
  0xda   : > { %v4148_v24 = vor.u32 %v5183_v15, %v4147_v14  ;;  %v5099_v28 = vld [vmem:[%s7995_s1 + $0x354] sm:$0xf0]  ;;  %v4003_v33 = vld [vmem:[%s7995_s1 + $0x4c8] sm:$0xf] }
  0xdb   : > { %2991 = vmatpush.bf16.msra.mxu3 %v3604_v55  ;;  %v3860_v55 = vor.u32 %v5111_v45, %v3859_v43  ;;  %v2727_v63 = vpop.f32.mrf.mxu2  ;;  %v5147_v35 = vld [vmem:[%s7995_s1 + $0x4d4] sm:$0xf0]  ;;  %v3812_v40 = vor.u32 %v5099_v28, %v3811_v23  ;;  %v3667_v45 = vld [vmem:[%s7995_s1 + $0x228] sm:$0xf] }
  0xdc   : > { %2957 = vmatpush.bf16.msra.mxu0 %v4800_v62  ;;  %v3395_v62 = vld [vmem:[%s7995_s1 + $0x8] sm:$0xf]  ;;  %v5179_v37 = vld [vmem:[%s7995_s1 + $0x5d4] sm:$0xf0]  ;;  %v4004_v43 = vor.u32 %v5147_v35, %v4003_v33 }
  0xdd   : > { %2970 = vmatpush.bf16.msra.mxu1 %v4928_v2  ;;  %2979 = vmatpush.bf16.msra.mxu2 %v3460_v3  ;;  %v4995_v2 = vld [vmem:[%s7995_s1 + $0x14] sm:$0xf0]  ;;  %v3523_v3 = vld [vmem:[%s7995_s1 + $0x108] sm:$0xf] }
  0xde   : > { %v2740_v5 = vpop.f32.mrf.mxu3  ;;  %v3396_v13 = vor.u32 %v4995_v2, %v3395_v62  ;;  %v3524_v16 = vor.u32 %v5027_v4, %v3523_v3  ;;  %v5063_v47 = vld [vmem:[%s7995_s1 + $0x234] sm:$0xf0]  ;;  %v4115_v53 = vld [vmem:[%s7995_s1 + $0x5a8] sm:$0xf] }
  0xdf   : > { %2992 = vmatpush.bf16.msra.mxu3 %v3588_v6  ;;  %2958 = vmatmul.bf16.vlgmr.msra.gmra.mxu0 %v6110_v29  ;;  %v3844_v6 = vor.u32 %v5107_v60, %v3843_v59  ;;  %v5143_v52 = vld [vmem:[%s7995_s1 + $0x4b4] sm:$0xf0]  ;;  %v3651_v56 = vld [vmem:[%s7995_s1 + $0x208] sm:$0xf] }
  0xe0   : > { %3002 = vmatpush.bf16.msrb.mxu0 %v3764_v7  ;;  %4986 = vmatmul.msk.bf16.vlgmr.msra.gmra.mxu1 %vm2634_vm0, %v6210_v27  ;;  %v3699_v7 = vld [vmem:[%s7995_s1 + $0x268] sm:$0xf]  ;;  %v5175_v54 = vld [vmem:[%s7995_s1 + $0x5b4] sm:$0xf0] }
  0xe1   : > { %3015 = vmatpush.bf16.msrb.mxu1 %v3892_v11  ;;  %2980 = vmatpush.bf16.msra.mxu2 %v3444_v18  ;;  %v4019_v11 = vld [vmem:[%s7995_s1 + $0x4e8] sm:$0xf]  ;;  %v3700_v17 = vor.u32 %v5071_v8, %v3699_v7  ;;  %v3828_v18 = vor.u32 %v5103_v10, %v3827_v9  ;;  %v5059_v59 = vld [vmem:[%s7995_s1 + $0x214] sm:$0xf0]  ;;  %v4116_v62 = vor.u32 %v5175_v54, %v4115_v53 }
  0xe2   : > { %v4020_v19 = vor.u32 %v5151_v12, %v4019_v11  ;;  %v3779_v60 = vld [vmem:[%s7995_s1 + $0x308] sm:$0xf]  ;;  %v5171_v3 = vld [vmem:[%s7995_s1 + $0x594] sm:$0xf0]  ;;  %v3652_v7 = vor.u32 %v5059_v59, %v3651_v56 }
  0xe3   : > { %2993 = vmatpush.bf16.msra.mxu3 %v3572_v20  ;;  %v3683_v20 = vld [vmem:[%s7995_s1 + $0x248] sm:$0xf]  ;;  %v5215_v5 = vld [vmem:[%s7995_s1 + $0x6f4] sm:$0xf0] }
  0xe4   : > { %3003 = vmatpush.bf16.msrb.mxu0 %v3748_v22  ;;  %v5067_v22 = vld [vmem:[%s7995_s1 + $0x254] sm:$0xf0]  ;;  %v3971_v63 = vld [vmem:[%s7995_s1 + $0x488] sm:$0xf] }
  0xe5   : > { %3016 = vmatpush.bf16.msrb.mxu1 %v3876_v36  ;;  %2981 = vmatpush.bf16.msra.mxu2 %v3428_v48  ;;  %v4131_v36 = vld [vmem:[%s7995_s1 + $0x5c8] sm:$0xf]  ;;  %v3684_v39 = vor.u32 %v5067_v22, %v3683_v20  ;;  %v5247_v10 = vld [vmem:[%s7995_s1 + $0x7f4] sm:$0xf0] }
  0xe6   : > { %v3795_v48 = vld [vmem:[%s7995_s1 + $0x328] sm:$0xf]  ;;  %v4132_v49 = vor.u32 %v5179_v37, %v4131_v36  ;;  %v5211_v22 = vld [vmem:[%s7995_s1 + $0x6d4] sm:$0xf0] }
  0xe7   : > { %2994 = vmatpush.bf16.msra.mxu3 %v3556_v50  ;;  %v5095_v50 = vld [vmem:[%s7995_s1 + $0x334] sm:$0xf0]  ;;  %v4275_v4 = vld [vmem:[%s7995_s1 + $0x6e8] sm:$0xf] }
  0xe8   : > { %3004 = vmatpush.bf16.msrb.mxu0 %v3732_v51  ;;  %v3987_v51 = vld [vmem:[%s7995_s1 + $0x4a8] sm:$0xf]  ;;  %v3796_v57 = vor.u32 %v5095_v50, %v3795_v48  ;;  %v4276_v15 = vor.u32 %v5215_v5, %v4275_v4  ;;  %v5239_v53 = vld [vmem:[%s7995_s1 + $0x7b4] sm:$0xf0] }
  0xe9   : > { %3017 = vmatpush.bf16.msrb.mxu1 %v3860_v55  ;;  %2982 = vmatpush.bf16.msra.mxu2 %v3412_v61  ;;  %v3668_v55 = vor.u32 %v5063_v47, %v3667_v45  ;;  %v3988_v58 = vor.u32 %v5143_v52, %v3987_v51  ;;  %v5091_v61 = vld [vmem:[%s7995_s1 + $0x314] sm:$0xf0]  ;;  %v4403_v9 = vld [vmem:[%s7995_s1 + $0x7e8] sm:$0xf] }
  0xea   : > { %v3780_v11 = vor.u32 %v5091_v61, %v3779_v60  ;;  %v4259_v20 = vld [vmem:[%s7995_s1 + $0x6c8] sm:$0xf]  ;;  %v5207_v51 = vld [vmem:[%s7995_s1 + $0x6b4] sm:$0xf0] }
  0xeb   : > { %2995 = vmatpush.bf16.msra.mxu3 %v3540_v0  ;;  %v5139_v0 = vld [vmem:[%s7995_s1 + $0x494] sm:$0xf0]  ;;  %v4387_v23 = vld [vmem:[%s7995_s1 + $0x7c8] sm:$0xf]  ;;  %v4260_v36 = vor.u32 %v5211_v22, %v4259_v20 }
  0xec   : > { %3005 = vmatpush.bf16.msrb.mxu0 %v3716_v1  ;;  %v4099_v1 = vld [vmem:[%s7995_s1 + $0x588] sm:$0xf]  ;;  %v3972_v12 = vor.u32 %v5139_v0, %v3971_v63  ;;  %v5127_v60 = vld [vmem:[%s7995_s1 + $0x434] sm:$0xf0] }
  0xed   : > { %3018 = vmatpush.bf16.msrb.mxu1 %v3844_v6  ;;  %2983 = vmatpush.bf16.msra.mxu2 %v3396_v13  ;;  %v4100_v13 = vor.u32 %v5171_v3, %v4099_v1  ;;  %v3939_v37 = vld [vmem:[%s7995_s1 + $0x448] sm:$0xf]  ;;  %v5159_v63 = vld [vmem:[%s7995_s1 + $0x534] sm:$0xf0] }
  0xee   : > { %v4243_v50 = vld [vmem:[%s7995_s1 + $0x6a8] sm:$0xf]  ;;  %v5203_v1 = vld [vmem:[%s7995_s1 + $0x694] sm:$0xf0] }
  0xef   : > { %2996 = vmatpush.bf16.msra.mxu3 %v3524_v16  ;;  %v2751_v2 = vpop.f32.mrf.mxu0  ;;  %v2764_v8 = vpop.f32.mrf.mxu1  ;;  %v5135_v16 = vld [vmem:[%s7995_s1 + $0x474] sm:$0xf0]  ;;  %v4371_v52 = vld [vmem:[%s7995_s1 + $0x7a8] sm:$0xf] }
  0xf0   : > { %3006 = vmatpush.bf16.msrb.mxu0 %v3700_v17  ;;  %2984 = vmatmul.bf16.vlgmr.msra.gmra.mxu2 %v5766_v31  ;;  %v2752_v6 = vadd.f32 %v2751_v2, %v6820_v46  ;;  %v3955_v46 = vld [vmem:[%s7995_s1 + $0x468] sm:$0xf]  ;;  %v5235_v3 = vld [vmem:[%s7995_s1 + $0x794] sm:$0xf0] }
  0xf1   : > { %3019 = vmatpush.bf16.msrb.mxu1 %v3828_v18  ;;  %3028 = vmatpush.bf16.msrb.mxu2 %v4020_v19  ;;  %v4083_v17 = vld [vmem:[%s7995_s1 + $0x568] sm:$0xf]  ;;  %v4404_v18 = vor.u32 %v5247_v10, %v4403_v9  ;;  %v5167_v19 = vld [vmem:[%s7995_s1 + $0x574] sm:$0xf0]  ;;  %v3956_v28 = vor.u32 %v5135_v16, %v3955_v46 }
  0xf2   : > { %2997 = vmatmul.bf16.vlgmr.msra.gmra.mxu3 %v5770_v34  ;;  %v2765_v14 = vadd.f32 %v2764_v8, %v2752_v6  ;;  %v4084_v33 = vor.u32 %v5167_v19, %v4083_v17  ;;  %v3923_v59 = vld [vmem:[%s7995_s1 + $0x428] sm:$0xf]  ;;  %v5123_v8 = vld [vmem:[%s7995_s1 + $0x414] sm:$0xf0] }
  0xf3   : > { %3041 = vmatpush.bf16.msrb.mxu3 %v4148_v24  ;;  %v5243_v24 = vld [vmem:[%s7995_s1 + $0x7d4] sm:$0xf0]  ;;  %v2777_v35 = vpop.f32.mrf.mxu2  ;;  %v4051_v61 = vld [vmem:[%s7995_s1 + $0x528] sm:$0xf]  ;;  %v3924_v4 = vor.u32 %v5127_v60, %v3923_v59 }
  0xf4   : > { %3007 = vmatpush.bf16.msrb.mxu0 %v3684_v39  ;;  %v5131_v39 = vld [vmem:[%s7995_s1 + $0x454] sm:$0xf0]  ;;  %v4388_v45 = vor.u32 %v5243_v24, %v4387_v23  ;;  %v4227_v0 = vld [vmem:[%s7995_s1 + $0x688] sm:$0xf]  ;;  %v4052_v6 = vor.u32 %v5159_v63, %v4051_v61 }
  0xf5   : > { %3020 = vmatpush.bf16.msrb.mxu1 %v3812_v40  ;;  %3029 = vmatpush.bf16.msrb.mxu2 %v4004_v43  ;;  %v4067_v40 = vld [vmem:[%s7995_s1 + $0x548] sm:$0xf]  ;;  %v2778_v43 = vadd.f32 %v2777_v35, %v2765_v14  ;;  %v3940_v56 = vor.u32 %v5131_v39, %v3939_v37  ;;  %v5155_v10 = vld [vmem:[%s7995_s1 + $0x514] sm:$0xf0] }
  0xf6   : > { %v4355_v2 = vld [vmem:[%s7995_s1 + $0x788] sm:$0xf]  ;;  %v5199_v14 = vld [vmem:[%s7995_s1 + $0x674] sm:$0xf0] }
  0xf7   : > { %3042 = vmatpush.bf16.msrb.mxu3 %v4132_v49  ;;  %v2753_v47 = vpop.f32.mrf.mxu0  ;;  %v2790_v48 = vpop.f32.mrf.mxu3  ;;  %v5163_v49 = vld [vmem:[%s7995_s1 + $0x554] sm:$0xf0]  ;;  %v3907_v5 = vld [vmem:[%s7995_s1 + $0x408] sm:$0xf] }
  0xf8   : > { %3008 = vmatpush.bf16.msrb.mxu0 %v3668_v55  ;;  %v2766_v54 = vpop.f32.mrf.mxu1  ;;  %v2791_v55 = vadd.f32 %v2790_v48, %v2778_v43  ;;  %v4035_v9 = vld [vmem:[%s7995_s1 + $0x508] sm:$0xf]  ;;  %v5231_v17 = vld [vmem:[%s7995_s1 + $0x774] sm:$0xf0]  ;;  %v3908_v22 = vor.u32 %v5123_v8, %v3907_v5 }
  0xf9   : > { %3021 = vmatpush.bf16.msrb.mxu1 %v3796_v57  ;;  %3030 = vmatpush.bf16.msrb.mxu2 %v3988_v58  ;;  %v4068_v57 = vor.u32 %v5163_v49, %v4067_v40  ;;  %v4244_v58 = vor.u32 %v5207_v51, %v4243_v50  ;;  %v5279_v19 = vld [vmem:[%s7995_s1 + $0x8f4] sm:$0xf0]  ;;  %v4659_v23 = vld [vmem:[%s7995_s1 + $0x9e8] sm:$0xf] }
  0xfa   : > { %v5311_v24 = vld [vmem:[%s7995_s1 + $0x9f4] sm:$0xf0]  ;;  %v4195_v37 = vld [vmem:[%s7995_s1 + $0x648] sm:$0xf] }
  0xfb   : > { %3043 = vmatpush.bf16.msrb.mxu3 %v4116_v62  ;;  %v4372_v62 = vor.u32 %v5239_v53, %v4371_v52  ;;  %v5195_v39 = vld [vmem:[%s7995_s1 + $0x654] sm:$0xf0]  ;;  %v4323_v40 = vld [vmem:[%s7995_s1 + $0x748] sm:$0xf]  ;;  %v4660_v43 = vor.u32 %v5311_v24, %v4659_v23 }
  0xfc   : > { %3009 = vmatpush.bf16.msrb.mxu0 %v3652_v7  ;;  %v4228_v7 = vor.u32 %v5203_v1, %v4227_v0  ;;  %v4515_v47 = vld [vmem:[%s7995_s1 + $0x8c8] sm:$0xf]  ;;  %v5275_v48 = vld [vmem:[%s7995_s1 + $0x8d4] sm:$0xf0]  ;;  %v4196_v51 = vor.u32 %v5195_v39, %v4195_v37 }
  0xfd   : > { %3022 = vmatpush.bf16.msrb.mxu1 %v3780_v11  ;;  %3031 = vmatpush.bf16.msrb.mxu2 %v3972_v12  ;;  %v2779_v11 = vpop.f32.mrf.mxu2  ;;  %v4356_v12 = vor.u32 %v5235_v3, %v4355_v2  ;;  %v4643_v49 = vld [vmem:[%s7995_s1 + $0x9c8] sm:$0xf]  ;;  %v5307_v50 = vld [vmem:[%s7995_s1 + $0x9d4] sm:$0xf0]  ;;  %v4516_v53 = vor.u32 %v5275_v48, %v4515_v47 }
  0xfe   : > { %v4179_v54 = vld [vmem:[%s7995_s1 + $0x628] sm:$0xf]  ;;  %v5271_v60 = vld [vmem:[%s7995_s1 + $0x8b4] sm:$0xf0] }
  0xff   : > { %3044 = vmatpush.bf16.msrb.mxu3 %v4100_v13  ;;  %3010 = vmatmul.bf16.vlgmr.msrb.gmra.mxu0 %v5764_v30  ;;  %v4211_v13 = vld [vmem:[%s7995_s1 + $0x668] sm:$0xf]  ;;  %v2792_v46 = vpop.f32.mrf.mxu3  ;;  %v2803_v16 = vpop.f32.mrf.mxu0  ;;  %v5303_v63 = vld [vmem:[%s7995_s1 + $0x9b4] sm:$0xf0] }
 0x100   : > { %3054 = vmatpush.bf16.msra.mxu0 %v4276_v15  ;;  %3023 = vmatmul.bf16.vlgmr.msrb.gmra.mxu1 %v5768_v32  ;;  %v4339_v15 = vld [vmem:[%s7995_s1 + $0x768] sm:$0xf]  ;;  %v7075_v20 = vadd.f32 %v2803_v16, %v2791_v55  ;;  %v5191_v55 = vld [vmem:[%s7995_s1 + $0x634] sm:$0xf0] }
 0x101   : > { %3067 = vmatpush.bf16.msra.mxu1 %v4404_v18  ;;  %3032 = vmatpush.bf16.msrb.mxu2 %v3956_v28  ;;  %v4531_v18 = vld [vmem:[%s7995_s1 + $0x8e8] sm:$0xf]  ;;  %v4036_v28 = vor.u32 %v5155_v10, %v4035_v9  ;;  %v4340_v35 = vor.u32 %v5231_v17, %v4339_v15  ;;  %v4180_v0 = vor.u32 %v5191_v55, %v4179_v54  ;;  %v5267_v9 = vld [vmem:[%s7995_s1 + $0x894] sm:$0xf0] }
 0x102   : > { %v4499_v59 = vld [vmem:[%s7995_s1 + $0x8a8] sm:$0xf]  ;;  %v5299_v11 = vld [vmem:[%s7995_s1 + $0x994] sm:$0xf0] }
 0x103   : > { %3045 = vmatpush.bf16.msrb.mxu3 %v4084_v33  ;;  %v4212_v33 = vor.u32 %v5199_v14, %v4211_v13  ;;  %v4163_v1 = vld [vmem:[%s7995_s1 + $0x608] sm:$0xf]  ;;  %v4500_v3 = vor.u32 %v5271_v60, %v4499_v59  ;;  %v5343_v13 = vld [vmem:[%s7995_s1 + $0xaf4] sm:$0xf0] }
 0x104   : > { %3055 = vmatpush.bf16.msra.mxu0 %v4260_v36  ;;  %v4532_v36 = vor.u32 %v5279_v19, %v4531_v18  ;;  %v4291_v5 = vld [vmem:[%s7995_s1 + $0x708] sm:$0xf]  ;;  %v5375_v46 = vld [vmem:[%s7995_s1 + $0xbf4] sm:$0xf0] }
 0x105   : > { %3068 = vmatpush.bf16.msra.mxu1 %v4388_v45  ;;  %3033 = vmatpush.bf16.msrb.mxu2 %v3940_v56  ;;  %v5227_v45 = vld [vmem:[%s7995_s1 + $0x754] sm:$0xf0]  ;;  %v4307_v56 = vld [vmem:[%s7995_s1 + $0x728] sm:$0xf] }
 0x106   : > { %v4324_v52 = vor.u32 %v5227_v45, %v4323_v40  ;;  %v4483_v8 = vld [vmem:[%s7995_s1 + $0x888] sm:$0xf]  ;;  %v5263_v24 = vld [vmem:[%s7995_s1 + $0x874] sm:$0xf0] }
 0x107   : > { %3046 = vmatpush.bf16.msrb.mxu3 %v4068_v57  ;;  %v4644_v57 = vor.u32 %v5307_v50, %v4643_v49  ;;  %v2805_v61 = vpop.f32.mrf.mxu0  ;;  %v4611_v10 = vld [vmem:[%s7995_s1 + $0x988] sm:$0xf]  ;;  %v4484_v18 = vor.u32 %v5267_v9, %v4483_v8  ;;  %v5339_v37 = vld [vmem:[%s7995_s1 + $0xad4] sm:$0xf0] }
 0x108   : > { %3056 = vmatpush.bf16.msra.mxu0 %v4244_v58  ;;  %v5223_v58 = vld [vmem:[%s7995_s1 + $0x734] sm:$0xf0]  ;;  %v4915_v15 = vld [vmem:[%s7995_s1 + $0xbe8] sm:$0xf]  ;;  %v4612_v19 = vor.u32 %v5299_v11, %v4611_v10 }
 0x109   : > { %3069 = vmatpush.bf16.msra.mxu1 %v4372_v62  ;;  %3034 = vmatpush.bf16.msrb.mxu2 %v3924_v4  ;;  %v4627_v62 = vld [vmem:[%s7995_s1 + $0x9a8] sm:$0xf]  ;;  %v4308_v2 = vor.u32 %v5223_v58, %v4307_v56  ;;  %v5187_v4 = vld [vmem:[%s7995_s1 + $0x614] sm:$0xf0] }
 0x10a   : > { %v4164_v14 = vor.u32 %v5187_v4, %v4163_v1  ;;  %v4467_v23 = vld [vmem:[%s7995_s1 + $0x868] sm:$0xf]  ;;  %v5371_v40 = vld [vmem:[%s7995_s1 + $0xbd4] sm:$0xf0] }
 0x10b   : > { %3047 = vmatpush.bf16.msrb.mxu3 %v4052_v6  ;;  %v5219_v6 = vld [vmem:[%s7995_s1 + $0x714] sm:$0xf0]  ;;  %v4899_v39 = vld [vmem:[%s7995_s1 + $0xbc8] sm:$0xf] }
 0x10c   : > { %3057 = vmatpush.bf16.msra.mxu0 %v4228_v7  ;;  %v4628_v7 = vor.u32 %v5303_v63, %v4627_v62  ;;  %v4292_v17 = vor.u32 %v5219_v6, %v4291_v5  ;;  %v4451_v49 = vld [vmem:[%s7995_s1 + $0x848] sm:$0xf]  ;;  %v5259_v50 = vld [vmem:[%s7995_s1 + $0x854] sm:$0xf0] }
 0x10d   : > { %3070 = vmatpush.bf16.msra.mxu1 %v4356_v12  ;;  %3035 = vmatpush.bf16.msrb.mxu2 %v3908_v22  ;;  %v4787_v12 = vld [vmem:[%s7995_s1 + $0xae8] sm:$0xf]  ;;  %v5291_v54 = vld [vmem:[%s7995_s1 + $0x954] sm:$0xf0]  ;;  %v4452_v60 = vor.u32 %v5259_v50, %v4451_v49 }
 0x10e   : > { %v4788_v22 = vor.u32 %v5343_v13, %v4787_v12  ;;  %v4755_v55 = vld [vmem:[%s7995_s1 + $0xaa8] sm:$0xf]  ;;  %v5335_v56 = vld [vmem:[%s7995_s1 + $0xab4] sm:$0xf0] }
 0x10f   : > { %3048 = vmatpush.bf16.msrb.mxu3 %v4036_v28  ;;  %v7169_v16 = vpop.f32.mrf.mxu1  ;;  %v4595_v28 = vld [vmem:[%s7995_s1 + $0x968] sm:$0xf]  ;;  %v5367_v58 = vld [vmem:[%s7995_s1 + $0xbb4] sm:$0xf0]  ;;  %v4756_v62 = vor.u32 %v5335_v56, %v4755_v55 }
 0x110   : > { %3058 = vmatpush.bf16.msra.mxu0 %v4212_v33  ;;  %3036 = vmatmul.bf16.vlgmr.msrb.gmra.mxu2 %v5900_v41  ;;  %v4916_v33 = vor.u32 %v5375_v46, %v4915_v15  ;;  %v4435_v63 = vld [vmem:[%s7995_s1 + $0x828] sm:$0xf]  ;;  %v5331_v5 = vld [vmem:[%s7995_s1 + $0xa94] sm:$0xf0] }
 0x111   : > { %3071 = vmatpush.bf16.msra.mxu1 %v4340_v35  ;;  %3080 = vmatpush.bf16.msra.mxu2 %v4532_v36  ;;  %v5295_v35 = vld [vmem:[%s7995_s1 + $0x974] sm:$0xf0]  ;;  %v4771_v36 = vld [vmem:[%s7995_s1 + $0xac8] sm:$0xf] }
 0x112   : > { %3049 = vmatmul.bf16.vlgmr.msrb.gmra.mxu3 %v5904_v44  ;;  %v4596_v47 = vor.u32 %v5295_v35, %v4595_v28  ;;  %v4772_v48 = vor.u32 %v5339_v37, %v4771_v36  ;;  %v4563_v1 = vld [vmem:[%s7995_s1 + $0x928] sm:$0xf]  ;;  %v5283_v46 = vld [vmem:[%s7995_s1 + $0x914] sm:$0xf0]  ;;  %v5021_v36 = vld [vmem:[%s7995_s1 + $0xec] sm:$0xf] }
 0x113   : > { %3093 = vmatpush.bf16.msra.mxu3 %v4660_v43  ;;  %v4468_v43 = vor.u32 %v5263_v24, %v4467_v23  ;;  %v7195_v45 = vpop.f32.mrf.mxu2  ;;  %v4739_v4 = vld [vmem:[%s7995_s1 + $0xa88] sm:$0xf]  ;;  %v5359_v24 = vld [vmem:[%s7995_s1 + $0xb74] sm:$0xf0]  ;;  %v3509_v37 = vld [vmem:[%s7995_s1 + $0xf8] sm:$0xf0] }
 0x114   : > { %3059 = vmatpush.bf16.msra.mxu0 %v4196_v51  ;;  %v4579_v51 = vld [vmem:[%s7995_s1 + $0x948] sm:$0xf]  ;;  %v4740_v13 = vor.u32 %v5331_v5, %v4739_v4  ;;  %v5323_v49 = vld [vmem:[%s7995_s1 + $0xa54] sm:$0xf0]  ;;  %v5013_v5 = vld [vmem:[%s7995_s1 + $0xac] sm:$0xf] }
 0x115   : > { %3072 = vmatpush.bf16.msra.mxu1 %v4324_v52  ;;  %3081 = vmatpush.bf16.msra.mxu2 %v4516_v53  ;;  %v7206_v52 = vpop.f32.mrf.mxu3  ;;  %v4900_v53 = vor.u32 %v5371_v40, %v4899_v39  ;;  %v4580_v61 = vor.u32 %v5291_v54, %v4579_v51  ;;  %v4867_v6 = vld [vmem:[%s7995_s1 + $0xb88] sm:$0xf]  ;;  %v3512_v51 = vor.u32 %v5021_v36, %v3509_v37  ;;  %v5387_v55 = vld [vmem:[%s7995_s1 + $0xc54] sm:$0xf0]  ;;  %v3893_v36 = vld [vmem:[%s7995_s1 + $0x3f8] sm:$0xf0] }
 0x116   : > { %v4419_v10 = vld [vmem:[%s7995_s1 + $0x808] sm:$0xf]  ;;  %v5383_v4 = vld [vmem:[%s7995_s1 + $0xc34] sm:$0xf0] }
 0x117   : > { %3094 = vmatpush.bf16.msra.mxu3 %v4644_v57  ;;  %v4883_v57 = vld [vmem:[%s7995_s1 + $0xba8] sm:$0xf]  ;;  %v2818_v59 = vpop.f32.mrf.mxu1 }
 0x118   : > { %3060 = vmatpush.bf16.msra.mxu0 %v4180_v0  ;;  %v5255_v0 = vld [vmem:[%s7995_s1 + $0x834] sm:$0xf0]  ;;  %v4547_v15 = vld [vmem:[%s7995_s1 + $0x908] sm:$0xf] }
 0x119   : > { %3073 = vmatpush.bf16.msra.mxu1 %v4308_v2  ;;  %3082 = vmatpush.bf16.msra.mxu2 %v4500_v3  ;;  %v4884_v2 = vor.u32 %v5367_v58, %v4883_v57  ;;  %v5287_v3 = vld [vmem:[%s7995_s1 + $0x934] sm:$0xf0]  ;;  %v4436_v9 = vor.u32 %v5255_v0, %v4435_v63  ;;  %v4851_v23 = vld [vmem:[%s7995_s1 + $0xb68] sm:$0xf]  ;;  %v4548_v39 = vor.u32 %v5283_v46, %v4547_v15  ;;  %v5017_v57 = vld [vmem:[%s7995_s1 + $0xcc] sm:$0xf] }
 0x11a   : > { %v4564_v12 = vor.u32 %v5287_v3, %v4563_v1  ;;  %v4979_v28 = vld [vmem:[%s7995_s1 + $0xc68] sm:$0xf]  ;;  %v3493_v58 = vld [vmem:[%s7995_s1 + $0xd8] sm:$0xf0]  ;;  %v5319_v63 = vld [vmem:[%s7995_s1 + $0xa34] sm:$0xf0] }
 0x11b   : > { %3095 = vmatpush.bf16.msra.mxu3 %v4628_v7  ;;  %v5363_v7 = vld [vmem:[%s7995_s1 + $0xb94] sm:$0xf0]  ;;  %v2831_v11 = vpop.f32.mrf.mxu2  ;;  %v4835_v50 = vld [vmem:[%s7995_s1 + $0xb48] sm:$0xf]  ;;  %v3496_v1 = vor.u32 %v5017_v57, %v3493_v58  ;;  %v5081_v57 = vld [vmem:[%s7995_s1 + $0x2cc] sm:$0xf] }
 0x11c   : > { %3061 = vmatpush.bf16.msra.mxu0 %v4164_v14  ;;  %v7249_v8 = vpop.f32.mrf.mxu0  ;;  %v5251_v14 = vld [vmem:[%s7995_s1 + $0x814] sm:$0xf0]  ;;  %v4963_v54 = vld [vmem:[%s7995_s1 + $0xc48] sm:$0xf]  ;;  %v3749_v58 = vld [vmem:[%s7995_s1 + $0x2d8] sm:$0xf0] }
 0x11d   : > { %3074 = vmatpush.bf16.msra.mxu1 %v4292_v17  ;;  %3083 = vmatpush.bf16.msra.mxu2 %v4484_v18  ;;  %v2844_v17 = vpop.f32.mrf.mxu3  ;;  %v4868_v18 = vor.u32 %v5363_v7, %v4867_v6  ;;  %v4420_v35 = vor.u32 %v5251_v14, %v4419_v10  ;;  %v4819_v0 = vld [vmem:[%s7995_s1 + $0xb28] sm:$0xf]  ;;  %v3477_v6 = vld [vmem:[%s7995_s1 + $0xb8] sm:$0xf0]  ;;  %v5315_v10 = vld [vmem:[%s7995_s1 + $0xa14] sm:$0xf0] }
 0x11e   : > { %v4947_v3 = vld [vmem:[%s7995_s1 + $0xc28] sm:$0xf]  ;;  %v5347_v14 = vld [vmem:[%s7995_s1 + $0xb14] sm:$0xf0]  ;;  %v3480_v46 = vor.u32 %v5013_v5, %v3477_v6  ;;  %v3605_v6 = vld [vmem:[%s7995_s1 + $0x1b8] sm:$0xf0] }
 0x11f   : > { %3096 = vmatpush.bf16.msra.mxu3 %v4612_v19  ;;  %3062 = vmatmul.bf16.vlgmr.msra.gmra.mxu0 %v5892_v38  ;;  %v4723_v19 = vld [vmem:[%s7995_s1 + $0xa68] sm:$0xf]  ;;  %v5379_v17 = vld [vmem:[%s7995_s1 + $0xc14] sm:$0xf0] }
 0x120   : > { %3106 = vmatpush.bf16.msrb.mxu0 %v4788_v22  ;;  %3075 = vmatmul.bf16.vlgmr.msra.gmra.mxu1 %v5902_v42  ;;  %v5327_v22 = vld [vmem:[%s7995_s1 + $0xa74] sm:$0xf0]  ;;  %v4931_v15 = vld [vmem:[%s7995_s1 + $0xc08] sm:$0xf] }
 0x121   : > { %3119 = vmatpush.bf16.msrb.mxu1 %v4916_v33  ;;  %3084 = vmatpush.bf16.msra.mxu2 %v4468_v43  ;;  %v5391_v33 = vld [vmem:[%s7995_s1 + $0xc74] sm:$0xf0]  ;;  %v4724_v40 = vor.u32 %v5327_v22, %v4723_v19  ;;  %v4852_v43 = vor.u32 %v5359_v24, %v4851_v23  ;;  %v3461_v19 = vld [vmem:[%s7995_s1 + $0x98] sm:$0xf0]  ;;  %v5053_v22 = vld [vmem:[%s7995_s1 + $0x1ec] sm:$0xf] }
 0x122   : > { %v3637_v23 = vld [vmem:[%s7995_s1 + $0x1f8] sm:$0xf0]  ;;  %v5085_v24 = vld [vmem:[%s7995_s1 + $0x2ec] sm:$0xf] }
 0x123   : > { %3097 = vmatpush.bf16.msra.mxu3 %v4596_v47  ;;  %v4980_v47 = vor.u32 %v5391_v33, %v4979_v28  ;;  %v3765_v33 = vld [vmem:[%s7995_s1 + $0x2f8] sm:$0xf0] }
 0x124   : > { %3107 = vmatpush.bf16.msrb.mxu0 %v4772_v48  ;;  %v4707_v48 = vld [vmem:[%s7995_s1 + $0xa48] sm:$0xf]  ;;  %v2857_v56 = vpop.f32.mrf.mxu0 }
 0x125   : > { %3120 = vmatpush.bf16.msrb.mxu1 %v4900_v53  ;;  %3085 = vmatpush.bf16.msra.mxu2 %v4452_v60  ;;  %v5355_v53 = vld [vmem:[%s7995_s1 + $0xb54] sm:$0xf0]  ;;  %v4708_v59 = vor.u32 %v5323_v49, %v4707_v48  ;;  %v3640_v49 = vor.u32 %v5053_v22, %v3637_v23  ;;  %v3621_v56 = vld [vmem:[%s7995_s1 + $0x1d8] sm:$0xf0]  ;;  %v5073_v23 = vld [vmem:[%s7995_s1 + $0x28c] sm:$0xf] }
 0x126   : > { %v4836_v60 = vor.u32 %v5355_v53, %v4835_v50  ;;  %v5005_v50 = vld [vmem:[%s7995_s1 + $0x6c] sm:$0xf]  ;;  %v3768_v53 = vor.u32 %v5085_v24, %v3765_v33  ;;  %v3589_v22 = vld [vmem:[%s7995_s1 + $0x198] sm:$0xf0] }
 0x127   : > { %3098 = vmatpush.bf16.msra.mxu3 %v4580_v61  ;;  %v4964_v61 = vor.u32 %v5387_v55, %v4963_v54  ;;  %v5049_v55 = vld [vmem:[%s7995_s1 + $0x1cc] sm:$0xf] }
 0x128   : > { %3108 = vmatpush.bf16.msrb.mxu0 %v4756_v62  ;;  %v4691_v62 = vld [vmem:[%s7995_s1 + $0xa28] sm:$0xf]  ;;  %v5105_v33 = vld [vmem:[%s7995_s1 + $0x38c] sm:$0xf] }
 0x129   : > { %3121 = vmatpush.bf16.msrb.mxu1 %v4884_v2  ;;  %3086 = vmatpush.bf16.msra.mxu2 %v4436_v9  ;;  %v5351_v2 = vld [vmem:[%s7995_s1 + $0xb34] sm:$0xf0]  ;;  %v4692_v7 = vor.u32 %v5319_v63, %v4691_v62  ;;  %v4675_v9 = vld [vmem:[%s7995_s1 + $0xa08] sm:$0xf] }
 0x12a   : > { %v4820_v11 = vor.u32 %v5351_v2, %v4819_v0  ;;  %v4676_v28 = vor.u32 %v5315_v10, %v4675_v9  ;;  %v3624_v0 = vor.u32 %v5049_v55, %v3621_v56  ;;  %v3429_v2 = vld [vmem:[%s7995_s1 + $0x58] sm:$0xf0]  ;;  %v5109_v10 = vld [vmem:[%s7995_s1 + $0x3ac] sm:$0xf] }
 0x12b   : > { %3099 = vmatpush.bf16.msra.mxu3 %v4564_v12  ;;  %v4948_v12 = vor.u32 %v5383_v4, %v4947_v3  ;;  %v3752_v4 = vor.u32 %v5081_v57, %v3749_v58  ;;  %v3733_v9 = vld [vmem:[%s7995_s1 + $0x2b8] sm:$0xf0]  ;;  %v5069_v55 = vld [vmem:[%s7995_s1 + $0x26c] sm:$0xf] }
 0x12c   : > { %3109 = vmatpush.bf16.msrb.mxu0 %v4740_v13  ;;  %v4803_v13 = vld [vmem:[%s7995_s1 + $0xb08] sm:$0xf]  ;;  %v3701_v56 = vld [vmem:[%s7995_s1 + $0x278] sm:$0xf0]  ;;  %v5101_v57 = vld [vmem:[%s7995_s1 + $0x36c] sm:$0xf] }
 0x12d   : > { %3122 = vmatpush.bf16.msrb.mxu1 %v4868_v18  ;;  %3087 = vmatpush.bf16.msra.mxu2 %v4420_v35  ;;  %v5009_v18 = vld [vmem:[%s7995_s1 + $0x8c] sm:$0xf]  ;;  %v3829_v58 = vld [vmem:[%s7995_s1 + $0x378] sm:$0xf0] }
 0x12e   : > { %v5117_v35 = vld [vmem:[%s7995_s1 + $0x3ec] sm:$0xf]  ;;  %v3464_v48 = vor.u32 %v5009_v18, %v3461_v19 }
 0x12f   : > { %3100 = vmatpush.bf16.msra.mxu3 %v4548_v39  ;;  %v7379_v37 = vpop.f32.mrf.mxu1  ;;  %v4804_v39 = vor.u32 %v5347_v14, %v4803_v13  ;;  %v3896_v54 = vor.u32 %v5117_v35, %v3893_v36  ;;  %v3845_v35 = vld [vmem:[%s7995_s1 + $0x398] sm:$0xf0] }
 0x130   : > { %3110 = vmatpush.bf16.msrb.mxu0 %v4724_v40  ;;  %3088 = vmatmul.bf16.vlgmr.msra.gmra.mxu2 %v6089_v21  ;;  %v4932_v40 = vor.u32 %v5379_v17, %v4931_v15  ;;  %v3413_v17 = vld [vmem:[%s7995_s1 + $0x38] sm:$0xf0] }
 0x131   : > { %3123 = vmatpush.bf16.msrb.mxu1 %v4852_v43  ;;  %3136 = vmatpush.bf16.msrb.mxu2 %v4980_v47  ;;  %v7384_v43 = vld [vmem:[%s7996_s2] sm:$0xf] }
 0x132   : > { %3101 = vmatmul.bf16.vlgmr.msra.gmra.mxu3 %v6102_v26  ;;  %v582_v47 = vperm.slane %v7384_v43, 1 }
 0x133   : > { %3145 = vmatpush.bf16.msrb.mxu3 %v3512_v51  ;;  %v3445_v51 = vld [vmem:[%s7995_s1 + $0x78] sm:$0xf0] }
 0x134   : > { %3111 = vmatpush.bf16.msrb.mxu0 %v4708_v59  ;;  %v5113_v59 = vld [vmem:[%s7995_s1 + $0x3cc] sm:$0xf]  ;;  %v2817_v62 = vadd.f32 %v7169_v16, %v582_v47  ;;  %v3448_v63 = vor.u32 %v5005_v50, %v3445_v51 }
 0x135   : > { %3124 = vmatpush.bf16.msrb.mxu1 %v4836_v60  ;;  %3137 = vmatpush.bf16.msrb.mxu2 %v4964_v61  ;;  %v3877_v60 = vld [vmem:[%s7995_s1 + $0x3d8] sm:$0xf0]  ;;  %v7411_v61 = vpop.f32.mrf.mxu2  ;;  %v7420_v3 = vpop.f32.mrf.mxu3  ;;  %v5045_v16 = vld [vmem:[%s7995_s1 + $0x1ac] sm:$0xf] }
 0x136   : > { %v3880_v5 = vor.u32 %v5113_v59, %v3877_v60  ;;  %v2830_v13 = vadd.f32 %v7195_v45, %v2817_v62  ;;  %v3608_v15 = vor.u32 %v5045_v16, %v3605_v6  ;;  %v5041_v45 = vld [vmem:[%s7995_s1 + $0x18c] sm:$0xf]  ;;  %v4021_v60 = vld [vmem:[%s7995_s1 + $0x4f8] sm:$0xf0] }
 0x137   : > { %3146 = vmatpush.bf16.msrb.mxu3 %v3496_v1  ;;  %v5001_v1 = vld [vmem:[%s7995_s1 + $0x4c] sm:$0xf]  ;;  %v3592_v47 = vor.u32 %v5041_v45, %v3589_v22  ;;  %v3685_v6 = vld [vmem:[%s7995_s1 + $0x258] sm:$0xf0] }
 0x138   : > { %3112 = vmatpush.bf16.msrb.mxu0 %v4692_v7  ;;  %v5077_v7 = vld [vmem:[%s7995_s1 + $0x2ac] sm:$0xf]  ;;  %v3432_v14 = vor.u32 %v5001_v1, %v3429_v2  ;;  %v3704_v1 = vor.u32 %v5069_v55, %v3701_v56  ;;  %v3832_v2 = vor.u32 %v5101_v57, %v3829_v58  ;;  %v3669_v45 = vld [vmem:[%s7995_s1 + $0x238] sm:$0xf0] }
 0x139   : > { %3125 = vmatpush.bf16.msrb.mxu1 %v4820_v11  ;;  %3138 = vmatpush.bf16.msrb.mxu2 %v4948_v12  ;;  %v3861_v11 = vld [vmem:[%s7995_s1 + $0x3b8] sm:$0xf0]  ;;  %v2870_v12 = vpop.f32.mrf.mxu1  ;;  %v3736_v18 = vor.u32 %v5077_v7, %v3733_v9  ;;  %v5149_v59 = vld [vmem:[%s7995_s1 + $0x4ec] sm:$0xf] }
 0x13a   : > { %v3864_v19 = vor.u32 %v5109_v10, %v3861_v11  ;;  %v4024_v16 = vor.u32 %v5149_v59, %v4021_v60  ;;  %v5097_v7 = vld [vmem:[%s7995_s1 + $0x34c] sm:$0xf]  ;;  %v3813_v9 = vld [vmem:[%s7995_s1 + $0x358] sm:$0xf0] }
 0x13b   : > { %3147 = vmatpush.bf16.msrb.mxu3 %v3480_v46  ;;  %v4997_v46 = vld [vmem:[%s7995_s1 + $0x2c] sm:$0xf]  ;;  %v4005_v12 = vld [vmem:[%s7995_s1 + $0x4d8] sm:$0xf0] }
 0x13c   : > { %3113 = vmatpush.bf16.msrb.mxu0 %v4676_v28  ;;  %v7460_v24 = vpop.f32.mrf.mxu0  ;;  %v3717_v28 = vld [vmem:[%s7995_s1 + $0x298] sm:$0xf0]  ;;  %v5145_v11 = vld [vmem:[%s7995_s1 + $0x4cc] sm:$0xf] }
 0x13d   : > { %3126 = vmatpush.bf16.msrb.mxu1 %v4804_v39  ;;  %3139 = vmatpush.bf16.msrb.mxu2 %v4932_v40  ;;  %v2883_v36 = vpop.f32.mrf.mxu2  ;;  %v2843_v39 = vadd.f32 %v7206_v52, %v2830_v13  ;;  %v3416_v40 = vor.u32 %v4997_v46, %v3413_v17  ;;  %v2896_v50 = vpop.f32.mrf.mxu3  ;;  %v3720_v51 = vor.u32 %v5073_v23, %v3717_v28  ;;  %v5037_v52 = vld [vmem:[%s7995_s1 + $0x16c] sm:$0xf]  ;;  %v3797_v23 = vld [vmem:[%s7995_s1 + $0x338] sm:$0xf0] }
 0x13e   : > { %v3816_v46 = vor.u32 %v5097_v7, %v3813_v9  ;;  %v5029_v17 = vld [vmem:[%s7995_s1 + $0x12c] sm:$0xf]  ;;  %v4149_v56 = vld [vmem:[%s7995_s1 + $0x5f8] sm:$0xf0] }
 0x13f   : > { %3148 = vmatpush.bf16.msrb.mxu3 %v3464_v48  ;;  %3114 = vmatmul.bf16.vlgmr.msrb.gmra.mxu0 %v6100_v25  ;;  %v4993_v48 = vld [vmem:[%s7995_s1 + $0xc] sm:$0xf]  ;;  %v2856_v62 = vadd.f32 %v7249_v8, %v2843_v39  ;;  %v4277_v60 = vld [vmem:[%s7995_s1 + $0x6f8] sm:$0xf0] }
 0x140   : > { %3158 = vmatpush.bf16.msra.mxu0 %v3640_v49  ;;  %3127 = vmatmul.bf16.vlgmr.msrb.gmra.mxu1 %v6110_v29  ;;  %v3397_v49 = vld [vmem:[%s7995_s1 + $0x18] sm:$0xf0]  ;;  %v5065_v8 = vld [vmem:[%s7995_s1 + $0x24c] sm:$0xf] }
 0x141   : > { %3171 = vmatpush.bf16.msra.mxu1 %v3768_v53  ;;  %3184 = vmatpush.bf16.msra.mxu2 %v3896_v54  ;;  %v3848_v53 = vor.u32 %v5105_v33, %v3845_v35  ;;  %v3573_v54 = vld [vmem:[%s7995_s1 + $0x178] sm:$0xf0]  ;;  %v2869_v13 = vadd.f32 %v7379_v37, %v2856_v62  ;;  %v4008_v37 = vor.u32 %v5145_v11, %v4005_v12  ;;  %v5093_v22 = vld [vmem:[%s7995_s1 + $0x32c] sm:$0xf] }
 0x142   : > { %4987 = vmatmul.msk.bf16.vlgmr.msrb.gmra.mxu2 %vm2634_vm0, %v6210_v27  ;;  %v5141_v28 = vld [vmem:[%s7995_s1 + $0x4ac] sm:$0xf]  ;;  %v3989_v33 = vld [vmem:[%s7995_s1 + $0x4b8] sm:$0xf0] }
 0x143   : > { %3149 = vmatpush.bf16.msrb.mxu3 %v3448_v63  ;;  %v3400_v63 = vor.u32 %v4993_v48, %v3397_v49  ;;  %v2882_v35 = vadd.f32 %v7411_v61, %v2869_v13  ;;  %v5025_v39 = vld [vmem:[%s7995_s1 + $0x10c] sm:$0xf]  ;;  %v3800_v48 = vor.u32 %v5093_v22, %v3797_v23  ;;  %v3653_v61 = vld [vmem:[%s7995_s1 + $0x218] sm:$0xf0]  ;;  %v3992_v50 = vor.u32 %v5141_v28, %v3989_v33 }
 0x144   : > { %3159 = vmatpush.bf16.msra.mxu0 %v3624_v0  ;;  %v3576_v0 = vor.u32 %v5037_v52, %v3573_v54  ;;  %v2909_v10 = vpop.f32.mrf.mxu0  ;;  %v5089_v49 = vld [vmem:[%s7995_s1 + $0x30c] sm:$0xf]  ;;  %v3973_v52 = vld [vmem:[%s7995_s1 + $0x498] sm:$0xf0] }
 0x145   : > { %3172 = vmatpush.bf16.msra.mxu1 %v3752_v4  ;;  %3185 = vmatpush.bf16.msra.mxu2 %v3880_v5  ;;  %v5033_v4 = vld [vmem:[%s7995_s1 + $0x14c] sm:$0xf]  ;;  %v3557_v5 = vld [vmem:[%s7995_s1 + $0x158] sm:$0xf0]  ;;  %v2895_v58 = vadd.f32 %v7420_v3, %v2882_v35 }
 0x146   : > { %v5181_v55 = vld [vmem:[%s7995_s1 + $0x5ec] sm:$0xf]  ;;  %v4133_v7 = vld [vmem:[%s7995_s1 + $0x5d8] sm:$0xf0] }
 0x147   : > { %3150 = vmatpush.bf16.msrb.mxu3 %v3432_v14  ;;  %v3560_v14 = vor.u32 %v5033_v4, %v3557_v5  ;;  %v5213_v57 = vld [vmem:[%s7995_s1 + $0x6ec] sm:$0xf]  ;;  %v3957_v5 = vld [vmem:[%s7995_s1 + $0x478] sm:$0xf0]  ;;  %v2908_v10 = vadd.f32 %v7460_v24, %v2895_v58 }
 0x148   : > { %3160 = vmatpush.bf16.msra.mxu0 %v3608_v15  ;;  %v3688_v15 = vor.u32 %v5065_v8, %v3685_v6  ;;  %v5245_v62 = vld [vmem:[%s7995_s1 + $0x7ec] sm:$0xf]  ;;  %v4280_v8 = vor.u32 %v5213_v57, %v4277_v60  ;;  %v4261_v11 = vld [vmem:[%s7995_s1 + $0x6d8] sm:$0xf0] }
 0x149   : > { %3173 = vmatpush.bf16.msra.mxu1 %v3736_v18  ;;  %3186 = vmatpush.bf16.msra.mxu2 %v3864_v19  ;;  %v3541_v18 = vld [vmem:[%s7995_s1 + $0x138] sm:$0xf0]  ;;  %v5061_v19 = vld [vmem:[%s7995_s1 + $0x22c] sm:$0xf] }
 0x14a   : > { %v3544_v36 = vor.u32 %v5029_v17, %v3541_v18  ;;  %v5133_v4 = vld [vmem:[%s7995_s1 + $0x46c] sm:$0xf]  ;;  %v4389_v13 = vld [vmem:[%s7995_s1 + $0x7d8] sm:$0xf0] }
 0x14b   : > { %3151 = vmatpush.bf16.msrb.mxu3 %v3416_v40  ;;  %v3525_v40 = vld [vmem:[%s7995_s1 + $0x118] sm:$0xf0]  ;;  %v5177_v6 = vld [vmem:[%s7995_s1 + $0x5cc] sm:$0xf] }
 0x14c   : > { %3161 = vmatpush.bf16.msra.mxu0 %v3592_v47  ;;  %v3672_v47 = vor.u32 %v5061_v19, %v3669_v45  ;;  %v3528_v59 = vor.u32 %v5025_v39, %v3525_v40  ;;  %v5209_v9 = vld [vmem:[%s7995_s1 + $0x6cc] sm:$0xf]  ;;  %v3941_v19 = vld [vmem:[%s7995_s1 + $0x458] sm:$0xf0] }
 0x14d   : > { %3174 = vmatpush.bf16.msra.mxu1 %v3720_v51  ;;  %3187 = vmatpush.bf16.msra.mxu2 %v3848_v53  ;;  %v3781_v51 = vld [vmem:[%s7995_s1 + $0x318] sm:$0xf0]  ;;  %v5137_v53 = vld [vmem:[%s7995_s1 + $0x48c] sm:$0xf]  ;;  %v2920_v54 = vpop.f32.mrf.mxu1 }
 0x14e   : > { %v3976_v3 = vor.u32 %v5137_v53, %v3973_v52  ;;  %v5241_v12 = vld [vmem:[%s7995_s1 + $0x7cc] sm:$0xf]  ;;  %v4117_v28 = vld [vmem:[%s7995_s1 + $0x5b8] sm:$0xf0] }
 0x14f   : > { %3152 = vmatpush.bf16.msrb.mxu3 %v3400_v63  ;;  %v4405_v63 = vld [vmem:[%s7995_s1 + $0x7f8] sm:$0xf0]  ;;  %v5129_v18 = vld [vmem:[%s7995_s1 + $0x44c] sm:$0xf]  ;;  %v4392_v45 = vor.u32 %v5241_v12, %v4389_v13 }
 0x150   : > { %3162 = vmatpush.bf16.msra.mxu0 %v3576_v0  ;;  %v5173_v23 = vld [vmem:[%s7995_s1 + $0x5ac] sm:$0xf]  ;;  %v4373_v40 = vld [vmem:[%s7995_s1 + $0x7b8] sm:$0xf0] }
 0x151   : > { %3175 = vmatpush.bf16.msra.mxu1 %v3704_v1  ;;  %3188 = vmatpush.bf16.msra.mxu2 %v3832_v2  ;;  %v3784_v1 = vor.u32 %v5089_v49, %v3781_v51  ;;  %v4152_v2 = vor.u32 %v5181_v55, %v4149_v56  ;;  %v5205_v33 = vld [vmem:[%s7995_s1 + $0x6ac] sm:$0xf]  ;;  %v4229_v52 = vld [vmem:[%s7995_s1 + $0x698] sm:$0xf0] }
 0x152   : > { %3153 = vmatmul.bf16.vlgmr.msrb.gmra.mxu3 %v5766_v31  ;;  %v5057_v31 = vld [vmem:[%s7995_s1 + $0x20c] sm:$0xf]  ;;  %v4357_v55 = vld [vmem:[%s7995_s1 + $0x798] sm:$0xf0] }
 0x153   : > { %3197 = vmatpush.bf16.msra.mxu3 %v4024_v16  ;;  %v3656_v0 = vor.u32 %v5057_v31, %v3653_v61  ;;  %v4408_v16 = vor.u32 %v5245_v62, %v4405_v63  ;;  %v5237_v39 = vld [vmem:[%s7995_s1 + $0x7ac] sm:$0xf]  ;;  %v3925_v61 = vld [vmem:[%s7995_s1 + $0x438] sm:$0xf0] }
 0x154   : > { %3163 = vmatpush.bf16.msra.mxu0 %v3560_v14  ;;  %v2921_v14 = vadd.f32 %v2920_v54, %v2908_v10  ;;  %v5125_v31 = vld [vmem:[%s7995_s1 + $0x42c] sm:$0xf]  ;;  %v3909_v60 = vld [vmem:[%s7995_s1 + $0x418] sm:$0xf0] }
 0x155   : > { %3176 = vmatpush.bf16.msra.mxu1 %v3688_v15  ;;  %3189 = vmatpush.bf16.msra.mxu2 %v3816_v46  ;;  %v3960_v15 = vor.u32 %v5133_v4, %v3957_v5  ;;  %v2933_v24 = vpop.f32.mrf.mxu2  ;;  %v4136_v46 = vor.u32 %v5177_v6, %v4133_v7  ;;  %v2946_v17 = vpop.f32.mrf.mxu3  ;;  %v5233_v54 = vld [vmem:[%s7995_s1 + $0x78c] sm:$0xf]  ;;  %v3928_v57 = vor.u32 %v5125_v31, %v3925_v61  ;;  %v4213_v5 = vld [vmem:[%s7995_s1 + $0x678] sm:$0xf0] }
 0x156   : > { %v2922_v22 = vpop.f32.mrf.mxu1  ;;  %v2934_v35 = vadd.f32 %v2933_v24, %v2921_v14  ;;  %v5197_v4 = vld [vmem:[%s7995_s1 + $0x66c] sm:$0xf]  ;;  %v4069_v24 = vld [vmem:[%s7995_s1 + $0x558] sm:$0xf0] }
 0x157   : > { %3198 = vmatpush.bf16.msra.mxu3 %v4008_v37  ;;  %v4264_v37 = vor.u32 %v5209_v9, %v4261_v11  ;;  %v5277_v7 = vld [vmem:[%s7995_s1 + $0x8ec] sm:$0xf]  ;;  %v4533_v9 = vld [vmem:[%s7995_s1 + $0x8f8] sm:$0xf0]  ;;  %v4216_v14 = vor.u32 %v5197_v4, %v4213_v5 }
 0x158   : > { %3164 = vmatpush.bf16.msra.mxu0 %v3544_v36  ;;  %v4245_v36 = vld [vmem:[%s7995_s1 + $0x6b8] sm:$0xf0]  ;;  %v2947_v51 = vadd.f32 %v2946_v17, %v2934_v35  ;;  %v5161_v13 = vld [vmem:[%s7995_s1 + $0x54c] sm:$0xf] }
 0x159   : > { %3177 = vmatpush.bf16.msra.mxu1 %v3672_v47  ;;  %3190 = vmatpush.bf16.msra.mxu2 %v3800_v48  ;;  %v3944_v47 = vor.u32 %v5129_v18, %v3941_v19  ;;  %v4120_v48 = vor.u32 %v5173_v23, %v4117_v28  ;;  %v4248_v49 = vor.u32 %v5205_v33, %v4245_v36  ;;  %v4197_v17 = vld [vmem:[%s7995_s1 + $0x658] sm:$0xf0]  ;;  %v3314_v18 = vmax.f32 %v7075_v20, 0.0  ;;  %v5273_v20 = vld [vmem:[%s7995_s1 + $0x8cc] sm:$0xf] }
 0x15a   : > { %v4325_v22 = vld [vmem:[%s7995_s1 + $0x758] sm:$0xf0]  ;;  %v4072_v35 = vor.u32 %v5161_v13, %v4069_v24  ;;  %v5373_v4 = vld [vmem:[%s7995_s1 + $0xbec] sm:$0xf] }
 0x15b   : > { %3199 = vmatpush.bf16.msra.mxu3 %v3992_v50  ;;  %v5201_v50 = vld [vmem:[%s7995_s1 + $0x68c] sm:$0xf]  ;;  %v4517_v28 = vld [vmem:[%s7995_s1 + $0x8d8] sm:$0xf0] }
 0x15c   : > { %3165 = vmatpush.bf16.msra.mxu0 %v3528_v59  ;;  %v2959_v53 = vpop.f32.mrf.mxu0  ;;  %v5121_v59 = vld [vmem:[%s7995_s1 + $0x40c] sm:$0xf]  ;;  %v4520_v31 = vor.u32 %v5273_v20, %v4517_v28  ;;  %v4181_v61 = vld [vmem:[%s7995_s1 + $0x638] sm:$0xf0] }
 0x15d   : > { %3178 = vmatpush.bf16.msra.mxu1 %v3656_v0  ;;  %3191 = vmatpush.bf16.msra.mxu2 %v3784_v1  ;;  %v2960_v56 = vadd.f32 %v2959_v53, %v2947_v51  ;;  %v2948_v62 = vpop.f32.mrf.mxu3  ;;  %v2935_v63 = vpop.f32.mrf.mxu2  ;;  %v4232_v0 = vor.u32 %v5201_v50, %v4229_v52  ;;  %v4360_v1 = vor.u32 %v5233_v54, %v4357_v55  ;;  %v5153_v53 = vld [vmem:[%s7995_s1 + $0x50c] sm:$0xf]  ;;  %v4037_v52 = vld [vmem:[%s7995_s1 + $0x518] sm:$0xf0] }
 0x15e   : > { %v2972_v6 = vpop.f32.mrf.mxu1  ;;  %v3912_v11 = vor.u32 %v5121_v59, %v3909_v60  ;;  %v5185_v55 = vld [vmem:[%s7995_s1 + $0x60c] sm:$0xf]  ;;  %v4293_v59 = vld [vmem:[%s7995_s1 + $0x718] sm:$0xf0] }
 0x15f   : > { %3200 = vmatpush.bf16.msra.mxu3 %v3976_v3  ;;  %3166 = vmatmul.bf16.vlgmr.msra.gmra.mxu0 %v5770_v34  ;;  %v4376_v34 = vor.u32 %v5237_v39, %v4373_v40  ;;  %v5165_v3 = vld [vmem:[%s7995_s1 + $0x56c] sm:$0xf]  ;;  %v2973_v10 = vadd.f32 %v2972_v6, %v2960_v56  ;;  %v4165_v56 = vld [vmem:[%s7995_s1 + $0x618] sm:$0xf0] }
 0x160   : > { %3210 = vmatpush.bf16.msrb.mxu0 %v4152_v2  ;;  %3192 = vmatmul.bf16.vlgmr.msra.gmra.mxu2 %v5768_v32  ;;  %v4101_v32 = vld [vmem:[%s7995_s1 + $0x598] sm:$0xf0]  ;;  %v5157_v40 = vld [vmem:[%s7995_s1 + $0x52c] sm:$0xf] }
 0x161   : > { %3223 = vmatpush.bf16.msrb.mxu1 %v4280_v8  ;;  %3236 = vmatpush.bf16.msrb.mxu2 %v4408_v16  ;;  %v4085_v2 = vld [vmem:[%s7995_s1 + $0x578] sm:$0xf0]  ;;  %v5229_v8 = vld [vmem:[%s7995_s1 + $0x76c] sm:$0xf]  ;;  %v3315_v19 = vmax.f32 %v2973_v10, 0.0 }
 0x162   : > { %3179 = vmatmul.bf16.vlgmr.msra.gmra.mxu1 %v5764_v30  ;;  %v5169_v30 = vld [vmem:[%s7995_s1 + $0x58c] sm:$0xf]  ;;  %v4341_v16 = vld [vmem:[%s7995_s1 + $0x778] sm:$0xf0]  ;;  %v4088_v12 = vor.u32 %v5165_v3, %v4085_v2  ;;  %v4040_v3 = vor.u32 %v5153_v53, %v4037_v52 }
 0x163   : > { %3201 = vmatpush.bf16.msra.mxu3 %v3960_v15  ;;  %v4104_v58 = vor.u32 %v5169_v30, %v4101_v32  ;;  %v4344_v15 = vor.u32 %v5229_v8, %v4341_v16  ;;  %v3318_v33 = vpack.c.bf16 %v3315_v19, %v3314_v18  ;;  %v5269_v30 = vld [vmem:[%s7995_s1 + $0x8ac] sm:$0xf]  ;;  %v4501_v32 = vld [vmem:[%s7995_s1 + $0x8b8] sm:$0xf0]  ;;  %v4168_v8 = vor.u32 %v5185_v55, %v4165_v56 }
 0x164   : > { %3211 = vmatpush.bf16.msrb.mxu0 %v4136_v46  ;;  %v5193_v46 = vld [vmem:[%s7995_s1 + $0x64c] sm:$0xf]  ;;  %v2961_v23 = vpop.f32.mrf.mxu0  ;;  %v4485_v62 = vld [vmem:[%s7995_s1 + $0x898] sm:$0xf0] }
 0x165   : > { %3224 = vmatpush.bf16.msrb.mxu1 %v4264_v37  ;;  %3237 = vmatpush.bf16.msrb.mxu2 %v4392_v45  ;;  %v4536_v37 = vor.u32 %v5277_v7, %v4533_v9  ;;  %v5225_v45 = vld [vmem:[%s7995_s1 + $0x74c] sm:$0xf]  ;;  %v4200_v36 = vor.u32 %v5193_v46, %v4197_v17  ;;  %3320 = vst [vmem:[%s7726_s20] sm:$0xff] %v3318_v33  ;;  %v4789_v2 = vld [vmem:[%s7995_s1 + $0xaf8] sm:$0xf0] }
 0x166   : > { %v4328_v39 = vor.u32 %v5225_v45, %v4325_v22  ;;  %v2974_v50 = vpop.f32.mrf.mxu1  ;;  %v5265_v60 = vld [vmem:[%s7995_s1 + $0x88c] sm:$0xf]  ;;  %v4917_v5 = vld [vmem:[%s7995_s1 + $0xbf8] sm:$0xf0] }
 0x167   : > { %3202 = vmatpush.bf16.msra.mxu3 %v3944_v47  ;;  %v4053_v47 = vld [vmem:[%s7995_s1 + $0x538] sm:$0xf0]  ;;  %v5309_v63 = vld [vmem:[%s7995_s1 + $0x9ec] sm:$0xf]  ;;  %v4488_v6 = vor.u32 %v5265_v60, %v4485_v62  ;;  %v4920_v13 = vor.u32 %v5373_v4, %v4917_v5 }
 0x168   : > { %3212 = vmatpush.bf16.msrb.mxu0 %v4120_v48  ;;  %v5189_v48 = vld [vmem:[%s7995_s1 + $0x62c] sm:$0xf]  ;;  %v4056_v51 = vor.u32 %v5157_v40, %v4053_v47  ;;  %v4469_v10 = vld [vmem:[%s7995_s1 + $0x878] sm:$0xf0] }
 0x169   : > { %3225 = vmatpush.bf16.msrb.mxu1 %v4248_v49  ;;  %3238 = vmatpush.bf16.msrb.mxu2 %v4376_v34  ;;  %v5221_v49 = vld [vmem:[%s7995_s1 + $0x72c] sm:$0xf]  ;;  %v4309_v34 = vld [vmem:[%s7995_s1 + $0x738] sm:$0xf0] }
 0x16a   : > { %v4312_v54 = vor.u32 %v5221_v49, %v4309_v34  ;;  %v5261_v9 = vld [vmem:[%s7995_s1 + $0x86c] sm:$0xf]  ;;  %v4773_v46 = vld [vmem:[%s7995_s1 + $0xad8] sm:$0xf0] }
 0x16b   : > { %3203 = vmatpush.bf16.msra.mxu3 %v3928_v57  ;;  %v5217_v57 = vld [vmem:[%s7995_s1 + $0x70c] sm:$0xf]  ;;  %v4901_v18 = vld [vmem:[%s7995_s1 + $0xbd8] sm:$0xf0] }
 0x16c   : > { %3213 = vmatpush.bf16.msrb.mxu0 %v4104_v58  ;;  %v4504_v58 = vor.u32 %v5269_v30, %v4501_v32  ;;  %v4296_v16 = vor.u32 %v5217_v57, %v4293_v59  ;;  %v5337_v24 = vld [vmem:[%s7995_s1 + $0xacc] sm:$0xf]  ;;  %v4453_v23 = vld [vmem:[%s7995_s1 + $0x858] sm:$0xf0] }
 0x16d   : > { %3226 = vmatpush.bf16.msrb.mxu1 %v4232_v0  ;;  %3239 = vmatpush.bf16.msrb.mxu2 %v4360_v1  ;;  %v4661_v0 = vld [vmem:[%s7995_s1 + $0x9f8] sm:$0xf0]  ;;  %v5341_v1 = vld [vmem:[%s7995_s1 + $0xaec] sm:$0xf]  ;;  %v4776_v33 = vor.u32 %v5337_v24, %v4773_v46 }
 0x16e   : > { %v4664_v7 = vor.u32 %v5309_v63, %v4661_v0  ;;  %v5369_v17 = vld [vmem:[%s7995_s1 + $0xbcc] sm:$0xf]  ;;  %v4757_v47 = vld [vmem:[%s7995_s1 + $0xab8] sm:$0xf0] }
 0x16f   : > { %3204 = vmatpush.bf16.msra.mxu3 %v3912_v11  ;;  %v583_v11 = vperm.slane %v7384_v43, 2  ;;  %v5257_v22 = vld [vmem:[%s7995_s1 + $0x84c] sm:$0xf]  ;;  %v4437_v34 = vld [vmem:[%s7995_s1 + $0x838] sm:$0xf0] }
 0x170   : > { %3214 = vmatpush.bf16.msrb.mxu0 %v4088_v12  ;;  %v4792_v12 = vor.u32 %v5341_v1, %v4789_v2  ;;  %v5333_v40 = vld [vmem:[%s7995_s1 + $0xaac] sm:$0xf]  ;;  %v4613_v50 = vld [vmem:[%s7995_s1 + $0x998] sm:$0xf0] }
 0x171   : > { %3227 = vmatpush.bf16.msrb.mxu1 %v4216_v14  ;;  %3240 = vmatpush.bf16.msrb.mxu2 %v4344_v15  ;;  %v5305_v14 = vld [vmem:[%s7995_s1 + $0x9cc] sm:$0xf]  ;;  %v4645_v15 = vld [vmem:[%s7995_s1 + $0x9d8] sm:$0xf0]  ;;  %v4760_v30 = vor.u32 %v5333_v40, %v4757_v47 }
 0x172   : > { %3205 = vmatmul.bf16.vlgmr.msra.gmra.mxu3 %v5900_v41  ;;  %v4184_v41 = vor.u32 %v5189_v48, %v4181_v61  ;;  %v4648_v45 = vor.u32 %v5305_v14, %v4645_v15  ;;  %v5365_v48 = vld [vmem:[%s7995_s1 + $0xbac] sm:$0xf]  ;;  %v4741_v53 = vld [vmem:[%s7995_s1 + $0xa98] sm:$0xf0] }
 0x173   : > { %3249 = vmatpush.bf16.msrb.mxu3 %v4536_v37  ;;  %v2985_v19 = vpop.f32.mrf.mxu2  ;;  %v4472_v37 = vor.u32 %v5261_v9, %v4469_v10  ;;  %v5361_v52 = vld [vmem:[%s7995_s1 + $0xb8c] sm:$0xf]  ;;  %v4421_v62 = vld [vmem:[%s7995_s1 + $0x818] sm:$0xf0] }
 0x174   : > { %3215 = vmatpush.bf16.msrb.mxu0 %v4072_v35  ;;  %v2986_v20 = vadd.f32 %v2985_v19, %v583_v11  ;;  %v4904_v35 = vor.u32 %v5369_v17, %v4901_v18  ;;  %v5249_v60 = vld [vmem:[%s7995_s1 + $0x80c] sm:$0xf]  ;;  %v4597_v2 = vld [vmem:[%s7995_s1 + $0x978] sm:$0xf0] }
 0x175   : > { %3228 = vmatpush.bf16.msrb.mxu1 %v4200_v36  ;;  %3241 = vmatpush.bf16.msrb.mxu2 %v4328_v39  ;;  %v2998_v28 = vpop.f32.mrf.mxu3  ;;  %v5301_v36 = vld [vmem:[%s7995_s1 + $0x9ac] sm:$0xf]  ;;  %v4629_v39 = vld [vmem:[%s7995_s1 + $0x9b8] sm:$0xf0]  ;;  %v4424_v10 = vor.u32 %v5249_v60, %v4421_v62 }
 0x176   : > { %v2999_v61 = vadd.f32 %v2998_v28, %v2986_v20  ;;  %v4632_v49 = vor.u32 %v5301_v36, %v4629_v39  ;;  %v5325_v4 = vld [vmem:[%s7995_s1 + $0xa6c] sm:$0xf]  ;;  %v4981_v9 = vld [vmem:[%s7995_s1 + $0xc78] sm:$0xf0] }
 0x177   : > { %3250 = vmatpush.bf16.msrb.mxu3 %v4520_v31  ;;  %v4885_v31 = vld [vmem:[%s7995_s1 + $0xbb8] sm:$0xf0]  ;;  %v5289_v14 = vld [vmem:[%s7995_s1 + $0x94c] sm:$0xf] }
 0x178   : > { %3216 = vmatpush.bf16.msrb.mxu0 %v4056_v51  ;;  %v4888_v32 = vor.u32 %v5365_v48, %v4885_v31  ;;  %v5329_v51 = vld [vmem:[%s7995_s1 + $0xa8c] sm:$0xf]  ;;  %v4581_v15 = vld [vmem:[%s7995_s1 + $0x958] sm:$0xf0] }
 0x179   : > { %3229 = vmatpush.bf16.msrb.mxu1 %v4184_v41  ;;  %3242 = vmatpush.bf16.msrb.mxu2 %v4312_v54  ;;  %v4869_v41 = vld [vmem:[%s7995_s1 + $0xb98] sm:$0xf0]  ;;  %v4744_v0 = vor.u32 %v5329_v51, %v4741_v53  ;;  %v5321_v24 = vld [vmem:[%s7995_s1 + $0xa4c] sm:$0xf]  ;;  %v4584_v20 = vor.u32 %v5289_v14, %v4581_v15 }
 0x17a   : > { %v4872_v1 = vor.u32 %v5361_v52, %v4869_v41  ;;  %v4709_v17 = vld [vmem:[%s7995_s1 + $0xa58] sm:$0xf0]  ;;  %v5353_v18 = vld [vmem:[%s7995_s1 + $0xb4c] sm:$0xf] }
 0x17b   : > { %3251 = vmatpush.bf16.msrb.mxu3 %v4504_v58  ;;  %v2987_v57 = vpop.f32.mrf.mxu2  ;;  %v4837_v19 = vld [vmem:[%s7995_s1 + $0xb58] sm:$0xf0]  ;;  %v4712_v28 = vor.u32 %v5321_v24, %v4709_v17  ;;  %v5317_v39 = vld [vmem:[%s7995_s1 + $0xa2c] sm:$0xf] }
 0x17c   : > { %3217 = vmatpush.bf16.msrb.mxu0 %v4040_v3  ;;  %v3011_v54 = vpop.f32.mrf.mxu0  ;;  %v5293_v3 = vld [vmem:[%s7995_s1 + $0x96c] sm:$0xf]  ;;  %v4565_v36 = vld [vmem:[%s7995_s1 + $0x938] sm:$0xf0] }
 0x17d   : > { %3230 = vmatpush.bf16.msrb.mxu1 %v4168_v8  ;;  %3243 = vmatpush.bf16.msrb.mxu2 %v4296_v16  ;;  %v3012_v55 = vadd.f32 %v3011_v54, %v2999_v61  ;;  %v3024_v56 = vpop.f32.mrf.mxu1  ;;  %v3000_v63 = vpop.f32.mrf.mxu3  ;;  %v4725_v8 = vld [vmem:[%s7995_s1 + $0xa78] sm:$0xf0]  ;;  %v5357_v16 = vld [vmem:[%s7995_s1 + $0xb6c] sm:$0xf]  ;;  %v4600_v11 = vor.u32 %v5293_v3, %v4597_v2 }
 0x17e   : > { %v4693_v47 = vld [vmem:[%s7995_s1 + $0xa38] sm:$0xf0]  ;;  %v5349_v48 = vld [vmem:[%s7995_s1 + $0xb2c] sm:$0xf] }
 0x17f   : > { %3252 = vmatpush.bf16.msrb.mxu3 %v4488_v6  ;;  %3218 = vmatmul.bf16.vlgmr.msrb.gmra.mxu0 %v5904_v44  ;;  %v4456_v44 = vor.u32 %v5257_v22, %v4453_v23  ;;  %v7893_v5 = vadd.f32 %v3024_v56, %v3012_v55  ;;  %v4853_v6 = vld [vmem:[%s7995_s1 + $0xb78] sm:$0xf0]  ;;  %v5381_v61 = vld [vmem:[%s7995_s1 + $0xc2c] sm:$0xf] }
 0x180   : > { %3262 = vmatpush.bf16.msra.mxu0 %v4664_v7  ;;  %3244 = vmatmul.bf16.vlgmr.msrb.gmra.mxu2 %v5902_v42  ;;  %v5253_v42 = vld [vmem:[%s7995_s1 + $0x82c] sm:$0xf]  ;;  %v4965_v22 = vld [vmem:[%s7995_s1 + $0xc58] sm:$0xf0] }
 0x181   : > { %3275 = vmatpush.bf16.msra.mxu1 %v4792_v12  ;;  %3288 = vmatpush.bf16.msra.mxu2 %v4920_v13  ;;  %v4440_v58 = vor.u32 %v5253_v42, %v4437_v34  ;;  %v5389_v7 = vld [vmem:[%s7995_s1 + $0xc6c] sm:$0xf]  ;;  %v4728_v12 = vor.u32 %v5325_v4, %v4725_v8  ;;  %v4856_v13 = vor.u32 %v5357_v16, %v4853_v6  ;;  %v4821_v31 = vld [vmem:[%s7995_s1 + $0xb38] sm:$0xf0] }
 0x182   : > { %3231 = vmatmul.bf16.vlgmr.msrb.gmra.mxu1 %v5892_v38  ;;  %v5297_v38 = vld [vmem:[%s7995_s1 + $0x98c] sm:$0xf]  ;;  %v4984_v46 = vor.u32 %v5389_v7, %v4981_v9  ;;  %v4696_v42 = vor.u32 %v5317_v39, %v4693_v47  ;;  %v4824_v34 = vor.u32 %v5349_v48, %v4821_v31  ;;  %v4805_v53 = vld [vmem:[%s7995_s1 + $0xb18] sm:$0xf0] }
 0x183   : > { %3253 = vmatpush.bf16.msrb.mxu3 %v4472_v37  ;;  %v4616_v59 = vor.u32 %v5297_v38, %v4613_v50  ;;  %v4677_v50 = vld [vmem:[%s7995_s1 + $0xa18] sm:$0xf0]  ;;  %v5345_v51 = vld [vmem:[%s7995_s1 + $0xb0c] sm:$0xf] }
 0x184   : > { %3263 = vmatpush.bf16.msra.mxu0 %v4648_v45  ;;  %v3013_v37 = vpop.f32.mrf.mxu0  ;;  %v5385_v45 = vld [vmem:[%s7995_s1 + $0xc4c] sm:$0xf]  ;;  %v4933_v41 = vld [vmem:[%s7995_s1 + $0xc18] sm:$0xf0]  ;;  %v4808_v56 = vor.u32 %v5345_v51, %v4805_v53 }
 0x185   : > { %3276 = vmatpush.bf16.msra.mxu1 %v4776_v33  ;;  %3289 = vmatpush.bf16.msra.mxu2 %v4904_v35  ;;  %v3026_v23 = vpop.f32.mrf.mxu1  ;;  %v4840_v33 = vor.u32 %v5353_v18, %v4837_v19  ;;  %v5285_v35 = vld [vmem:[%s7995_s1 + $0x92c] sm:$0xf]  ;;  %v4968_v40 = vor.u32 %v5385_v45, %v4965_v22 }
 0x186   : > { %v5377_v52 = vld [vmem:[%s7995_s1 + $0xc0c] sm:$0xf] }
 0x187   : > { %3254 = vmatpush.bf16.msrb.mxu3 %v4456_v44  ;;  %v4949_v44 = vld [vmem:[%s7995_s1 + $0xc38] sm:$0xf0]  ;;  %v4936_v57 = vor.u32 %v5377_v52, %v4933_v41 }
 0x188   : > { %3264 = vmatpush.bf16.msra.mxu0 %v4632_v49  ;;  %v4568_v49 = vor.u32 %v5285_v35, %v4565_v36  ;;  %v4952_v38 = vor.u32 %v5381_v61, %v4949_v44 }
 0x189   : > { %3277 = vmatpush.bf16.msra.mxu1 %v4760_v30  ;;  %3290 = vmatpush.bf16.msra.mxu2 %v4888_v32  ;;  %v5281_v30 = vld [vmem:[%s7995_s1 + $0x90c] sm:$0xf] }
 0x18a   : > { %v5313_v32 = vld [vmem:[%s7995_s1 + $0xa0c] sm:$0xf] }
 0x18b   : > { %3255 = vmatpush.bf16.msrb.mxu3 %v4440_v58  ;;  %v4680_v55 = vor.u32 %v5313_v32, %v4677_v50 }
 0x18c   : > { %3265 = vmatpush.bf16.msra.mxu0 %v4616_v59 }
 0x18d   : > { %3278 = vmatpush.bf16.msra.mxu1 %v4744_v0  ;;  %3291 = vmatpush.bf16.msra.mxu2 %v4872_v1 }
 0x18f   : > { %3256 = vmatpush.bf16.msrb.mxu3 %v4424_v10 }
 0x190   : > { %3266 = vmatpush.bf16.msra.mxu0 %v4600_v11 }
 0x191   : > { %3279 = vmatpush.bf16.msra.mxu1 %v4728_v12  ;;  %3292 = vmatpush.bf16.msra.mxu2 %v4856_v13 }
 0x192   : > { %3257 = vmatmul.bf16.vlgmr.msrb.gmra.mxu3 %v6089_v21  ;;  %v4549_v21 = vld [vmem:[%s7995_s1 + $0x918] sm:$0xf0] }
 0x193   : > { %3305 = vmatpush.bf16.msra.mxu3 %v4984_v46  ;;  %v4552_v54 = vor.u32 %v5281_v30, %v4549_v21  ;;  %v3037_v58 = vpop.f32.mrf.mxu2 }
 0x194   : > { %3267 = vmatpush.bf16.msra.mxu0 %v4584_v20  ;;  %v3038_v59 = vadd.f32 %v3037_v58, %v7893_v5 }
 0x195   : > { %3280 = vmatpush.bf16.msra.mxu1 %v4712_v28  ;;  %3293 = vmatpush.bf16.msra.mxu2 %v4840_v33  ;;  %v3050_v60 = vpop.f32.mrf.mxu3  ;;  %v584_v28 = vperm.slane %v7384_v43, 3 }
 0x196   : > { %v3051_v62 = vadd.f32 %v3050_v60, %v3038_v59 }
 0x197   : > { %3306 = vmatpush.bf16.msra.mxu3 %v4968_v40 }
 0x198   : > { %3268 = vmatpush.bf16.msra.mxu0 %v4568_v49 }
 0x199   : > { %3281 = vmatpush.bf16.msra.mxu1 %v4696_v42  ;;  %3294 = vmatpush.bf16.msra.mxu2 %v4824_v34 }
 0x19b   : > { %3307 = vmatpush.bf16.msra.mxu3 %v4952_v38  ;;  %v3039_v3 = vpop.f32.mrf.mxu2 }
 0x19c   : > { %3269 = vmatpush.bf16.msra.mxu0 %v4552_v54  ;;  %v3063_v63 = vpop.f32.mrf.mxu0 }
 0x19d   : > { %3282 = vmatpush.bf16.msra.mxu1 %v4680_v55  ;;  %3295 = vmatpush.bf16.msra.mxu2 %v4808_v56  ;;  %v3064_v0 = vadd.f32 %v3063_v63, %v3051_v62  ;;  %v3076_v1 = vpop.f32.mrf.mxu1  ;;  %v3052_v2 = vpop.f32.mrf.mxu3 }
 0x19f   : > { %3308 = vmatpush.bf16.msra.mxu3 %v4936_v57  ;;  %3270 = vmatmul.bf16.vlgmr.msra.gmra.mxu0 %v6102_v26  ;;  %v3077_v4 = vadd.f32 %v3076_v1, %v3064_v0 }
 0x1a0   : > { %3283 = vmatmul.bf16.vlgmr.msra.gmra.mxu1 %v6100_v25  ;;  %3296 = vmatmul.bf16.vlgmr.msra.gmra.mxu2 %v6110_v29 }
 0x1a2   : > { %4988 = vmatmul.msk.bf16.vlgmr.msra.gmra.mxu3 %vm2634_vm0, %v6210_v27 }
 0x1a4   : > { %v3065_v8 = vpop.f32.mrf.mxu0 }
 0x1a5   : > { %v3078_v16 = vpop.f32.mrf.mxu1 }
 0x1b3   : > { %v3089_v5 = vpop.f32.mrf.mxu2 }
 0x1b4   : > { %v3090_v6 = vadd.f32 %v3089_v5, %v3077_v4 }
 0x1b5   : > { %v3102_v7 = vpop.f32.mrf.mxu3 }
 0x1b6   : > { %v3103_v26 = vadd.f32 %v3102_v7, %v3090_v6 }
 0x1bb   : > { %v3091_v25 = vpop.f32.mrf.mxu2 }
 0x1bc   : > { %v3115_v9 = vpop.f32.mrf.mxu0 }
 0x1bd   : > { %v3116_v10 = vadd.f32 %v3115_v9, %v3103_v26  ;;  %v3128_v29 = vpop.f32.mrf.mxu1  ;;  %v3104_v11 = vpop.f32.mrf.mxu3 }
 0x1bf   : > { %v3129_v12 = vadd.f32 %v3128_v29, %v3116_v10 }
 0x1c4   : > { %v3117_v13 = vpop.f32.mrf.mxu0 }
 0x1c5   : > { %v3130_v27 = vpop.f32.mrf.mxu1  ;;  %v3141_v14 = vpop.f32.mrf.mxu2 }
 0x1c6   : > { %v3142_v15 = vadd.f32 %v3141_v14, %v3129_v12 }
 0x1c8   : > { %v3316_v59 = vmax.f32 %v3142_v15, 0.0 }
 0x1cd   : > { %v3143_v24 = vpop.f32.mrf.mxu2 }
 0x1d5   : > { %v3154_v46 = vpop.f32.mrf.mxu3 }
 0x1d6   : > { %v3155_v35 = vadd.f32 %v3154_v46, %v584_v28 }
 0x1dc   : > { %v3167_v17 = vpop.f32.mrf.mxu0 }
 0x1dd   : > { %v3156_v19 = vpop.f32.mrf.mxu3  ;;  %v3168_v40 = vadd.f32 %v3167_v17, %v3155_v35 }
 0x1df   : > { %v3180_v18 = vpop.f32.mrf.mxu1 }
 0x1e0   : > { %v3181_v31 = vadd.f32 %v3180_v18, %v3168_v40 }
 0x1e3   : > { %v3193_v37 = vpop.f32.mrf.mxu2 }
 0x1e4   : > { %v3169_v45 = vpop.f32.mrf.mxu0  ;;  %v3194_v44 = vadd.f32 %v3193_v37, %v3181_v31 }
 0x1e7   : > { %v3182_v22 = vpop.f32.mrf.mxu1 }
 0x1eb   : > { %v3195_v23 = vpop.f32.mrf.mxu2 }
 0x1f5   : > { %v3206_v20 = vpop.f32.mrf.mxu3 }
 0x1f6   : > { %v3207_v42 = vadd.f32 %v3206_v20, %v3194_v44 }
 0x1fc   : > { %v3219_v33 = vpop.f32.mrf.mxu0 }
 0x1fd   : > { %v3208_v39 = vpop.f32.mrf.mxu3  ;;  %v3220_v34 = vadd.f32 %v3219_v33, %v3207_v42 }
 0x1ff   : > { %v3232_v36 = vpop.f32.mrf.mxu1 }
 0x200   : > { %v3233_v21 = vadd.f32 %v3232_v36, %v3220_v34 }
 0x203   : > { %v3245_v47 = vpop.f32.mrf.mxu2 }
 0x204   : > { %v3221_v48 = vpop.f32.mrf.mxu0  ;;  %v3246_v32 = vadd.f32 %v3245_v47, %v3233_v21 }
 0x207   : > { %v3234_v61 = vpop.f32.mrf.mxu1 }
 0x20b   : > { %v3247_v49 = vpop.f32.mrf.mxu2 }
 0x215   : > { %v3258_v30 = vpop.f32.mrf.mxu3 }
 0x216   : > { %v3259_v38 = vadd.f32 %v3258_v30, %v3246_v32 }
 0x21c   : > { %v3271_v50 = vpop.f32.mrf.mxu0 }
 0x21d   : > { %v3284_v43 = vpop.f32.mrf.mxu1  ;;  %v3272_v51 = vadd.f32 %v3271_v50, %v3259_v38  ;;  %v3260_v53 = vpop.f32.mrf.mxu3 }
 0x21f   : > { %v3285_v52 = vadd.f32 %v3284_v43, %v3272_v51 }
 0x223   : > { %v3297_v41 = vpop.f32.mrf.mxu2 }
 0x224   : > { %v3298_v54 = vadd.f32 %v3297_v41, %v3285_v52  ;;  %v3273_v55 = vpop.f32.mrf.mxu0 }
 0x225   : > { %v3286_v56 = vpop.f32.mrf.mxu1  ;;  %v3310_v57 = vpop.f32.mrf.mxu3 }
 0x226   : > { %v3311_v58 = vadd.f32 %v3310_v57, %v3298_v54 }
 0x228   : > { %v3317_v60 = vmax.f32 %v3311_v58, 0.0 }
 0x22a   : > { %v3319_v62 = vpack.c.bf16 %v3317_v60, %v3316_v59 }
 0x22b   : > { %v3299_v63 = vpop.f32.mrf.mxu2 }
 0x22c   : > { %3321 = vst [vmem:[%s7726_s20 + $0x8] sm:$0xff] %v3319_v62 }
 0x22d   : > { %v3312_v0 = vpop.f32.mrf.mxu3 }
 0x22e PF: > { %s13_s12 = sadd.s32 1, %s5408_s12  }
 0x22f   : > { %p10_p4 = scmp.ge.s32.totalorder %s13_s12, 4  }
 0x231   :  { %12 = sbr.rel (!%p10_p4) target bundleno = 1 (0x1), region = 62 }

// kernel: cnn_forward.7
= control target key start
LH: loop header
LB: loop body
LE: loop exit
PB: predicated region body
PF: predicated region fallthrough
CT: control target
= control target key end

     0   :  { %s855_s0 = inlined_call_operand.vmem [shape: bf16[2,512], index: 0, kind: input, shape index: {}]   ;;  %s856_s1 = inlined_call_operand.vmem [shape: bf16[512,64], index: 1, kind: input, shape index: {}]   ;;  %s857_s2 = inlined_call_operand.vmem [shape: f32[1,64], index: 2, kind: input, shape index: {}]   ;;  %s858_s3 = inlined_call_operand.vmem [shape: bf16[64,32], index: 3, kind: input, shape index: {}]   ;;  %s859_s4 = inlined_call_operand.vmem [shape: f32[1,32], index: 4, kind: input, shape index: {}]   ;;  %s860_s5 = inlined_call_operand.vmem [shape: bf16[32,5], index: 5, kind: input, shape index: {}]   ;;  %s861_s6 = inlined_call_operand.vmem [shape: f32[1,5], index: 6, kind: input, shape index: {}]   ;;  %s862_s7 = inlined_call_operand.hbm [shape: f32[2,5], index: 7, kind: output, shape index: {}]  }
   0x1   :  { %v624_v0 = vld [vmem:[%s856_s1 + $0x38] sm:$0xff]  ;;  %v623_v4 = vld [vmem:[%s856_s1 + $0x30] sm:$0xff]  ;;  %v622_v8 = vld [vmem:[%s856_s1 + $0x28] sm:$0xff] }
   0x2   :  { %v632_v1 = vld [vmem:[%s856_s1 + $0x78] sm:$0xff]  ;;  %299 = vmatpush.bf16.msra.mxu0 %v624_v0  ;;  %v631_v5 = vld [vmem:[%s856_s1 + $0x70] sm:$0xff]  ;;  %v630_v9 = vld [vmem:[%s856_s1 + $0x68] sm:$0xff] }
   0x3   :  { %v640_v2 = vld [vmem:[%s856_s1 + $0xb8] sm:$0xff]  ;;  %312 = vmatpush.bf16.msra.mxu1 %v632_v1  ;;  %v639_v6 = vld [vmem:[%s856_s1 + $0xb0] sm:$0xff]  ;;  %v638_v10 = vld [vmem:[%s856_s1 + $0xa8] sm:$0xff] }
   0x4   :  { %v648_v3 = vld [vmem:[%s856_s1 + $0xf8] sm:$0xff]  ;;  %325 = vmatpush.bf16.msra.mxu2 %v640_v2  ;;  %v647_v7 = vld [vmem:[%s856_s1 + $0xf0] sm:$0xff]  ;;  %v646_v11 = vld [vmem:[%s856_s1 + $0xe8] sm:$0xff] }
   0x5   :  { %338 = vmatpush.bf16.msra.mxu3 %v648_v3  ;;  %v621_v12 = vld [vmem:[%s856_s1 + $0x20] sm:$0xff] }
   0x6   :  { %300 = vmatpush.bf16.msra.mxu0 %v623_v4  ;;  %v629_v13 = vld [vmem:[%s856_s1 + $0x60] sm:$0xff] }
   0x7   :  { %313 = vmatpush.bf16.msra.mxu1 %v631_v5  ;;  %v28_v14 = vld [vmem:[%s855_s0] sm:$0xf] }
   0x8   :  { %326 = vmatpush.bf16.msra.mxu2 %v639_v6  ;;  %v637_v15 = vld [vmem:[%s856_s1 + $0xa0] sm:$0xff]  ;;  %98 = vst [vmem:[#allocation1] ss:$9 sm:$0xff] %v28_v14 }
   0x9   :  { %339 = vmatpush.bf16.msra.mxu3 %v647_v7  ;;  %v645_v16 = vld [vmem:[%s856_s1 + $0xe0] sm:$0xff] }
   0xa   :  { %301 = vmatpush.bf16.msra.mxu0 %v622_v8 }
   0xb   :  { %314 = vmatpush.bf16.msra.mxu1 %v630_v9 }
   0xc   :  { %327 = vmatpush.bf16.msra.mxu2 %v638_v10 }
   0xd   :  { %340 = vmatpush.bf16.msra.mxu3 %v646_v11 }
   0xe   :  { %12 = vsyncpa [#allocation3], 0  ;;  %302 = vmatpush.bf16.msra.mxu0 %v621_v12  ;;  %v620_v17 = vld [vmem:[%s856_s1 + $0x18] sm:$0xff]  ;;  %v619_v21 = vld [vmem:[%s856_s1 + $0x10] sm:$0xff]  ;;  %vm389_vm0 = vcmask 523264   ;;  %vm428_vm1 = vcmask 261120  }
   0xf   :  { %315 = vmatpush.bf16.msra.mxu1 %v629_v13  ;;  %v628_v18 = vld [vmem:[%s856_s1 + $0x58] sm:$0xff]  ;;  %v627_v22 = vld [vmem:[%s856_s1 + $0x50] sm:$0xff]  ;;  %v618_v25 = vld [vmem:[%s856_s1 + $0x8] sm:$0xff]  ;;  %s685_s10 = smov [#allocation2]   ;;  %s454_s14 = sshll.u32 %s862_s7, 4  ;;  %vm445_vm2 = vcmask 33792   ;;  %s455_s14 = int_to_ptr.hbm [resolvable:$true] %s454_s14 }
  0x10   :  { %328 = vmatpush.bf16.msra.mxu2 %v637_v15  ;;  %v636_v19 = vld [vmem:[%s856_s1 + $0x98] sm:$0xff]  ;;  %v635_v23 = vld [vmem:[%s856_s1 + $0x90] sm:$0xff]  ;;  %v626_v26 = vld [vmem:[%s856_s1 + $0x48] sm:$0xff]  ;;  %s452_s11 = sshll.u32 %s685_s10, 4  ;;  %s453_s11 = int_to_ptr.vmem [resolvable:$true] %s452_s11 }
  0x11   :  { %341 = vmatpush.bf16.msra.mxu3 %v645_v16  ;;  %v644_v20 = vld [vmem:[%s856_s1 + $0xd8] sm:$0xff]  ;;  %v643_v24 = vld [vmem:[%s856_s1 + $0xd0] sm:$0xff]  ;;  %v634_v27 = vld [vmem:[%s856_s1 + $0x88] sm:$0xff] }
  0x12   :  { %303 = vmatpush.bf16.msra.mxu0 %v620_v17  ;;  %v642_v28 = vld [vmem:[%s856_s1 + $0xc8] sm:$0xff]  ;;  %v617_v29 = vld [vmem:[%s856_s1] sm:$0xff]  ;;  %v652_v33 = vld [vmem:[%s858_s3 + $0x18] sm:$0xff] }
  0x13   :  { %316 = vmatpush.bf16.msra.mxu1 %v628_v18  ;;  %v625_v30 = vld [vmem:[%s856_s1 + $0x40] sm:$0xff]  ;;  %v100_v35 = vld [vmem:[#allocation1 + $0x9] sm:$0xff]  ;;  %v101_v36 = vld [vmem:[#allocation1 + $0x12] sm:$0xff] }
  0x14   :  { %329 = vmatpush.bf16.msra.mxu2 %v636_v19  ;;  %v633_v31 = vld [vmem:[%s856_s1 + $0x80] sm:$0xff]  ;;  %v651_v38 = vld [vmem:[%s858_s3 + $0x10] sm:$0xff]  ;;  %v650_v39 = vld [vmem:[%s858_s3 + $0x8] sm:$0xff] }
  0x15   :  { %342 = vmatpush.bf16.msra.mxu3 %v644_v20  ;;  %v641_v32 = vld [vmem:[%s856_s1 + $0xc0] sm:$0xff]  ;;  %v654_v41 = vld [vmem:[%s860_s5 + $0x8] sm:$0xff] }
  0x16   :  { %304 = vmatpush.bf16.msra.mxu0 %v619_v21  ;;  %v99_v34 = vld [vmem:[#allocation1] sm:$0xff] }
  0x17   :  { %317 = vmatpush.bf16.msra.mxu1 %v627_v22  ;;  %v102_v37 = vld [vmem:[#allocation1 + $0x1b] sm:$0xff] }
  0x18   :  { %330 = vmatpush.bf16.msra.mxu2 %v635_v23  ;;  %v649_v40 = vld [vmem:[%s858_s3] sm:$0xff] }
  0x19   :  { %343 = vmatpush.bf16.msra.mxu3 %v643_v24  ;;  %v653_v42 = vld [vmem:[%s860_s5] sm:$0xff] }
  0x1a   :  { %305 = vmatpush.bf16.msra.mxu0 %v618_v25  ;;  %v656_v43 = vld [vmem:[%s857_s2] ss:$0 sm:$0xff] }
  0x1b   :  { %318 = vmatpush.bf16.msra.mxu1 %v626_v26  ;;  %v657_v58 = vld [vmem:[%s859_s4] ss:$0 sm:$0xff] }
  0x1c   :  { %331 = vmatpush.bf16.msra.mxu2 %v634_v27  ;;  %v658_v0 = vld [vmem:[%s861_s6] ss:$0 sm:$0xff] }
  0x1d   :  { %344 = vmatpush.bf16.msra.mxu3 %v642_v28 }
  0x1e   :  { %306 = vmatpush.bf16.msra.mxu0 %v617_v29 }
  0x1f   :  { %319 = vmatpush.bf16.msra.mxu1 %v625_v30 }
  0x20   :  { %332 = vmatpush.bf16.msra.mxu2 %v633_v31 }
  0x21   :  { %345 = vmatpush.bf16.msra.mxu3 %v641_v32  ;;  %307 = vmatmul.bf16.vlgmr.msra.gmra.mxu0 %v99_v34 }
  0x22   :  { %397 = vmatpush.bf16.msrb.mxu0 %v652_v33  ;;  %320 = vmatmul.bf16.vlgmr.msra.gmra.mxu1 %v100_v35 }
  0x23   :  { %333 = vmatmul.bf16.vlgmr.msra.gmra.mxu2 %v101_v36  ;;  %438 = vmatpush.bf16.msrb.mxu1 %v654_v41 }
  0x24   :  { %346 = vmatmul.bf16.vlgmr.msra.gmra.mxu3 %v102_v37 }
  0x26   :  { %398 = vmatpush.bf16.msrb.mxu0 %v651_v38 }
  0x27   :  { %439 = vmatpush.bf16.msrb.mxu1 %v653_v42 }
  0x2a   :  { %399 = vmatpush.bf16.msrb.mxu0 %v650_v39 }
  0x2e   :  { %400 = vmatpush.bf16.msrb.mxu0 %v649_v40 }
  0x9e   :  { %v308_v44 = vpop.f32.mrf.mxu0 }
  0x9f   :  { %v321_v45 = vpop.f32.mrf.mxu1  ;;  %v309_v46 = vadd.f32 %v656_v43, %v308_v44 }
  0xa1   :  { %v322_v47 = vadd.f32 %v321_v45, %v309_v46 }
  0xa6   :  { %v334_v48 = vpop.f32.mrf.mxu2  ;;  %v310_v51 = vpop.f32.mrf.mxu0 }
  0xa7   :  { %v347_v49 = vpop.f32.mrf.mxu3  ;;  %v335_v50 = vadd.f32 %v334_v48, %v322_v47  ;;  %v323_v52 = vpop.f32.mrf.mxu1 }
  0xa9   :  { %v348_v53 = vadd.f32 %v347_v49, %v335_v50 }
  0xab   :  { %v351_v54 = vmax.f32 %v348_v53, 0.0 }
  0xad   :  { %v352_v55 = vpack.c.bf16 %v351_v54, %v351_v54 }
  0xae   :  { %v336_v56 = vpop.f32.mrf.mxu2 }
  0xaf   :  { %v349_v57 = vpop.f32.mrf.mxu3  ;;  %607 = vmatmul.msk.bf16.vlgmr.msrb.gmra.mxu0 %vm389_vm0, %v352_v55 }
 0x12c   :  { %v402_v59 = vpop.f32.mrf.mxu0 }
 0x12d   :  { %v403_v60 = vadd.f32 %v657_v58, %v402_v59 }
 0x12f   :  { %v406_v61 = vmax.f32 %v403_v60, 0.0 }
 0x131   :  { %v407_v62 = vpack.c.bf16 %v406_v61, %v406_v61 }
 0x133   :  { %616 = vmatmul.msk.bf16.vlgmr.msrb.gmra.mxu1 %vm428_vm1, %v407_v62 }
 0x134   :  { %v404_v63 = vpop.f32.mrf.mxu0 }
 0x1b0   :  { %v441_v1 = vpop.f32.mrf.mxu1 }
 0x1b1   :  { %v442_v2 = vadd.f32 %v658_v0, %v441_v1 }
 0x1b3   :  { %446 = vst.msk [vmem:[#allocation2] sm:$0x3] %vm445_vm2, %v442_v2 }
 0x1b4   :  { %457 = dma.vmem_to_hbm [thread:$0]  %s453_s11, 32, %s455_s14, [#allocation3]  }
 0x1b8   :  { %v443_v3 = vpop.f32.mrf.mxu1 }
 0x1b9   :  { %683 = dma.done.wait [#allocation3], 32  }
 0x1ba   :  { %684 = vsyncadd [#allocation3], 4294967264 }
 0x1bb   :  { %462 = vsyncpa [#allocation3], 1 }

// kernel: cnn_forward.6
= control target key start
LH: loop header
LB: loop body
LE: loop exit
PB: predicated region body
PF: predicated region fallthrough
CT: control target
= control target key end

     0   :  { %s4450_s1 = inlined_call_operand.vmem [shape: bf16[3840,128], index: 1, kind: input, shape index: {}]   ;;  %s4451_s0 = inlined_call_operand.vmem [shape: bf16[8,3840], index: 0, kind: input, shape index: {}]   ;;  %s4452_s2 = inlined_call_operand.vmem [shape: f32[1,128], index: 2, kind: input, shape index: {}]   ;;  %s4453_s3 = inlined_call_operand.vmem [shape: bf16[8,128], index: 3, kind: output, shape index: {}]  }
   0x1   :  { %v3422_v0 = vld [vmem:[%s4450_s1 + $0x38] sm:$0xff]  ;;  %v3421_v4 = vld [vmem:[%s4450_s1 + $0x30] sm:$0xff]  ;;  %v3420_v8 = vld [vmem:[%s4450_s1 + $0x28] sm:$0xff] }
   0x2   :  { %v3430_v1 = vld [vmem:[%s4450_s1 + $0x78] sm:$0xff]  ;;  %2058 = vmatpush.bf16.msra.mxu0 %v3422_v0  ;;  %v3429_v5 = vld [vmem:[%s4450_s1 + $0x70] sm:$0xff]  ;;  %v3428_v9 = vld [vmem:[%s4450_s1 + $0x68] sm:$0xff] }
   0x3   :  { %v3438_v2 = vld [vmem:[%s4450_s1 + $0xb8] sm:$0xff]  ;;  %2071 = vmatpush.bf16.msra.mxu1 %v3430_v1  ;;  %v3437_v6 = vld [vmem:[%s4450_s1 + $0xb0] sm:$0xff]  ;;  %v3436_v10 = vld [vmem:[%s4450_s1 + $0xa8] sm:$0xff] }
   0x4   :  { %v3446_v3 = vld [vmem:[%s4450_s1 + $0xf8] sm:$0xff]  ;;  %2084 = vmatpush.bf16.msra.mxu2 %v3438_v2  ;;  %v3445_v7 = vld [vmem:[%s4450_s1 + $0xf0] sm:$0xff]  ;;  %v3444_v11 = vld [vmem:[%s4450_s1 + $0xe8] sm:$0xff] }
   0x5   :  { %2097 = vmatpush.bf16.msra.mxu3 %v3446_v3  ;;  %v3419_v12 = vld [vmem:[%s4450_s1 + $0x20] sm:$0xff]  ;;  %v3418_v16 = vld [vmem:[%s4450_s1 + $0x18] sm:$0xff]  ;;  %v3417_v20 = vld [vmem:[%s4450_s1 + $0x10] sm:$0xff] }
   0x6   :  { %2059 = vmatpush.bf16.msra.mxu0 %v3421_v4  ;;  %v3427_v13 = vld [vmem:[%s4450_s1 + $0x60] sm:$0xff]  ;;  %v3426_v17 = vld [vmem:[%s4450_s1 + $0x58] sm:$0xff]  ;;  %v3425_v21 = vld [vmem:[%s4450_s1 + $0x50] sm:$0xff] }
   0x7   :  { %2072 = vmatpush.bf16.msra.mxu1 %v3429_v5  ;;  %v3435_v14 = vld [vmem:[%s4450_s1 + $0xa0] sm:$0xff]  ;;  %v3434_v18 = vld [vmem:[%s4450_s1 + $0x98] sm:$0xff]  ;;  %v3433_v22 = vld [vmem:[%s4450_s1 + $0x90] sm:$0xff] }
   0x8   :  { %2085 = vmatpush.bf16.msra.mxu2 %v3437_v6  ;;  %v3443_v15 = vld [vmem:[%s4450_s1 + $0xe0] sm:$0xff]  ;;  %v3442_v19 = vld [vmem:[%s4450_s1 + $0xd8] sm:$0xff]  ;;  %v3441_v23 = vld [vmem:[%s4450_s1 + $0xd0] sm:$0xff] }
   0x9   :  { %2098 = vmatpush.bf16.msra.mxu3 %v3445_v7  ;;  %v3416_v24 = vld [vmem:[%s4450_s1 + $0x8] sm:$0xff]  ;;  %v14_v26 = vld [vmem:[%s4451_s0] sm:$0xff]  ;;  %v3454_v35 = vld [vmem:[%s4450_s1 + $0x138] sm:$0xff] }
   0xa   :  { %2060 = vmatpush.bf16.msra.mxu0 %v3420_v8  ;;  %v3424_v25 = vld [vmem:[%s4450_s1 + $0x48] sm:$0xff]  ;;  %v528_v30 = vunpack.c.l.b16 %v14_v26  ;;  %v3415_v31 = vld [vmem:[%s4450_s1] sm:$0xff]  ;;  %v529_v36 = vunpack.c.h.b16 %v14_v26  ;;  %v3462_v37 = vld [vmem:[%s4450_s1 + $0x178] sm:$0xff] }
   0xb   :  { %2073 = vmatpush.bf16.msra.mxu1 %v3428_v9  ;;  %v3432_v27 = vld [vmem:[%s4450_s1 + $0x88] sm:$0xff]  ;;  %v3423_v32 = vld [vmem:[%s4450_s1 + $0x40] sm:$0xff]  ;;  %v3470_v38 = vld [vmem:[%s4450_s1 + $0x1b8] sm:$0xff] }
   0xc   :  { %2086 = vmatpush.bf16.msra.mxu2 %v3436_v10  ;;  %v3440_v28 = vld [vmem:[%s4450_s1 + $0xc8] sm:$0xff]  ;;  %v3431_v34 = vld [vmem:[%s4450_s1 + $0x80] sm:$0xff]  ;;  %v558_v40 = vpack.c.b16 %v528_v30, %v528_v30  ;;  %v3478_v42 = vld [vmem:[%s4450_s1 + $0x1f8] sm:$0xff]  ;;  %v559_v45 = vpack.c.b16 %v529_v36, %v529_v36 }
   0xd   :  { %2099 = vmatpush.bf16.msra.mxu3 %v3444_v11  ;;  %v15_v29 = vld [vmem:[%s4451_s0 + $0x8] sm:$0xff]  ;;  %v3439_v39 = vld [vmem:[%s4450_s1 + $0xc0] sm:$0xff]  ;;  %v3453_v44 = vld [vmem:[%s4450_s1 + $0x130] sm:$0xff] }
   0xe   :  { %2061 = vmatpush.bf16.msra.mxu0 %v3419_v12  ;;  %v530_v33 = vunpack.c.l.b16 %v15_v29  ;;  %v531_v41 = vunpack.c.h.b16 %v15_v29  ;;  %v3461_v46 = vld [vmem:[%s4450_s1 + $0x170] sm:$0xff]  ;;  %v3452_v50 = vld [vmem:[%s4450_s1 + $0x128] sm:$0xff]  ;;  %v3451_v54 = vld [vmem:[%s4450_s1 + $0x120] sm:$0xff] }
   0xf   :  { %2074 = vmatpush.bf16.msra.mxu1 %v3427_v13  ;;  %v3469_v47 = vld [vmem:[%s4450_s1 + $0x1b0] sm:$0xff]  ;;  %v3460_v51 = vld [vmem:[%s4450_s1 + $0x168] sm:$0xff]  ;;  %v3459_v55 = vld [vmem:[%s4450_s1 + $0x160] sm:$0xff] }
  0x10   :  { %2087 = vmatpush.bf16.msra.mxu2 %v3435_v14  ;;  %v560_v43 = vpack.c.b16 %v530_v33, %v530_v33  ;;  %v561_v48 = vpack.c.b16 %v531_v41, %v531_v41  ;;  %v3477_v49 = vld [vmem:[%s4450_s1 + $0x1f0] sm:$0xff]  ;;  %v3468_v52 = vld [vmem:[%s4450_s1 + $0x1a8] sm:$0xff]  ;;  %v3467_v56 = vld [vmem:[%s4450_s1 + $0x1a0] sm:$0xff] }
  0x11   :  { %2100 = vmatpush.bf16.msra.mxu3 %v3443_v15  ;;  %v3476_v53 = vld [vmem:[%s4450_s1 + $0x1e8] sm:$0xff]  ;;  %v3475_v57 = vld [vmem:[%s4450_s1 + $0x1e0] sm:$0xff]  ;;  %v3450_v58 = vld [vmem:[%s4450_s1 + $0x118] sm:$0xff] }
  0x12   :  { %2062 = vmatpush.bf16.msra.mxu0 %v3418_v16  ;;  %v3458_v59 = vld [vmem:[%s4450_s1 + $0x158] sm:$0xff]  ;;  %v3449_v62 = vld [vmem:[%s4450_s1 + $0x110] sm:$0xff]  ;;  %v3448_v2 = vld [vmem:[%s4450_s1 + $0x108] sm:$0xff] }
  0x13   :  { %2075 = vmatpush.bf16.msra.mxu1 %v3426_v17  ;;  %v3466_v60 = vld [vmem:[%s4450_s1 + $0x198] sm:$0xff]  ;;  %v3457_v63 = vld [vmem:[%s4450_s1 + $0x150] sm:$0xff]  ;;  %v3456_v3 = vld [vmem:[%s4450_s1 + $0x148] sm:$0xff] }
  0x14   :  { %2088 = vmatpush.bf16.msra.mxu2 %v3434_v18  ;;  %v3474_v61 = vld [vmem:[%s4450_s1 + $0x1d8] sm:$0xff]  ;;  %v3465_v0 = vld [vmem:[%s4450_s1 + $0x190] sm:$0xff]  ;;  %v3464_v4 = vld [vmem:[%s4450_s1 + $0x188] sm:$0xff] }
  0x15   :  { %2101 = vmatpush.bf16.msra.mxu3 %v3442_v19  ;;  %v3473_v1 = vld [vmem:[%s4450_s1 + $0x1d0] sm:$0xff]  ;;  %v17_v5 = vld [vmem:[%s4451_s0 + $0x18] sm:$0xff]  ;;  %v3472_v7 = vld [vmem:[%s4450_s1 + $0x1c8] sm:$0xff] }
  0x16   :  { %2063 = vmatpush.bf16.msra.mxu0 %v3417_v20  ;;  %v16_v6 = vld [vmem:[%s4451_s0 + $0x10] sm:$0xff]  ;;  %v3447_v8 = vld [vmem:[%s4450_s1 + $0x100] sm:$0xff]  ;;  %v534_v9 = vunpack.c.l.b16 %v17_v5  ;;  %v3486_v14 = vld [vmem:[%s4450_s1 + $0x238] sm:$0xff]  ;;  %v535_v18 = vunpack.c.h.b16 %v17_v5 }
  0x17   :  { %2076 = vmatpush.bf16.msra.mxu1 %v3425_v21  ;;  %v3455_v10 = vld [vmem:[%s4450_s1 + $0x140] sm:$0xff]  ;;  %v532_v12 = vunpack.c.l.b16 %v16_v6  ;;  %v533_v13 = vunpack.c.h.b16 %v16_v6  ;;  %v3494_v15 = vld [vmem:[%s4450_s1 + $0x278] sm:$0xff]  ;;  %v3492_v29 = vld [vmem:[%s4450_s1 + $0x268] sm:$0xff] }
  0x18   :  { %2089 = vmatpush.bf16.msra.mxu2 %v3433_v22  ;;  %v3463_v11 = vld [vmem:[%s4450_s1 + $0x180] sm:$0xff]  ;;  %v3502_v16 = vld [vmem:[%s4450_s1 + $0x2b8] sm:$0xff]  ;;  %v564_v20 = vpack.c.b16 %v534_v9, %v534_v9  ;;  %v565_v26 = vpack.c.b16 %v535_v18, %v535_v18  ;;  %v3500_v30 = vld [vmem:[%s4450_s1 + $0x2a8] sm:$0xff] }
  0x19   :  { %2102 = vmatpush.bf16.msra.mxu3 %v3441_v23  ;;  %v3471_v17 = vld [vmem:[%s4450_s1 + $0x1c0] sm:$0xff]  ;;  %v3510_v19 = vld [vmem:[%s4450_s1 + $0x2f8] sm:$0xff]  ;;  %v562_v21 = vpack.c.b16 %v532_v12, %v532_v12  ;;  %v563_v22 = vpack.c.b16 %v533_v13, %v533_v13  ;;  %v3485_v23 = vld [vmem:[%s4450_s1 + $0x230] sm:$0xff] }
  0x1a   :  { %2064 = vmatpush.bf16.msra.mxu0 %v3416_v24  ;;  %v3493_v24 = vld [vmem:[%s4450_s1 + $0x270] sm:$0xff]  ;;  %v3491_v33 = vld [vmem:[%s4450_s1 + $0x260] sm:$0xff]  ;;  %v3482_v36 = vld [vmem:[%s4450_s1 + $0x218] sm:$0xff] }
  0x1b   :  { %2077 = vmatpush.bf16.msra.mxu1 %v3424_v25  ;;  %v3501_v25 = vld [vmem:[%s4450_s1 + $0x2b0] sm:$0xff]  ;;  %v3516_v6 = vld [vmem:[%s4450_s1 + $0x328] sm:$0xff]  ;;  %v3531_v12 = vld [vmem:[%s4450_s1 + $0x3a0] sm:$0xff] }
  0x1c   :  { %2090 = vmatpush.bf16.msra.mxu2 %v3432_v27  ;;  %v3509_v27 = vld [vmem:[%s4450_s1 + $0x2f0] sm:$0xff]  ;;  %v3540_v9 = vld [vmem:[%s4450_s1 + $0x3e8] sm:$0xff]  ;;  %v3539_v13 = vld [vmem:[%s4450_s1 + $0x3e0] sm:$0xff] }
  0x1d   :  { %2103 = vmatpush.bf16.msra.mxu3 %v3440_v28  ;;  %v3484_v28 = vld [vmem:[%s4450_s1 + $0x228] sm:$0xff]  ;;  %v3489_v41 = vld [vmem:[%s4450_s1 + $0x250] sm:$0xff] }
  0x1e   :  { %2065 = vmatpush.bf16.msra.mxu0 %v3415_v31  ;;  %v3508_v31 = vld [vmem:[%s4450_s1 + $0x2e8] sm:$0xff]  ;;  %v3541_v5 = vld [vmem:[%s4450_s1 + $0x3f0] sm:$0xff] }
  0x1f   :  { %2078 = vmatpush.bf16.msra.mxu1 %v3423_v32  ;;  %v3483_v32 = vld [vmem:[%s4450_s1 + $0x220] sm:$0xff]  ;;  %v3513_v18 = vld [vmem:[%s4450_s1 + $0x310] sm:$0xff] }
  0x20   :  { %2091 = vmatpush.bf16.msra.mxu2 %v3431_v34  ;;  %v3499_v34 = vld [vmem:[%s4450_s1 + $0x2a0] sm:$0xff] }
  0x21   :  { %2104 = vmatpush.bf16.msra.mxu3 %v3439_v39  ;;  %2066 = vmatmul.bf16.vlgmr.msra.gmra.mxu0 %v558_v40  ;;  %v3506_v39 = vld [vmem:[%s4450_s1 + $0x2d8] sm:$0xff]  ;;  %v3481_v40 = vld [vmem:[%s4450_s1 + $0x210] sm:$0xff] }
  0x22   :  { %2110 = vmatpush.bf16.msrb.mxu0 %v3454_v35  ;;  %2079 = vmatmul.bf16.vlgmr.msra.gmra.mxu1 %v559_v45  ;;  %v3507_v35 = vld [vmem:[%s4450_s1 + $0x2e0] sm:$0xff]  ;;  %v3488_v45 = vld [vmem:[%s4450_s1 + $0x248] sm:$0xff] }
  0x23   :  { %2123 = vmatpush.bf16.msrb.mxu1 %v3462_v37  ;;  %2092 = vmatmul.bf16.vlgmr.msra.gmra.mxu2 %v560_v43  ;;  %v3490_v37 = vld [vmem:[%s4450_s1 + $0x258] sm:$0xff]  ;;  %v3505_v43 = vld [vmem:[%s4450_s1 + $0x2d0] sm:$0xff] }
  0x24   :  { %2136 = vmatpush.bf16.msrb.mxu2 %v3470_v38  ;;  %2105 = vmatmul.bf16.vlgmr.msra.gmra.mxu3 %v561_v48  ;;  %v3498_v38 = vld [vmem:[%s4450_s1 + $0x298] sm:$0xff]  ;;  %v19_v48 = vld [vmem:[%s4451_s0 + $0x28] sm:$0xff] }
  0x25   :  { %2149 = vmatpush.bf16.msrb.mxu3 %v3478_v42  ;;  %v3497_v42 = vld [vmem:[%s4450_s1 + $0x290] sm:$0xff] }
  0x26   :  { %2111 = vmatpush.bf16.msrb.mxu0 %v3453_v44  ;;  %v3480_v44 = vld [vmem:[%s4450_s1 + $0x208] sm:$0xff] }
  0x27   :  { %2124 = vmatpush.bf16.msrb.mxu1 %v3461_v46  ;;  %v18_v46 = vld [vmem:[%s4451_s0 + $0x20] sm:$0xff] }
  0x28   :  { %2137 = vmatpush.bf16.msrb.mxu2 %v3469_v47  ;;  %v3496_v47 = vld [vmem:[%s4450_s1 + $0x288] sm:$0xff] }
  0x29   :  { %2150 = vmatpush.bf16.msrb.mxu3 %v3477_v49  ;;  %v3504_v49 = vld [vmem:[%s4450_s1 + $0x2c8] sm:$0xff] }
  0x2a   :  { %2112 = vmatpush.bf16.msrb.mxu0 %v3452_v50  ;;  %v536_v50 = vunpack.c.l.b16 %v18_v46 }
  0x2b   :  { %2125 = vmatpush.bf16.msrb.mxu1 %v3460_v51  ;;  %v3479_v51 = vld [vmem:[%s4450_s1 + $0x200] sm:$0xff] }
  0x2c   :  { %2138 = vmatpush.bf16.msrb.mxu2 %v3468_v52  ;;  %v3487_v52 = vld [vmem:[%s4450_s1 + $0x240] sm:$0xff] }
  0x2d   :  { %2151 = vmatpush.bf16.msrb.mxu3 %v3476_v53  ;;  %v538_v53 = vunpack.c.l.b16 %v19_v48 }
  0x2e   :  { %2113 = vmatpush.bf16.msrb.mxu0 %v3451_v54  ;;  %v3495_v54 = vld [vmem:[%s4450_s1 + $0x280] sm:$0xff] }
  0x2f   :  { %2126 = vmatpush.bf16.msrb.mxu1 %v3459_v55  ;;  %v3518_v55 = vld [vmem:[%s4450_s1 + $0x338] sm:$0xff] }
  0x30   :  { %2139 = vmatpush.bf16.msrb.mxu2 %v3467_v56  ;;  %v537_v56 = vunpack.c.h.b16 %v18_v46  ;;  %v3565_v46 = vld [vmem:[%s4450_s1 + $0x4b0] sm:$0xff] }
  0x31   :  { %2152 = vmatpush.bf16.msrb.mxu3 %v3475_v57  ;;  %v3526_v57 = vld [vmem:[%s4450_s1 + $0x378] sm:$0xff] }
  0x32   :  { %2114 = vmatpush.bf16.msrb.mxu0 %v3450_v58  ;;  %v3534_v58 = vld [vmem:[%s4450_s1 + $0x3b8] sm:$0xff] }
  0x33   :  { %2127 = vmatpush.bf16.msrb.mxu1 %v3458_v59  ;;  %v539_v59 = vunpack.c.h.b16 %v19_v48  ;;  %v3548_v48 = vld [vmem:[%s4450_s1 + $0x428] sm:$0xff] }
  0x34   :  { %2140 = vmatpush.bf16.msrb.mxu2 %v3466_v60  ;;  %v3503_v60 = vld [vmem:[%s4450_s1 + $0x2c0] sm:$0xff] }
  0x35   :  { %2153 = vmatpush.bf16.msrb.mxu3 %v3474_v61  ;;  %v566_v61 = vpack.c.b16 %v536_v50, %v536_v50  ;;  %v3564_v50 = vld [vmem:[%s4450_s1 + $0x4a8] sm:$0xff] }
  0x36   :  { %2115 = vmatpush.bf16.msrb.mxu0 %v3449_v62  ;;  %v568_v62 = vpack.c.b16 %v538_v53, %v538_v53  ;;  %v3555_v53 = vld [vmem:[%s4450_s1 + $0x460] sm:$0xff] }
  0x37   :  { %2128 = vmatpush.bf16.msrb.mxu1 %v3457_v63  ;;  %v3542_v63 = vld [vmem:[%s4450_s1 + $0x3f8] sm:$0xff] }
  0x38   :  { %2141 = vmatpush.bf16.msrb.mxu2 %v3465_v0  ;;  %v567_v0 = vpack.c.b16 %v537_v56, %v537_v56  ;;  %v3546_v56 = vld [vmem:[%s4450_s1 + $0x418] sm:$0xff] }
  0x39   :  { %2154 = vmatpush.bf16.msrb.mxu3 %v3473_v1  ;;  %v3517_v1 = vld [vmem:[%s4450_s1 + $0x330] sm:$0xff] }
  0x3a   :  { %2116 = vmatpush.bf16.msrb.mxu0 %v3448_v2  ;;  %v569_v2 = vpack.c.b16 %v539_v59, %v539_v59  ;;  %v3570_v59 = vld [vmem:[%s4450_s1 + $0x4d8] sm:$0xff] }
  0x3b   :  { %2129 = vmatpush.bf16.msrb.mxu1 %v3456_v3  ;;  %v3525_v3 = vld [vmem:[%s4450_s1 + $0x370] sm:$0xff] }
  0x3c   :  { %2142 = vmatpush.bf16.msrb.mxu2 %v3464_v4  ;;  %v3533_v4 = vld [vmem:[%s4450_s1 + $0x3b0] sm:$0xff] }
  0x3d   :  { %2155 = vmatpush.bf16.msrb.mxu3 %v3472_v7  ;;  %v3524_v7 = vld [vmem:[%s4450_s1 + $0x368] sm:$0xff] }
  0x3e   :  { %2117 = vmatpush.bf16.msrb.mxu0 %v3447_v8  ;;  %v3532_v8 = vld [vmem:[%s4450_s1 + $0x3a8] sm:$0xff] }
  0x3f   :  { %2130 = vmatpush.bf16.msrb.mxu1 %v3455_v10  ;;  %v3515_v10 = vld [vmem:[%s4450_s1 + $0x320] sm:$0xff] }
  0x40   :  { %2143 = vmatpush.bf16.msrb.mxu2 %v3463_v11  ;;  %v3523_v11 = vld [vmem:[%s4450_s1 + $0x360] sm:$0xff] }
  0x41   :  { %2156 = vmatpush.bf16.msrb.mxu3 %v3471_v17  ;;  %2118 = vmatmul.bf16.vlgmr.msrb.gmra.mxu0 %v562_v21  ;;  %v3538_v17 = vld [vmem:[%s4450_s1 + $0x3d8] sm:$0xff]  ;;  %v3537_v21 = vld [vmem:[%s4450_s1 + $0x3d0] sm:$0xff] }
  0x42   :  { %2162 = vmatpush.bf16.msra.mxu0 %v3486_v14  ;;  %2131 = vmatmul.bf16.vlgmr.msrb.gmra.mxu1 %v563_v22  ;;  %v3514_v14 = vld [vmem:[%s4450_s1 + $0x318] sm:$0xff]  ;;  %v3512_v22 = vld [vmem:[%s4450_s1 + $0x308] sm:$0xff] }
  0x43   :  { %2175 = vmatpush.bf16.msra.mxu1 %v3494_v15  ;;  %2144 = vmatmul.bf16.vlgmr.msrb.gmra.mxu2 %v564_v20  ;;  %v3522_v15 = vld [vmem:[%s4450_s1 + $0x358] sm:$0xff]  ;;  %v3529_v20 = vld [vmem:[%s4450_s1 + $0x390] sm:$0xff] }
  0x44   :  { %2188 = vmatpush.bf16.msra.mxu2 %v3502_v16  ;;  %2157 = vmatmul.bf16.vlgmr.msrb.gmra.mxu3 %v565_v26  ;;  %v3530_v16 = vld [vmem:[%s4450_s1 + $0x398] sm:$0xff] }
  0x45   :  { %2201 = vmatpush.bf16.msra.mxu3 %v3510_v19  ;;  %v3521_v19 = vld [vmem:[%s4450_s1 + $0x350] sm:$0xff]  ;;  %v21_v26 = vld [vmem:[%s4451_s0 + $0x38] sm:$0xff] }
  0x46   :  { %2163 = vmatpush.bf16.msra.mxu0 %v3485_v23  ;;  %v3520_v23 = vld [vmem:[%s4450_s1 + $0x348] sm:$0xff] }
  0x47   :  { %2176 = vmatpush.bf16.msra.mxu1 %v3493_v24  ;;  %v20_v24 = vld [vmem:[%s4451_s0 + $0x30] sm:$0xff] }
  0x48   :  { %2189 = vmatpush.bf16.msra.mxu2 %v3501_v25  ;;  %v3528_v25 = vld [vmem:[%s4450_s1 + $0x388] sm:$0xff] }
  0x49   :  { %2202 = vmatpush.bf16.msra.mxu3 %v3509_v27  ;;  %v3536_v27 = vld [vmem:[%s4450_s1 + $0x3c8] sm:$0xff] }
  0x4a   :  { %2164 = vmatpush.bf16.msra.mxu0 %v3484_v28  ;;  %v3511_v28 = vld [vmem:[%s4450_s1 + $0x300] sm:$0xff] }
  0x4b   :  { %2177 = vmatpush.bf16.msra.mxu1 %v3492_v29  ;;  %v540_v29 = vunpack.c.l.b16 %v20_v24 }
  0x4c   :  { %2190 = vmatpush.bf16.msra.mxu2 %v3500_v30  ;;  %v3519_v30 = vld [vmem:[%s4450_s1 + $0x340] sm:$0xff] }
  0x4d   :  { %2203 = vmatpush.bf16.msra.mxu3 %v3508_v31  ;;  %v3550_v31 = vld [vmem:[%s4450_s1 + $0x438] sm:$0xff] }
  0x4e   :  { %2165 = vmatpush.bf16.msra.mxu0 %v3483_v32  ;;  %v542_v32 = vunpack.c.l.b16 %v21_v26 }
  0x4f   :  { %2178 = vmatpush.bf16.msra.mxu1 %v3491_v33  ;;  %v541_v33 = vunpack.c.h.b16 %v20_v24  ;;  %v3597_v24 = vld [vmem:[%s4450_s1 + $0x5b0] sm:$0xff] }
  0x50   :  { %2191 = vmatpush.bf16.msra.mxu2 %v3499_v34  ;;  %v3527_v34 = vld [vmem:[%s4450_s1 + $0x380] sm:$0xff] }
  0x51   :  { %2204 = vmatpush.bf16.msra.mxu3 %v3507_v35  ;;  %v3558_v35 = vld [vmem:[%s4450_s1 + $0x478] sm:$0xff] }
  0x52   :  { %2166 = vmatpush.bf16.msra.mxu0 %v3482_v36  ;;  %v543_v36 = vunpack.c.h.b16 %v21_v26  ;;  %v3580_v26 = vld [vmem:[%s4450_s1 + $0x528] sm:$0xff] }
  0x53   :  { %2179 = vmatpush.bf16.msra.mxu1 %v3490_v37  ;;  %v3566_v37 = vld [vmem:[%s4450_s1 + $0x4b8] sm:$0xff] }
  0x54   :  { %2192 = vmatpush.bf16.msra.mxu2 %v3498_v38  ;;  %v3535_v38 = vld [vmem:[%s4450_s1 + $0x3c0] sm:$0xff] }
  0x55   :  { %2205 = vmatpush.bf16.msra.mxu3 %v3506_v39  ;;  %v570_v39 = vpack.c.b16 %v540_v29, %v540_v29  ;;  %v3655_v29 = vld [vmem:[%s4452_s2] ss:$0 sm:$0xff] }
  0x56   :  { %2167 = vmatpush.bf16.msra.mxu0 %v3481_v40  ;;  %v3574_v40 = vld [vmem:[%s4450_s1 + $0x4f8] sm:$0xff] }
  0x57   :  { %2180 = vmatpush.bf16.msra.mxu1 %v3489_v41  ;;  %v572_v41 = vpack.c.b16 %v542_v32, %v542_v32 }
  0x58   :  { %2193 = vmatpush.bf16.msra.mxu2 %v3497_v42  ;;  %v571_v42 = vpack.c.b16 %v541_v33, %v541_v33  ;;  %v3587_v33 = vld [vmem:[%s4450_s1 + $0x560] sm:$0xff] }
  0x59   :  { %2206 = vmatpush.bf16.msra.mxu3 %v3505_v43  ;;  %v573_v43 = vpack.c.b16 %v543_v36, %v543_v36 }
  0x5a   :  { %2168 = vmatpush.bf16.msra.mxu0 %v3480_v44  ;;  %v3549_v44 = vld [vmem:[%s4450_s1 + $0x430] sm:$0xff] }
  0x5b   :  { %2181 = vmatpush.bf16.msra.mxu1 %v3488_v45  ;;  %v3557_v45 = vld [vmem:[%s4450_s1 + $0x470] sm:$0xff] }
  0x5c   :  { %2194 = vmatpush.bf16.msra.mxu2 %v3496_v47  ;;  %v3573_v47 = vld [vmem:[%s4450_s1 + $0x4f0] sm:$0xff] }
  0x5d   :  { %2207 = vmatpush.bf16.msra.mxu3 %v3504_v49  ;;  %v3556_v49 = vld [vmem:[%s4450_s1 + $0x468] sm:$0xff] }
  0x5e   :  { %2169 = vmatpush.bf16.msra.mxu0 %v3479_v51  ;;  %v3572_v51 = vld [vmem:[%s4450_s1 + $0x4e8] sm:$0xff] }
  0x5f   :  { %2182 = vmatpush.bf16.msra.mxu1 %v3487_v52  ;;  %v3547_v52 = vld [vmem:[%s4450_s1 + $0x420] sm:$0xff] }
  0x60   :  { %2195 = vmatpush.bf16.msra.mxu2 %v3495_v54  ;;  %v3563_v54 = vld [vmem:[%s4450_s1 + $0x4a0] sm:$0xff] }
  0x61   :  { %2208 = vmatpush.bf16.msra.mxu3 %v3503_v60  ;;  %2170 = vmatmul.bf16.vlgmr.msra.gmra.mxu0 %v566_v61  ;;  %v3545_v60 = vld [vmem:[%s4450_s1 + $0x410] sm:$0xff] }
  0x62   :  { %2214 = vmatpush.bf16.msrb.mxu0 %v3518_v55  ;;  %2183 = vmatmul.bf16.vlgmr.msra.gmra.mxu1 %v567_v0  ;;  %v3571_v55 = vld [vmem:[%s4450_s1 + $0x4e0] sm:$0xff]  ;;  %v3553_v61 = vld [vmem:[%s4450_s1 + $0x450] sm:$0xff]  ;;  %v3544_v0 = vld [vmem:[%s4450_s1 + $0x408] sm:$0xff] }
  0x63   :  { %2227 = vmatpush.bf16.msrb.mxu1 %v3526_v57  ;;  %2196 = vmatmul.bf16.vlgmr.msra.gmra.mxu2 %v568_v62  ;;  %v3554_v57 = vld [vmem:[%s4450_s1 + $0x458] sm:$0xff]  ;;  %v3561_v62 = vld [vmem:[%s4450_s1 + $0x490] sm:$0xff] }
  0x64   :  { %2240 = vmatpush.bf16.msrb.mxu2 %v3534_v58  ;;  %2209 = vmatmul.bf16.vlgmr.msra.gmra.mxu3 %v569_v2  ;;  %v3562_v58 = vld [vmem:[%s4450_s1 + $0x498] sm:$0xff]  ;;  %v3560_v2 = vld [vmem:[%s4450_s1 + $0x488] sm:$0xff] }
  0x65   :  { %2253 = vmatpush.bf16.msrb.mxu3 %v3542_v63  ;;  %v3569_v63 = vld [vmem:[%s4450_s1 + $0x4d0] sm:$0xff] }
  0x66   :  { %2215 = vmatpush.bf16.msrb.mxu0 %v3517_v1  ;;  %v3552_v1 = vld [vmem:[%s4450_s1 + $0x448] sm:$0xff] }
  0x67   :  { %2228 = vmatpush.bf16.msrb.mxu1 %v3525_v3  ;;  %v22_v3 = vld [vmem:[%s4451_s0 + $0x40] sm:$0xff] }
  0x68   :  { %2241 = vmatpush.bf16.msrb.mxu2 %v3533_v4  ;;  %v23_v4 = vld [vmem:[%s4451_s0 + $0x48] sm:$0xff] }
  0x69   :  { %2254 = vmatpush.bf16.msrb.mxu3 %v3541_v5  ;;  %v3568_v5 = vld [vmem:[%s4450_s1 + $0x4c8] sm:$0xff] }
  0x6a   :  { %2216 = vmatpush.bf16.msrb.mxu0 %v3516_v6  ;;  %v3543_v6 = vld [vmem:[%s4450_s1 + $0x400] sm:$0xff] }
  0x6b   :  { %2229 = vmatpush.bf16.msrb.mxu1 %v3524_v7  ;;  %v544_v7 = vunpack.c.l.b16 %v22_v3 }
  0x6c   :  { %2242 = vmatpush.bf16.msrb.mxu2 %v3532_v8  ;;  %v546_v8 = vunpack.c.l.b16 %v23_v4 }
  0x6d   :  { %2255 = vmatpush.bf16.msrb.mxu3 %v3540_v9  ;;  %v3551_v9 = vld [vmem:[%s4450_s1 + $0x440] sm:$0xff] }
  0x6e   :  { %2217 = vmatpush.bf16.msrb.mxu0 %v3515_v10  ;;  %v3559_v10 = vld [vmem:[%s4450_s1 + $0x480] sm:$0xff] }
  0x6f   :  { %2230 = vmatpush.bf16.msrb.mxu1 %v3523_v11  ;;  %v545_v11 = vunpack.c.h.b16 %v22_v3  ;;  %v3622_v3 = vld [vmem:[%s4450_s1 + $0x678] sm:$0xff] }
  0x70   :  { %2243 = vmatpush.bf16.msrb.mxu2 %v3531_v12  ;;  %v3582_v12 = vld [vmem:[%s4450_s1 + $0x538] sm:$0xff] }
  0x71   :  { %2256 = vmatpush.bf16.msrb.mxu3 %v3539_v13  ;;  %v3590_v13 = vld [vmem:[%s4450_s1 + $0x578] sm:$0xff] }
  0x72   :  { %2218 = vmatpush.bf16.msrb.mxu0 %v3514_v14  ;;  %v547_v14 = vunpack.c.h.b16 %v23_v4 }
  0x73   :  { %2231 = vmatpush.bf16.msrb.mxu1 %v3522_v15  ;;  %v3598_v15 = vld [vmem:[%s4450_s1 + $0x5b8] sm:$0xff] }
  0x74   :  { %2244 = vmatpush.bf16.msrb.mxu2 %v3530_v16  ;;  %v3567_v16 = vld [vmem:[%s4450_s1 + $0x4c0] sm:$0xff] }
  0x75   :  { %2257 = vmatpush.bf16.msrb.mxu3 %v3538_v17  ;;  %v574_v17 = vpack.c.b16 %v544_v7, %v544_v7  ;;  %v3599_v7 = vld [vmem:[%s4450_s1 + $0x5c0] sm:$0xff] }
  0x76   :  { %2219 = vmatpush.bf16.msrb.mxu0 %v3513_v18  ;;  %v576_v18 = vpack.c.b16 %v546_v8, %v546_v8 }
  0x77   :  { %2232 = vmatpush.bf16.msrb.mxu1 %v3521_v19  ;;  %v3606_v19 = vld [vmem:[%s4450_s1 + $0x5f8] sm:$0xff] }
  0x78   :  { %2245 = vmatpush.bf16.msrb.mxu2 %v3529_v20  ;;  %v575_v20 = vpack.c.b16 %v545_v11, %v545_v11 }
  0x79   :  { %2258 = vmatpush.bf16.msrb.mxu3 %v3537_v21  ;;  %v577_v21 = vpack.c.b16 %v547_v14, %v547_v14  ;;  %v3621_v14 = vld [vmem:[%s4450_s1 + $0x670] sm:$0xff] }
  0x7a   :  { %2220 = vmatpush.bf16.msrb.mxu0 %v3512_v22  ;;  %v3581_v22 = vld [vmem:[%s4450_s1 + $0x530] sm:$0xff] }
  0x7b   :  { %2233 = vmatpush.bf16.msrb.mxu1 %v3520_v23  ;;  %v3589_v23 = vld [vmem:[%s4450_s1 + $0x570] sm:$0xff] }
  0x7c   :  { %2246 = vmatpush.bf16.msrb.mxu2 %v3528_v25  ;;  %v3605_v25 = vld [vmem:[%s4450_s1 + $0x5f0] sm:$0xff] }
  0x7d   :  { %2259 = vmatpush.bf16.msrb.mxu3 %v3536_v27  ;;  %v3588_v27 = vld [vmem:[%s4450_s1 + $0x568] sm:$0xff] }
  0x7e   :  { %2221 = vmatpush.bf16.msrb.mxu0 %v3511_v28  ;;  %v3596_v28 = vld [vmem:[%s4450_s1 + $0x5a8] sm:$0xff] }
  0x7f   :  { %2234 = vmatpush.bf16.msrb.mxu1 %v3519_v30  ;;  %v3604_v30 = vld [vmem:[%s4450_s1 + $0x5e8] sm:$0xff] }
  0x80   :  { %2247 = vmatpush.bf16.msrb.mxu2 %v3527_v34  ;;  %v3595_v34 = vld [vmem:[%s4450_s1 + $0x5a0] sm:$0xff] }
  0x81   :  { %2260 = vmatpush.bf16.msrb.mxu3 %v3535_v38  ;;  %2222 = vmatmul.bf16.vlgmr.msrb.gmra.mxu0 %v570_v39  ;;  %v3578_v39 = vld [vmem:[%s4450_s1 + $0x518] sm:$0xff] }
  0x82   :  { %2266 = vmatpush.bf16.msra.mxu0 %v3550_v31  ;;  %2235 = vmatmul.bf16.vlgmr.msrb.gmra.mxu1 %v571_v42  ;;  %v3579_v31 = vld [vmem:[%s4450_s1 + $0x520] sm:$0xff]  ;;  %v3602_v42 = vld [vmem:[%s4450_s1 + $0x5d8] sm:$0xff] }
  0x83   :  { %2279 = vmatpush.bf16.msra.mxu1 %v3558_v35  ;;  %2248 = vmatmul.bf16.vlgmr.msrb.gmra.mxu2 %v572_v41  ;;  %v3594_v41 = vld [vmem:[%s4450_s1 + $0x598] sm:$0xff] }
  0x84   :  { %2292 = vmatpush.bf16.msra.mxu2 %v3566_v37  ;;  %2261 = vmatmul.bf16.vlgmr.msrb.gmra.mxu3 %v573_v43  ;;  %v3603_v37 = vld [vmem:[%s4450_s1 + $0x5e0] sm:$0xff] }
  0x85   :  { %2305 = vmatpush.bf16.msra.mxu3 %v3574_v40  ;;  %v3586_v40 = vld [vmem:[%s4450_s1 + $0x558] sm:$0xff] }
  0x86   :  { %2267 = vmatpush.bf16.msra.mxu0 %v3549_v44  ;;  %v3577_v44 = vld [vmem:[%s4450_s1 + $0x510] sm:$0xff] }
  0x87   :  { %2280 = vmatpush.bf16.msra.mxu1 %v3557_v45 }
  0x88   :  { %2293 = vmatpush.bf16.msra.mxu2 %v3565_v46 }
  0x89   :  { %2306 = vmatpush.bf16.msra.mxu3 %v3573_v47  ;;  %v3585_v47 = vld [vmem:[%s4450_s1 + $0x550] sm:$0xff] }
  0x8a   :  { %2268 = vmatpush.bf16.msra.mxu0 %v3548_v48  ;;  %v3593_v48 = vld [vmem:[%s4450_s1 + $0x590] sm:$0xff] }
  0x8b   :  { %2281 = vmatpush.bf16.msra.mxu1 %v3556_v49 }
  0x8c   :  { %2294 = vmatpush.bf16.msra.mxu2 %v3564_v50 }
  0x8d   :  { %2307 = vmatpush.bf16.msra.mxu3 %v3572_v51  ;;  %v3601_v51 = vld [vmem:[%s4450_s1 + $0x5d0] sm:$0xff] }
  0x8e   :  { %2269 = vmatpush.bf16.msra.mxu0 %v3547_v52 }
  0x8f   :  { %2282 = vmatpush.bf16.msra.mxu1 %v3555_v53  ;;  %v3576_v53 = vld [vmem:[%s4450_s1 + $0x508] sm:$0xff] }
  0x90   :  { %2295 = vmatpush.bf16.msra.mxu2 %v3563_v54  ;;  %v3584_v54 = vld [vmem:[%s4450_s1 + $0x548] sm:$0xff] }
  0x91   :  { %2308 = vmatpush.bf16.msra.mxu3 %v3571_v55  ;;  %v3592_v55 = vld [vmem:[%s4450_s1 + $0x588] sm:$0xff] }
  0x92   :  { %2270 = vmatpush.bf16.msra.mxu0 %v3546_v56  ;;  %v24_v56 = vld [vmem:[%s4451_s0 + $0x50] sm:$0xff] }
  0x93   :  { %2283 = vmatpush.bf16.msra.mxu1 %v3554_v57  ;;  %v25_v57 = vld [vmem:[%s4451_s0 + $0x58] sm:$0xff] }
  0x94   :  { %2296 = vmatpush.bf16.msra.mxu2 %v3562_v58  ;;  %v3600_v58 = vld [vmem:[%s4450_s1 + $0x5c8] sm:$0xff]  ;;  %v551_v4 = vunpack.c.h.b16 %v25_v57 }
  0x95   :  { %2309 = vmatpush.bf16.msra.mxu3 %v3570_v59 }
  0x96   :  { %2271 = vmatpush.bf16.msra.mxu0 %v3545_v60  ;;  %v3575_v60 = vld [vmem:[%s4450_s1 + $0x500] sm:$0xff] }
  0x97   :  { %2284 = vmatpush.bf16.msra.mxu1 %v3553_v61  ;;  %v548_v61 = vunpack.c.l.b16 %v24_v56 }
  0x98   :  { %2297 = vmatpush.bf16.msra.mxu2 %v3561_v62  ;;  %v550_v62 = vunpack.c.l.b16 %v25_v57  ;;  %v3646_v57 = vld [vmem:[%s4450_s1 + $0x738] sm:$0xff] }
  0x99   :  { %2310 = vmatpush.bf16.msra.mxu3 %v3569_v63  ;;  %v3583_v63 = vld [vmem:[%s4450_s1 + $0x540] sm:$0xff]  ;;  %v578_v8 = vpack.c.b16 %v548_v61, %v548_v61 }
  0x9a   :  { %2272 = vmatpush.bf16.msra.mxu0 %v3544_v0  ;;  %v3591_v0 = vld [vmem:[%s4450_s1 + $0x580] sm:$0xff] }
  0x9b   :  { %2285 = vmatpush.bf16.msra.mxu1 %v3552_v1  ;;  %v549_v1 = vunpack.c.h.b16 %v24_v56 }
  0x9c   :  { %2298 = vmatpush.bf16.msra.mxu2 %v3560_v2  ;;  %v3614_v2 = vld [vmem:[%s4450_s1 + $0x638] sm:$0xff] }
  0x9d   :  { %2311 = vmatpush.bf16.msra.mxu3 %v3568_v5  ;;  %v579_v11 = vpack.c.b16 %v549_v1, %v549_v1  ;;  %v3645_v1 = vld [vmem:[%s4450_s1 + $0x730] sm:$0xff] }
  0x9e   :  { %2273 = vmatpush.bf16.msra.mxu0 %v3543_v6  ;;  %v2067_v32 = vpop.f32.mrf.mxu0  ;;  %v3630_v6 = vld [vmem:[%s4450_s1 + $0x6b8] sm:$0xff] }
  0x9f   :  { %2286 = vmatpush.bf16.msra.mxu1 %v3551_v9  ;;  %v2068_v35 = vadd.f32 %v3655_v29, %v2067_v32  ;;  %v2080_v36 = vpop.f32.mrf.mxu1  ;;  %v580_v9 = vpack.c.b16 %v550_v62, %v550_v62 }
  0xa0   :  { %2299 = vmatpush.bf16.msra.mxu2 %v3559_v10  ;;  %v3638_v10 = vld [vmem:[%s4450_s1 + $0x6f8] sm:$0xff] }
  0xa1   :  { %2312 = vmatpush.bf16.msra.mxu3 %v3567_v16  ;;  %2274 = vmatmul.bf16.vlgmr.msra.gmra.mxu0 %v574_v17  ;;  %v2081_v38 = vadd.f32 %v2080_v36, %v2068_v35  ;;  %v3637_v16 = vld [vmem:[%s4450_s1 + $0x6f0] sm:$0xff]  ;;  %v3612_v17 = vld [vmem:[%s4450_s1 + $0x628] sm:$0xff] }
  0xa2   :  { %2318 = vmatpush.bf16.msrb.mxu0 %v3582_v12  ;;  %2287 = vmatmul.bf16.vlgmr.msra.gmra.mxu1 %v575_v20  ;;  %v581_v12 = vpack.c.b16 %v551_v4, %v551_v4  ;;  %v3636_v20 = vld [vmem:[%s4450_s1 + $0x6e8] sm:$0xff]  ;;  %v3609_v35 = vld [vmem:[%s4450_s1 + $0x610] sm:$0xff] }
  0xa3   :  { %2331 = vmatpush.bf16.msrb.mxu1 %v3590_v13  ;;  %2300 = vmatmul.bf16.vlgmr.msra.gmra.mxu2 %v576_v18  ;;  %v3613_v13 = vld [vmem:[%s4450_s1 + $0x630] sm:$0xff]  ;;  %v3620_v18 = vld [vmem:[%s4450_s1 + $0x668] sm:$0xff] }
  0xa4   :  { %2344 = vmatpush.bf16.msrb.mxu2 %v3598_v15  ;;  %2313 = vmatmul.bf16.vlgmr.msra.gmra.mxu3 %v577_v21  ;;  %v3629_v15 = vld [vmem:[%s4450_s1 + $0x6b0] sm:$0xff]  ;;  %v3611_v21 = vld [vmem:[%s4450_s1 + $0x620] sm:$0xff]  ;;  %v3652_v4 = vld [vmem:[%s4450_s1 + $0x768] sm:$0xff] }
  0xa5   :  { %2357 = vmatpush.bf16.msrb.mxu3 %v3606_v19  ;;  %v3628_v19 = vld [vmem:[%s4450_s1 + $0x6a8] sm:$0xff]  ;;  %v3617_v36 = vld [vmem:[%s4450_s1 + $0x650] sm:$0xff] }
  0xa6   :  { %2319 = vmatpush.bf16.msrb.mxu0 %v3581_v22  ;;  %v2093_v43 = vpop.f32.mrf.mxu2  ;;  %v2069_v46 = vpop.f32.mrf.mxu0  ;;  %v3619_v22 = vld [vmem:[%s4450_s1 + $0x660] sm:$0xff] }
  0xa7   :  { %2332 = vmatpush.bf16.msrb.mxu1 %v3589_v23  ;;  %v2094_v45 = vadd.f32 %v2093_v43, %v2081_v38  ;;  %v2106_v49 = vpop.f32.mrf.mxu3  ;;  %v2082_v50 = vpop.f32.mrf.mxu1  ;;  %v3627_v23 = vld [vmem:[%s4450_s1 + $0x6a0] sm:$0xff]  ;;  %v3608_v43 = vld [vmem:[%s4450_s1 + $0x608] sm:$0xff] }
  0xa8   :  { %2345 = vmatpush.bf16.msrb.mxu2 %v3597_v24  ;;  %v3624_v46 = vld [vmem:[%s4450_s1 + $0x688] sm:$0xff] }
  0xa9   :  { %2358 = vmatpush.bf16.msrb.mxu3 %v3605_v25  ;;  %v4261_v52 = vadd.f32 %v2106_v49, %v2094_v45  ;;  %v3616_v45 = vld [vmem:[%s4450_s1 + $0x648] sm:$0xff] }
  0xaa   :  { %2320 = vmatpush.bf16.msrb.mxu0 %v3580_v26  ;;  %v3632_v49 = vld [vmem:[%s4450_s1 + $0x6c8] sm:$0xff] }
  0xab   :  { %2333 = vmatpush.bf16.msrb.mxu1 %v3588_v27  ;;  %v3635_v27 = vld [vmem:[%s4450_s1 + $0x6e0] sm:$0xff] }
  0xac   :  { %2346 = vmatpush.bf16.msrb.mxu2 %v3596_v28  ;;  %v3610_v28 = vld [vmem:[%s4450_s1 + $0x618] sm:$0xff] }
  0xad   :  { %2359 = vmatpush.bf16.msrb.mxu3 %v3604_v30  ;;  %v3618_v30 = vld [vmem:[%s4450_s1 + $0x658] sm:$0xff] }
  0xae   :  { %2321 = vmatpush.bf16.msrb.mxu0 %v3579_v31  ;;  %v2095_v59 = vpop.f32.mrf.mxu2  ;;  %v3626_v31 = vld [vmem:[%s4450_s1 + $0x698] sm:$0xff] }
  0xaf   :  { %2334 = vmatpush.bf16.msrb.mxu1 %v3587_v33  ;;  %v2108_v5 = vpop.f32.mrf.mxu3  ;;  %v3634_v33 = vld [vmem:[%s4450_s1 + $0x6d8] sm:$0xff] }
  0xb0   :  { %2347 = vmatpush.bf16.msrb.mxu2 %v3595_v34 }
  0xb1   :  { %2360 = vmatpush.bf16.msrb.mxu3 %v3603_v37  ;;  %v3625_v37 = vld [vmem:[%s4450_s1 + $0x690] sm:$0xff] }
  0xb2   :  { %2322 = vmatpush.bf16.msrb.mxu0 %v3578_v39 }
  0xb3   :  { %2335 = vmatpush.bf16.msrb.mxu1 %v3586_v40 }
  0xb4   :  { %2348 = vmatpush.bf16.msrb.mxu2 %v3594_v41 }
  0xb5   :  { %2361 = vmatpush.bf16.msrb.mxu3 %v3602_v42  ;;  %v3633_v42 = vld [vmem:[%s4450_s1 + $0x6d0] sm:$0xff] }
  0xb6   :  { %2323 = vmatpush.bf16.msrb.mxu0 %v3577_v44  ;;  %v26_v44 = vld [vmem:[%s4451_s0 + $0x60] sm:$0xff] }
  0xb7   :  { %2336 = vmatpush.bf16.msrb.mxu1 %v3585_v47  ;;  %v27_v47 = vld [vmem:[%s4451_s0 + $0x68] sm:$0xff]  ;;  %v552_v50 = vunpack.c.l.b16 %v26_v44 }
  0xb8   :  { %2349 = vmatpush.bf16.msrb.mxu2 %v3593_v48  ;;  %v555_v59 = vunpack.c.h.b16 %v27_v47 }
  0xb9   :  { %2362 = vmatpush.bf16.msrb.mxu3 %v3601_v51  ;;  %v3607_v51 = vld [vmem:[%s4450_s1 + $0x600] sm:$0xff]  ;;  %v582_v61 = vpack.c.b16 %v552_v50, %v552_v50 }
  0xba   :  { %2324 = vmatpush.bf16.msrb.mxu0 %v3576_v53  ;;  %v553_v53 = vunpack.c.h.b16 %v26_v44 }
  0xbb   :  { %2337 = vmatpush.bf16.msrb.mxu1 %v3584_v54  ;;  %v3615_v54 = vld [vmem:[%s4450_s1 + $0x640] sm:$0xff] }
  0xbc   :  { %2350 = vmatpush.bf16.msrb.mxu2 %v3592_v55  ;;  %v3623_v55 = vld [vmem:[%s4450_s1 + $0x680] sm:$0xff] }
  0xbd   :  { %2363 = vmatpush.bf16.msrb.mxu3 %v3600_v58  ;;  %v3654_v58 = vld [vmem:[%s4450_s1 + $0x778] sm:$0xff] }
  0xbe   :  { %2325 = vmatpush.bf16.msrb.mxu0 %v3575_v60  ;;  %v2119_v24 = vpop.f32.mrf.mxu0  ;;  %v3631_v60 = vld [vmem:[%s4450_s1 + $0x6c0] sm:$0xff] }
  0xbf   :  { %2338 = vmatpush.bf16.msrb.mxu1 %v3583_v63  ;;  %v2132_v25 = vpop.f32.mrf.mxu1  ;;  %v2120_v26 = vadd.f32 %v2119_v24, %v4261_v52  ;;  %v554_v52 = vunpack.c.l.b16 %v27_v47  ;;  %v583_v63 = vpack.c.b16 %v553_v53, %v553_v53 }
  0xc0   :  { %2351 = vmatpush.bf16.msrb.mxu2 %v3591_v0  ;;  %v585_v0 = vpack.c.b16 %v555_v59, %v555_v59 }
  0xc1   :  { %2364 = vmatpush.bf16.msrb.mxu3 %v3599_v7  ;;  %2326 = vmatmul.bf16.vlgmr.msrb.gmra.mxu0 %v578_v8  ;;  %v2133_v29 = vadd.f32 %v2132_v25, %v2120_v26  ;;  %v584_v62 = vpack.c.b16 %v554_v52, %v554_v52  ;;  %v3643_v7 = vld [vmem:[%s4450_s1 + $0x720] sm:$0xff] }
  0xc2   :  { %2370 = vmatpush.bf16.msra.mxu0 %v3614_v2  ;;  %2339 = vmatmul.bf16.vlgmr.msrb.gmra.mxu1 %v579_v11  ;;  %v3653_v2 = vld [vmem:[%s4450_s1 + $0x770] sm:$0xff]  ;;  %v3651_v8 = vld [vmem:[%s4450_s1 + $0x760] sm:$0xff]  ;;  %v3642_v11 = vld [vmem:[%s4450_s1 + $0x718] sm:$0xff] }
  0xc3   :  { %2383 = vmatpush.bf16.msra.mxu1 %v3622_v3  ;;  %2352 = vmatmul.bf16.vlgmr.msrb.gmra.mxu2 %v580_v9  ;;  %v3644_v3 = vld [vmem:[%s4450_s1 + $0x728] sm:$0xff]  ;;  %v3639_v26 = vld [vmem:[%s4450_s1 + $0x700] sm:$0xff] }
  0xc4   :  { %2396 = vmatpush.bf16.msra.mxu2 %v3630_v6  ;;  %2365 = vmatmul.bf16.vlgmr.msrb.gmra.mxu3 %v581_v12  ;;  %v3650_v12 = vld [vmem:[%s4450_s1 + $0x758] sm:$0xff] }
  0xc5   :  { %2409 = vmatpush.bf16.msra.mxu3 %v3638_v10 }
  0xc6   :  { %2371 = vmatpush.bf16.msra.mxu0 %v3613_v13  ;;  %v2145_v32 = vpop.f32.mrf.mxu2  ;;  %v2121_v39 = vpop.f32.mrf.mxu0 }
  0xc7   :  { %2384 = vmatpush.bf16.msra.mxu1 %v3621_v14  ;;  %v2146_v34 = vadd.f32 %v2145_v32, %v2133_v29  ;;  %v2158_v38 = vpop.f32.mrf.mxu3  ;;  %v2134_v41 = vpop.f32.mrf.mxu1  ;;  %v3647_v29 = vld [vmem:[%s4450_s1 + $0x740] sm:$0xff] }
  0xc8   :  { %2397 = vmatpush.bf16.msra.mxu2 %v3629_v15 }
  0xc9   :  { %2410 = vmatpush.bf16.msra.mxu3 %v3637_v16  ;;  %v2159_v40 = vadd.f32 %v2158_v38, %v2146_v34 }
  0xca   :  { %2372 = vmatpush.bf16.msra.mxu0 %v3612_v17  ;;  %v3641_v17 = vld [vmem:[%s4450_s1 + $0x710] sm:$0xff] }
  0xcb   :  { %2385 = vmatpush.bf16.msra.mxu1 %v3620_v18 }
  0xcc   :  { %2398 = vmatpush.bf16.msra.mxu2 %v3628_v19  ;;  %v3649_v19 = vld [vmem:[%s4450_s1 + $0x750] sm:$0xff] }
  0xcd   :  { %2411 = vmatpush.bf16.msra.mxu3 %v3636_v20 }
  0xce   :  { %2373 = vmatpush.bf16.msra.mxu0 %v3611_v21  ;;  %v2147_v48 = vpop.f32.mrf.mxu2  ;;  %v3640_v21 = vld [vmem:[%s4450_s1 + $0x708] sm:$0xff] }
  0xcf   :  { %2386 = vmatpush.bf16.msra.mxu1 %v3619_v22  ;;  %v2160_v56 = vpop.f32.mrf.mxu3  ;;  %v28_v22 = vld [vmem:[%s4451_s0 + $0x70] sm:$0xff] }
  0xd0   :  { %2399 = vmatpush.bf16.msra.mxu2 %v3627_v23  ;;  %v3648_v23 = vld [vmem:[%s4450_s1 + $0x748] sm:$0xff]  ;;  %v556_v25 = vunpack.c.l.b16 %v28_v22 }
  0xd1   :  { %2412 = vmatpush.bf16.msra.mxu3 %v3635_v27  ;;  %v557_v27 = vunpack.c.h.b16 %v28_v22 }
  0xd2   :  { %2374 = vmatpush.bf16.msra.mxu0 %v3610_v28 }
  0xd3   :  { %2387 = vmatpush.bf16.msra.mxu1 %v3618_v30  ;;  %v586_v30 = vpack.c.b16 %v556_v25, %v556_v25 }
  0xd4   :  { %2400 = vmatpush.bf16.msra.mxu2 %v3626_v31  ;;  %v587_v31 = vpack.c.b16 %v557_v27, %v557_v27 }
  0xd5   :  { %2413 = vmatpush.bf16.msra.mxu3 %v3634_v33 }
  0xd6   :  { %2375 = vmatpush.bf16.msra.mxu0 %v3609_v35 }
  0xd7   :  { %2388 = vmatpush.bf16.msra.mxu1 %v3617_v36 }
  0xd8   :  { %2401 = vmatpush.bf16.msra.mxu2 %v3625_v37 }
  0xd9   :  { %2414 = vmatpush.bf16.msra.mxu3 %v3633_v42 }
  0xda   :  { %2376 = vmatpush.bf16.msra.mxu0 %v3608_v43 }
  0xdb   :  { %2389 = vmatpush.bf16.msra.mxu1 %v3616_v45 }
  0xdc   :  { %2402 = vmatpush.bf16.msra.mxu2 %v3624_v46 }
  0xdd   :  { %2415 = vmatpush.bf16.msra.mxu3 %v3632_v49 }
  0xde   :  { %2377 = vmatpush.bf16.msra.mxu0 %v3607_v51  ;;  %v2171_v5 = vpop.f32.mrf.mxu0 }
  0xdf   :  { %2390 = vmatpush.bf16.msra.mxu1 %v3615_v54  ;;  %v2172_v6 = vadd.f32 %v2171_v5, %v2159_v40  ;;  %v2184_v9 = vpop.f32.mrf.mxu1 }
  0xe0   :  { %2403 = vmatpush.bf16.msra.mxu2 %v3623_v55 }
  0xe1   :  { %2416 = vmatpush.bf16.msra.mxu3 %v3631_v60  ;;  %2378 = vmatmul.bf16.vlgmr.msra.gmra.mxu0 %v582_v61  ;;  %v2185_v10 = vadd.f32 %v2184_v9, %v2172_v6 }
  0xe2   :  { %2422 = vmatpush.bf16.msrb.mxu0 %v3646_v57  ;;  %2391 = vmatmul.bf16.vlgmr.msra.gmra.mxu1 %v583_v63 }
  0xe3   :  { %2435 = vmatpush.bf16.msrb.mxu1 %v3654_v58  ;;  %2404 = vmatmul.bf16.vlgmr.msra.gmra.mxu2 %v584_v62 }
  0xe4   :  { %2417 = vmatmul.bf16.vlgmr.msra.gmra.mxu3 %v585_v0 }
  0xe6   :  { %2423 = vmatpush.bf16.msrb.mxu0 %v3645_v1  ;;  %v2197_v13 = vpop.f32.mrf.mxu2  ;;  %v2173_v15 = vpop.f32.mrf.mxu0 }
  0xe7   :  { %2436 = vmatpush.bf16.msrb.mxu1 %v3653_v2  ;;  %v2198_v14 = vadd.f32 %v2197_v13, %v2185_v10  ;;  %v2210_v16 = vpop.f32.mrf.mxu3  ;;  %v2186_v20 = vpop.f32.mrf.mxu1 }
  0xe9   :  { %v2211_v18 = vadd.f32 %v2210_v16, %v2198_v14 }
  0xea   :  { %2424 = vmatpush.bf16.msrb.mxu0 %v3644_v3 }
  0xeb   :  { %2437 = vmatpush.bf16.msrb.mxu1 %v3652_v4 }
  0xee   :  { %2425 = vmatpush.bf16.msrb.mxu0 %v3643_v7  ;;  %v2199_v24 = vpop.f32.mrf.mxu2 }
  0xef   :  { %2438 = vmatpush.bf16.msrb.mxu1 %v3651_v8  ;;  %v2212_v28 = vpop.f32.mrf.mxu3 }
  0xf2   :  { %2426 = vmatpush.bf16.msrb.mxu0 %v3642_v11 }
  0xf3   :  { %2439 = vmatpush.bf16.msrb.mxu1 %v3650_v12 }
  0xf6   :  { %2427 = vmatpush.bf16.msrb.mxu0 %v3641_v17 }
  0xf7   :  { %2440 = vmatpush.bf16.msrb.mxu1 %v3649_v19 }
  0xfa   :  { %2428 = vmatpush.bf16.msrb.mxu0 %v3640_v21 }
  0xfb   :  { %2441 = vmatpush.bf16.msrb.mxu1 %v3648_v23 }
  0xfe   :  { %2429 = vmatpush.bf16.msrb.mxu0 %v3639_v26  ;;  %v2223_v32 = vpop.f32.mrf.mxu0 }
  0xff   :  { %2442 = vmatpush.bf16.msrb.mxu1 %v3647_v29  ;;  %v2224_v33 = vadd.f32 %v2223_v32, %v2211_v18  ;;  %v2236_v34 = vpop.f32.mrf.mxu1 }
 0x101   :  { %2430 = vmatmul.bf16.vlgmr.msrb.gmra.mxu0 %v586_v30  ;;  %v2237_v35 = vadd.f32 %v2236_v34, %v2224_v33 }
 0x102   :  { %2443 = vmatmul.bf16.vlgmr.msrb.gmra.mxu1 %v587_v31 }
 0x106   :  { %v2249_v36 = vpop.f32.mrf.mxu2  ;;  %v2225_v39 = vpop.f32.mrf.mxu0 }
 0x107   :  { %v2250_v37 = vadd.f32 %v2249_v36, %v2237_v35  ;;  %v2262_v38 = vpop.f32.mrf.mxu3  ;;  %v2238_v40 = vpop.f32.mrf.mxu1 }
 0x109   :  { %v2263_v41 = vadd.f32 %v2262_v38, %v2250_v37 }
 0x10e   :  { %v2251_v42 = vpop.f32.mrf.mxu2 }
 0x10f   :  { %v2264_v43 = vpop.f32.mrf.mxu3 }
 0x11e   :  { %v2275_v44 = vpop.f32.mrf.mxu0 }
 0x11f   :  { %v2276_v45 = vadd.f32 %v2275_v44, %v2263_v41  ;;  %v2288_v46 = vpop.f32.mrf.mxu1 }
 0x121   :  { %v2289_v47 = vadd.f32 %v2288_v46, %v2276_v45 }
 0x126   :  { %v2301_v48 = vpop.f32.mrf.mxu2  ;;  %v2277_v50 = vpop.f32.mrf.mxu0 }
 0x127   :  { %v2314_v49 = vpop.f32.mrf.mxu3  ;;  %v2290_v51 = vpop.f32.mrf.mxu1  ;;  %v2302_v63 = vadd.f32 %v2301_v48, %v2289_v47 }
 0x129   :  { %v2315_v1 = vadd.f32 %v2314_v49, %v2302_v63 }
 0x12e   :  { %v2303_v52 = vpop.f32.mrf.mxu2 }
 0x12f   :  { %v2316_v53 = vpop.f32.mrf.mxu3 }
 0x13e   :  { %v2327_v54 = vpop.f32.mrf.mxu0 }
 0x13f   :  { %v2340_v55 = vpop.f32.mrf.mxu1  ;;  %v2328_v2 = vadd.f32 %v2327_v54, %v2315_v1 }
 0x141   :  { %v2341_v7 = vadd.f32 %v2340_v55, %v2328_v2 }
 0x146   :  { %v2353_v56 = vpop.f32.mrf.mxu2  ;;  %v2329_v58 = vpop.f32.mrf.mxu0 }
 0x147   :  { %v2366_v57 = vpop.f32.mrf.mxu3  ;;  %v2342_v59 = vpop.f32.mrf.mxu1  ;;  %v2354_v8 = vadd.f32 %v2353_v56, %v2341_v7 }
 0x149   :  { %v2367_v10 = vadd.f32 %v2366_v57, %v2354_v8 }
 0x14e   :  { %v2355_v60 = vpop.f32.mrf.mxu2 }
 0x14f   :  { %v2368_v61 = vpop.f32.mrf.mxu3 }
 0x15e   :  { %v2379_v62 = vpop.f32.mrf.mxu0 }
 0x15f   :  { %v2392_v0 = vpop.f32.mrf.mxu1  ;;  %v2380_v12 = vadd.f32 %v2379_v62, %v2367_v10 }
 0x161   :  { %v2393_v13 = vadd.f32 %v2392_v0, %v2380_v12 }
 0x166   :  { %v2405_v3 = vpop.f32.mrf.mxu2  ;;  %v2381_v4 = vpop.f32.mrf.mxu0 }
 0x167   :  { %v2418_v5 = vpop.f32.mrf.mxu3  ;;  %v2394_v6 = vpop.f32.mrf.mxu1  ;;  %v2406_v14 = vadd.f32 %v2405_v3, %v2393_v13 }
 0x169   :  { %v2419_v15 = vadd.f32 %v2418_v5, %v2406_v14 }
 0x16e   :  { %v2407_v9 = vpop.f32.mrf.mxu2 }
 0x16f   :  { %v2420_v11 = vpop.f32.mrf.mxu3 }
 0x17e   :  { %v2431_v16 = vpop.f32.mrf.mxu0 }
 0x17f   :  { %v2432_v17 = vadd.f32 %v2431_v16, %v2419_v15  ;;  %v2444_v18 = vpop.f32.mrf.mxu1 }
 0x181   :  { %v2445_v19 = vadd.f32 %v2444_v18, %v2432_v17 }
 0x183   :  { %v2448_v20 = vmax.f32 %v2445_v19, 0.0 }
 0x185   :  { %v2449_v21 = vpack.c.bf16 %v2448_v20, %v2448_v20 }
 0x186   :  { %v2433_v22 = vpop.f32.mrf.mxu0 }
 0x187   :  { %2450 = vst [vmem:[%s4453_s3] sm:$0xf] %v2449_v21  ;;  %v2446_v23 = vpop.f32.mrf.mxu1 }

</bundles_post_ra>
